<compile_context>
chip_gen: v6e
topology: v6e:2x2x1
jax: 0.10.0
libtpu: 0.0.40
codegen_flags: <defaults>
</compile_context>

<pallas_src>
import math

import jax
import jax.numpy as jnp
from jax.experimental import pallas as pl
from jax.experimental.pallas import tpu as pltpu

# ----------------------------- model hyper-params ---------------------------
D_MODEL = 32
N_HEADS = 4
D_K = D_MODEL // N_HEADS
D_FF = 64
N_LAYERS = 2
VOCAB = 16
MAX_LEN = 32
LN_EPS = 1e-5
NEG_INF = -1e9

QKV_W = 3 * D_MODEL          # 96  : [Wq | Wk | Wv] columns
ATTN_W = 4 * D_MODEL         # 128 : [Wq | Wk | Wv | Wo] columns (lane-dense slab)
VEC_WIDTH = QKV_W            # all bias / LN vectors padded to 96 lanes


# ------------------------- vector-slab layout (static) ----------------------
def _build_vec_layout():
    entries = []
    for l in range(N_LAYERS):
        entries += [(f"enc{l}_ln1_g", D_MODEL), (f"enc{l}_ln1_b", D_MODEL),
                    (f"enc{l}_bqkv", QKV_W), (f"enc{l}_bo", D_MODEL),
                    (f"enc{l}_ln2_g", D_MODEL), (f"enc{l}_ln2_b", D_MODEL),
                    (f"enc{l}_bff1", D_FF), (f"enc{l}_bff2", D_MODEL)]
    for l in range(N_LAYERS):
        entries += [(f"dec{l}_ln1_g", D_MODEL), (f"dec{l}_ln1_b", D_MODEL),
                    (f"dec{l}_s_bqkv", QKV_W), (f"dec{l}_s_bo", D_MODEL),
                    (f"dec{l}_ln2_g", D_MODEL), (f"dec{l}_ln2_b", D_MODEL),
                    (f"dec{l}_c_bqkv", QKV_W), (f"dec{l}_c_bo", D_MODEL),
                    (f"dec{l}_ln3_g", D_MODEL), (f"dec{l}_ln3_b", D_MODEL),
                    (f"dec{l}_bff1", D_FF), (f"dec{l}_bff2", D_MODEL)]
    entries += [("enc_ln_g", D_MODEL), ("enc_ln_b", D_MODEL),
                ("dec_ln_g", D_MODEL), ("dec_ln_b", D_MODEL)]
    row = {k: i for i, (k, _) in enumerate(entries)}
    width = {k: w for k, w in entries}
    return entries, row, width


_VEC_ENTRIES, _VEC_ROW, _VEC_WDT = _build_vec_layout()
_N_VEC = len(_VEC_ENTRIES)


# --------------------------- fused encoder-decoder kernel -------------------
def _make_kernel(Rs, Rt):
    """Rs = B*S_src, Rt = B*S_tgt (batch folded into the row axis).
    Whole encoder+decoder stack runs in one program with everything in VMEM."""
    scale = 1.0 / math.sqrt(D_K)

    def kernel(acts_ref, mask_ref, wattn_ref, wff1_ref, wff2_ref, vec_ref, o_ref):
        vecs = vec_ref[...]                                   # (_N_VEC, 96)

        def vec_row(key):                                     # (1, width) static slice
            r = _VEC_ROW[key]
            return vecs[r:r + 1, :_VEC_WDT[key]]

        def layer_norm(x, gk, bk):
            # one-pass LN: var = E[x^2] - mean^2 (independent reductions)
            mean = jnp.mean(x, axis=-1, keepdims=True)
            mean2 = jnp.mean(x * x, axis=-1, keepdims=True)
            var = mean2 - mean * mean
            return (x - mean) * jax.lax.rsqrt(var + LN_EPS) * vec_row(gk) + vec_row(bk)

        def ffn(x, idx, b1k, b2k):
            h = jnp.dot(x, wff1_ref[idx], preferred_element_type=jnp.float32) + vec_row(b1k)
            h = jnp.maximum(h, 0.0)
            return jnp.dot(h, wff2_ref[idx], preferred_element_type=jnp.float32) + vec_row(b2k)

        def attend(q, k, v, wo, bo, bias):
            # q,k,v: (Rq,32)/(Rk,32) with heads as static lane slices; bias: (Rq,Rk)
            heads = []
            for h in range(N_HEADS):
                sl = slice(h * D_K, (h + 1) * D_K)
                s = jax.lax.dot_general(q[:, sl], k[:, sl], (((1,), (1,)), ((), ())),
                                        preferred_element_type=jnp.float32) * scale
                s = s + bias                                   # additive mask, hoisted
                s = s - jnp.max(s, axis=-1, keepdims=True)
                p = jnp.exp(s)
                p = p * pl.reciprocal(jnp.sum(p, axis=-1, keepdims=True), approx=True)
                heads.append(jnp.dot(p, v[:, sl], preferred_element_type=jnp.float32))
            ctx = jnp.concatenate(heads, axis=-1)              # (Rq, 32)
            return jnp.dot(ctx, wo, preferred_element_type=jnp.float32) + bo

        def mha_self(x, blk, bqkv_k, bo_k, bias):
            w = wattn_ref[blk]                                 # (32, 128) = [Wq|Wk|Wv|Wo]
            qkv = jnp.dot(x, w[:, :QKV_W],
                          preferred_element_type=jnp.float32) + vec_row(bqkv_k)
            return attend(qkv[:, :D_MODEL], qkv[:, D_MODEL:2 * D_MODEL],
                          qkv[:, 2 * D_MODEL:QKV_W], w[:, QKV_W:], vec_row(bo_k), bias)

        def mha_cross(xq, xkv, blk, bqkv_k, bo_k, bias):
            w = wattn_ref[blk]
            bqkv = vec_row(bqkv_k)
            q = jnp.dot(xq, w[:, :D_MODEL],
                        preferred_element_type=jnp.float32) + bqkv[:, :D_MODEL]
            kv = jnp.dot(xkv, w[:, D_MODEL:QKV_W],
                         preferred_element_type=jnp.float32) + bqkv[:, D_MODEL:]
            return attend(q, kv[:, :D_MODEL], kv[:, D_MODEL:],
                          w[:, QKV_W:], vec_row(bo_k), bias)

        masks = mask_ref[...]                                  # packed additive biases
        enc_bias = masks[0:Rs, 0:Rs]
        cross_bias = masks[Rs:Rs + Rt, 0:Rs]
        dec_bias = masks[Rs + Rt:Rs + 2 * Rt, 0:Rt]

        acts = acts_ref[...]                                   # (Rs+Rt, 32)

        # ------------------------------ encoder ------------------------------
        x = acts[0:Rs, :]
        for l in range(N_LAYERS):
            xn = layer_norm(x, f"enc{l}_ln1_g", f"enc{l}_ln1_b")
            x = x + mha_self(xn, l, f"enc{l}_bqkv", f"enc{l}_bo", enc_bias)
            xn = layer_norm(x, f"enc{l}_ln2_g", f"enc{l}_ln2_b")
            x = x + ffn(xn, l, f"enc{l}_bff1", f"enc{l}_bff2")
        memory = layer_norm(x, "enc_ln_g", "enc_ln_b")

        # ------------------------------ decoder ------------------------------
        x = acts[Rs:Rs + Rt, :]
        for l in range(N_LAYERS):
            xn = layer_norm(x, f"dec{l}_ln1_g", f"dec{l}_ln1_b")
            x = x + mha_self(xn, N_LAYERS + 2 * l,
                             f"dec{l}_s_bqkv", f"dec{l}_s_bo", dec_bias)
            xn = layer_norm(x, f"dec{l}_ln2_g", f"dec{l}_ln2_b")
            x = x + mha_cross(xn, memory, N_LAYERS + 2 * l + 1,
                              f"dec{l}_c_bqkv", f"dec{l}_c_bo", cross_bias)
            xn = layer_norm(x, f"dec{l}_ln3_g", f"dec{l}_ln3_b")
            x = x + ffn(xn, N_LAYERS + l, f"dec{l}_bff1", f"dec{l}_bff2")
        x = layer_norm(x, "dec_ln_g", "dec_ln_b")

        # Output is tiny (Rt x 32); lane-dense (B, St*D) packing is only worth it
        # at larger shapes, and an in-kernel (16,32)->(2,256) relayout costs more
        # than the masked store it would save here.
        o_ref[...] = x

    return kernel


# ----------------------------- host-side packing -----------------------------
def _pack_params(params):
    def qkvo(a):  # (D, 4D) = [Wq | Wk | Wv | Wo]
        return jnp.concatenate([a["wq"], a["wk"], a["wv"], a["wo"]], axis=1)

    attn_blocks = [qkvo(lp["attn"]) for lp in params["enc_layers"]]
    for lp in params["dec_layers"]:
        attn_blocks.append(qkvo(lp["self_attn"]))
        attn_blocks.append(qkvo(lp["cross_attn"]))
    w_attn = jnp.stack(attn_blocks, 0)                                   # (6, 32, 128)

    all_layers = params["enc_layers"] + params["dec_layers"]
    w_ff1 = jnp.stack([lp["ffn_w1"] for lp in all_layers], 0)            # (4, 32, 64)
    w_ff2 = jnp.stack([lp["ffn_w2"] for lp in all_layers], 0)            # (4, 64, 32)

    vals = {}
    for l, lp in enumerate(params["enc_layers"]):
        a = lp["attn"]
        vals[f"enc{l}_ln1_g"] = lp["ln1_g"]; vals[f"enc{l}_ln1_b"] = lp["ln1_b"]
        vals[f"enc{l}_bqkv"] = jnp.concatenate([a["bq"], a["bk"], a["bv"]])
        vals[f"enc{l}_bo"] = a["bo"]
        vals[f"enc{l}_ln2_g"] = lp["ln2_g"]; vals[f"enc{l}_ln2_b"] = lp["ln2_b"]
        vals[f"enc{l}_bff1"] = lp["ffn_b1"]; vals[f"enc{l}_bff2"] = lp["ffn_b2"]
    for l, lp in enumerate(params["dec_layers"]):
        sa, ca = lp["self_attn"], lp["cross_attn"]
        vals[f"dec{l}_ln1_g"] = lp["ln1_g"]; vals[f"dec{l}_ln1_b"] = lp["ln1_b"]
        vals[f"dec{l}_s_bqkv"] = jnp.concatenate([sa["bq"], sa["bk"], sa["bv"]])
        vals[f"dec{l}_s_bo"] = sa["bo"]
        vals[f"dec{l}_ln2_g"] = lp["ln2_g"]; vals[f"dec{l}_ln2_b"] = lp["ln2_b"]
        vals[f"dec{l}_c_bqkv"] = jnp.concatenate([ca["bq"], ca["bk"], ca["bv"]])
        vals[f"dec{l}_c_bo"] = ca["bo"]
        vals[f"dec{l}_ln3_g"] = lp["ln3_g"]; vals[f"dec{l}_ln3_b"] = lp["ln3_b"]
        vals[f"dec{l}_bff1"] = lp["ffn_b1"]; vals[f"dec{l}_bff2"] = lp["ffn_b2"]
    vals["enc_ln_g"] = params["enc_ln_g"]; vals["enc_ln_b"] = params["enc_ln_b"]
    vals["dec_ln_g"] = params["dec_ln_g"]; vals["dec_ln_b"] = params["dec_ln_b"]

    rows = []
    for key, width in _VEC_ENTRIES:
        v = vals[key].reshape(-1).astype(jnp.float32)
        rows.append(jnp.pad(v, (0, VEC_WIDTH - width)))
    vec_slab = jnp.stack(rows, 0)                                        # (44, 96)
    return w_attn, w_ff1, w_ff2, vec_slab


def _embed(tokens, table, pe):
    # embedding gather is pure XLA in the wrapper (no one-hot matmul kernel)
    S = tokens.shape[1]
    e = jnp.take(table, tokens, axis=0) * math.sqrt(D_MODEL)
    return e + pe[None, :S, :]


# ------------------------------ forward wrapper ------------------------------
@jax.jit
def encoder_decoder_forward(params, src, src_mask, tgt, tgt_mask):
    # == EncoderDecoder.forward: decode(encode(src, src_mask), src_mask, tgt, tgt_mask)
    # TODO(synk): generator (final Linear + log_softmax) is intentionally not
    # applied, matching the reference forward(); dropout omitted (eval mode).
    B, Ss = src.shape
    St = tgt.shape[1]
    Rs, Rt = B * Ss, B * St

    x_src = _embed(src, params["src_emb"], params["pe"]).reshape(Rs, D_MODEL)
    x_tgt = _embed(tgt, params["tgt_emb"], params["pe"]).reshape(Rt, D_MODEL)
    acts = jnp.concatenate([x_src, x_tgt], axis=0)                       # (Rs+Rt, 32)

    # Block-diagonal additive mask biases over the batch-folded row axis,
    # packed into ONE slab: [enc self | cross | dec self].
    col_valid_src = src_mask.reshape(Rs) > 0.5                           # (Rs,)
    rb_s = jnp.arange(Rs) // Ss
    rb_t = jnp.arange(Rt) // St
    rp_t = jnp.arange(Rt) % St

    enc_valid = (rb_s[:, None] == rb_s[None, :]) & col_valid_src[None, :]
    cross_valid = (rb_t[:, None] == rb_s[None, :]) & col_valid_src[None, :]
    tm = tgt_mask[rb_t[:, None], rp_t[:, None], rp_t[None, :]] > 0.5     # (Rt, Rt)
    dec_valid = (rb_t[:, None] == rb_t[None, :]) & tm

    def to_bias(v):
        return jnp.where(v, 0.0, NEG_INF).astype(jnp.float32)

    cmax = max(Rs, Rt)

    def padc(m):
        return jnp.pad(m, ((0, 0), (0, cmax - m.shape[1])), constant_values=NEG_INF)

    mask_slab = jnp.concatenate([padc(to_bias(enc_valid)),
                                 padc(to_bias(cross_valid)),
                                 padc(to_bias(dec_valid))], axis=0)      # (Rs+2Rt, cmax)

    w_attn, w_ff1, w_ff2, vec_slab = _pack_params(params)

    inputs = (acts, mask_slab, w_attn, w_ff1, w_ff2, vec_slab)
    out = pl.pallas_call(
        _make_kernel(Rs, Rt),
        out_shape=jax.ShapeDtypeStruct((Rt, D_MODEL), jnp.float32),
        in_specs=[pl.BlockSpec(memory_space=pltpu.MemorySpace.VMEM)] * len(inputs),
        out_specs=pl.BlockSpec(memory_space=pltpu.MemorySpace.VMEM),
    )(*inputs)
    return out.reshape(B, St, D_MODEL)


# ------------------------------ parameter init -------------------------------
def _dense_init(key, fan_in, fan_out):
    w = jax.random.normal(key, (fan_in, fan_out), jnp.float32) / math.sqrt(fan_in)
    b = jnp.zeros((fan_out,), jnp.float32)
    return w, b


def _init_attn(key):
    ks = jax.random.split(key, 4)
    p = {}
    for name, k in zip(("q", "k", "v", "o"), ks):
        w, b = _dense_init(k, D_MODEL, D_MODEL)
        p["w" + name], p["b" + name] = w, b
    return p


def _init_enc_layer(key):
    k1, k2, k3 = jax.random.split(key, 3)
    w1, b1 = _dense_init(k2, D_MODEL, D_FF)
    w2, b2 = _dense_init(k3, D_FF, D_MODEL)
    return {"attn": _init_attn(k1),
            "ln1_g": jnp.ones(D_MODEL), "ln1_b": jnp.zeros(D_MODEL),
            "ln2_g": jnp.ones(D_MODEL), "ln2_b": jnp.zeros(D_MODEL),
            "ffn_w1": w1, "ffn_b1": b1, "ffn_w2": w2, "ffn_b2": b2}


def _init_dec_layer(key):
    k1, k2, k3, k4 = jax.random.split(key, 4)
    w1, b1 = _dense_init(k3, D_MODEL, D_FF)
    w2, b2 = _dense_init(k4, D_FF, D_MODEL)
    return {"self_attn": _init_attn(k1), "cross_attn": _init_attn(k2),
            "ln1_g": jnp.ones(D_MODEL), "ln1_b": jnp.zeros(D_MODEL),
            "ln2_g": jnp.ones(D_MODEL), "ln2_b": jnp.zeros(D_MODEL),
            "ln3_g": jnp.ones(D_MODEL), "ln3_b": jnp.zeros(D_MODEL),
            "ffn_w1": w1, "ffn_b1": b1, "ffn_w2": w2, "ffn_b2": b2}


def _positional_encoding(max_len, d):
    pos = jnp.arange(max_len, dtype=jnp.float32)[:, None]
    div = jnp.exp(jnp.arange(0, d, 2, dtype=jnp.float32) * (-math.log(10000.0) / d))
    pe = jnp.zeros((max_len, d), jnp.float32)
    pe = pe.at[:, 0::2].set(jnp.sin(pos * div))
    pe = pe.at[:, 1::2].set(jnp.cos(pos * div))
    return pe


def init_params(key):
    ks = jax.random.split(key, 2 + 2 * N_LAYERS)
    return {
        "src_emb": jax.random.normal(ks[0], (VOCAB, D_MODEL), jnp.float32) * 0.1,
        "tgt_emb": jax.random.normal(ks[1], (VOCAB, D_MODEL), jnp.float32) * 0.1,
        "pe": _positional_encoding(MAX_LEN, D_MODEL),
        "enc_layers": [_init_enc_layer(ks[2 + i]) for i in range(N_LAYERS)],
        "dec_layers": [_init_dec_layer(ks[2 + N_LAYERS + i]) for i in range(N_LAYERS)],
        "enc_ln_g": jnp.ones(D_MODEL), "enc_ln_b": jnp.zeros(D_MODEL),
        "dec_ln_g": jnp.ones(D_MODEL), "dec_ln_b": jnp.zeros(D_MODEL),
    }


# ------------------------------------ main -----------------------------------
if __name__ == "__main__":
    B, S_SRC, S_TGT = 2, 8, 8

    key = jax.random.PRNGKey(0)
    k_src, k_tgt = jax.random.split(key)
    src = jax.random.randint(k_src, (B, S_SRC), 0, VOCAB, dtype=jnp.int32)
    tgt = jax.random.randint(k_tgt, (B, S_TGT), 0, VOCAB, dtype=jnp.int32)

    # src_mask: (B, 1, S_src) padding mask (second example has 2 padded positions)
    src_lens = jnp.array([S_SRC, S_SRC - 2])
    src_pad = (jnp.arange(S_SRC)[None, :] < src_lens[:, None]).astype(jnp.float32)
    src_mask = src_pad[:, None, :]
    # tgt_mask: (B, S_tgt, S_tgt) causal mask
    causal = jnp.tril(jnp.ones((S_TGT, S_TGT), jnp.float32))
    tgt_mask = jnp.broadcast_to(causal[None, :, :], (B, S_TGT, S_TGT))

    params = init_params(jax.random.PRNGKey(42))

    out = encoder_decoder_forward(params, src, src_mask, tgt, tgt_mask)
    out = jax.block_until_ready(out)

    assert out.shape == (B, S_TGT, D_MODEL), out.shape
    assert bool(jnp.all(jnp.isfinite(out)))
    print("KERNEL_OK")
</pallas_src>

<mosaic_0001>
module attributes {stable_mosaic.version = 11 : i64} {
  func.func @kernel(%arg0: memref<32x32xf32, #tpu.memory_space<vmem>>, %arg1: memref<48x16xf32, #tpu.memory_space<vmem>>, %arg2: memref<6x32x128xf32, #tpu.memory_space<vmem>>, %arg3: memref<4x32x64xf32, #tpu.memory_space<vmem>>, %arg4: memref<4x64x32xf32, #tpu.memory_space<vmem>>, %arg5: memref<44x96xf32, #tpu.memory_space<vmem>>, %arg6: memref<16x32xf32, #tpu.memory_space<vmem>>) attributes {dimension_semantics = [], scalar_prefetch = 0 : i64, scratch_operands = 0 : i64, tpu.core_type = #tpu.core_type<tc>} {
    %c0 = arith.constant 0 : index
    %c0_0 = arith.constant 0 : index
    %0 = vector.load %arg5[%c0, %c0_0] : memref<44x96xf32, #tpu.memory_space<vmem>>, vector<44x96xf32>
    %c0_1 = arith.constant 0 : index
    %c0_2 = arith.constant 0 : index
    %1 = vector.load %arg1[%c0_1, %c0_2] : memref<48x16xf32, #tpu.memory_space<vmem>>, vector<48x16xf32>
    %2 = vector.extract_strided_slice %1 {offsets = [0, 0], sizes = [16, 16], strides = [1, 1]} : vector<48x16xf32> to vector<16x16xf32>
    %3 = vector.extract_strided_slice %1 {offsets = [16, 0], sizes = [16, 16], strides = [1, 1]} : vector<48x16xf32> to vector<16x16xf32>
    %4 = vector.extract_strided_slice %1 {offsets = [32, 0], sizes = [16, 16], strides = [1, 1]} : vector<48x16xf32> to vector<16x16xf32>
    %c0_3 = arith.constant 0 : index
    %c0_4 = arith.constant 0 : index
    %5 = vector.load %arg0[%c0_3, %c0_4] : memref<32x32xf32, #tpu.memory_space<vmem>>, vector<32x32xf32>
    %6 = vector.extract_strided_slice %5 {offsets = [0, 0], sizes = [16, 32], strides = [1, 1]} : vector<32x32xf32> to vector<16x32xf32>
    %cst = arith.constant dense<0.000000e+00> : vector<16xf32>
    %7 = vector.multi_reduction <add>, %6, %cst [1] : vector<16x32xf32> to vector<16xf32>
    %8 = vector.shape_cast %7 : vector<16xf32> to vector<16x1xf32>
    %cst_5 = arith.constant 3.200000e+01 : f32
    %9 = vector.broadcast %cst_5 : f32 to vector<16x1xf32>
    %10 = arith.divf %8, %9 : vector<16x1xf32>
    %11 = arith.mulf %6, %6 : vector<16x32xf32>
    %cst_6 = arith.constant dense<0.000000e+00> : vector<16xf32>
    %12 = vector.multi_reduction <add>, %11, %cst_6 [1] : vector<16x32xf32> to vector<16xf32>
    %13 = vector.shape_cast %12 : vector<16xf32> to vector<16x1xf32>
    %cst_7 = arith.constant 3.200000e+01 : f32
    %14 = vector.broadcast %cst_7 : f32 to vector<16x1xf32>
    %15 = arith.divf %13, %14 : vector<16x1xf32>
    %16 = arith.mulf %10, %10 : vector<16x1xf32>
    %17 = arith.subf %15, %16 : vector<16x1xf32>
    %18 = vector.broadcast %10 : vector<16x1xf32> to vector<16x32xf32>
    %19 = arith.subf %6, %18 : vector<16x32xf32>
    %cst_8 = arith.constant 9.99999974E-6 : f32
    %20 = vector.broadcast %cst_8 : f32 to vector<16x1xf32>
    %21 = arith.addf %17, %20 : vector<16x1xf32>
    %22 = math.rsqrt %21 : vector<16x1xf32>
    %23 = vector.broadcast %22 : vector<16x1xf32> to vector<16x32xf32>
    %24 = arith.mulf %19, %23 : vector<16x32xf32>
    %25 = vector.extract_strided_slice %0 {offsets = [0, 0], sizes = [1, 32], strides = [1, 1]} : vector<44x96xf32> to vector<1x32xf32>
    %26 = vector.broadcast %25 : vector<1x32xf32> to vector<16x32xf32>
    %27 = arith.mulf %24, %26 : vector<16x32xf32>
    %28 = vector.extract_strided_slice %0 {offsets = [1, 0], sizes = [1, 32], strides = [1, 1]} : vector<44x96xf32> to vector<1x32xf32>
    %29 = vector.broadcast %28 : vector<1x32xf32> to vector<16x32xf32>
    %30 = arith.addf %27, %29 : vector<16x32xf32>
    %c0_9 = arith.constant 0 : index
    %c0_10 = arith.constant 0 : index
    %c0_11 = arith.constant 0 : index
    %31 = vector.load %arg2[%c0_9, %c0_10, %c0_11] : memref<6x32x128xf32, #tpu.memory_space<vmem>>, vector<1x32x128xf32>
    %32 = vector.shape_cast %31 : vector<1x32x128xf32> to vector<32x128xf32>
    %33 = vector.extract_strided_slice %32 {offsets = [0, 0], sizes = [32, 96], strides = [1, 1]} : vector<32x128xf32> to vector<32x96xf32>
    %cst_12 = arith.constant dense<0.000000e+00> : vector<16x96xf32>
    %34 = tpu.matmul %30, %33, %cst_12 {dimension_numbers = #tpu.dot_dimension_numbers<[1], [0], [0], [1], [0, 0, 1, 1], [], []>} : vector<16x32xf32>, vector<32x96xf32>, vector<16x96xf32> -> vector<16x96xf32>
    %35 = vector.extract_strided_slice %0 {offsets = [2, 0], sizes = [1, 96], strides = [1, 1]} : vector<44x96xf32> to vector<1x96xf32>
    %36 = vector.broadcast %35 : vector<1x96xf32> to vector<16x96xf32>
    %37 = arith.addf %34, %36 : vector<16x96xf32>
    %38 = vector.extract_strided_slice %37 {offsets = [0, 0], sizes = [16, 32], strides = [1, 1]} : vector<16x96xf32> to vector<16x32xf32>
    %39 = vector.extract_strided_slice %37 {offsets = [0, 32], sizes = [16, 32], strides = [1, 1]} : vector<16x96xf32> to vector<16x32xf32>
    %40 = vector.extract_strided_slice %37 {offsets = [0, 64], sizes = [16, 32], strides = [1, 1]} : vector<16x96xf32> to vector<16x32xf32>
    %41 = vector.extract_strided_slice %32 {offsets = [0, 96], sizes = [32, 32], strides = [1, 1]} : vector<32x128xf32> to vector<32x32xf32>
    %42 = vector.extract_strided_slice %0 {offsets = [3, 0], sizes = [1, 32], strides = [1, 1]} : vector<44x96xf32> to vector<1x32xf32>
    %43 = vector.extract_strided_slice %38 {offsets = [0, 0], sizes = [16, 8], strides = [1, 1]} : vector<16x32xf32> to vector<16x8xf32>
    %44 = vector.extract_strided_slice %39 {offsets = [0, 0], sizes = [16, 8], strides = [1, 1]} : vector<16x32xf32> to vector<16x8xf32>
    %cst_13 = arith.constant dense<0.000000e+00> : vector<16x16xf32>
    %45 = tpu.matmul %43, %44, %cst_13 {dimension_numbers = #tpu.dot_dimension_numbers<[1], [1], [0], [0], [0, 0, 1, 0], [], []>} : vector<16x8xf32>, vector<16x8xf32>, vector<16x16xf32> -> vector<16x16xf32>
    %cst_14 = arith.constant 0.353553385 : f32
    %46 = vector.broadcast %cst_14 : f32 to vector<16x16xf32>
    %47 = arith.mulf %45, %46 : vector<16x16xf32>
    %48 = arith.addf %47, %2 : vector<16x16xf32>
    %cst_15 = arith.constant dense<0xFF800000> : vector<16xf32>
    %49 = vector.multi_reduction <maximumf>, %48, %cst_15 [1] : vector<16x16xf32> to vector<16xf32>
    %50 = vector.shape_cast %49 : vector<16xf32> to vector<16x1xf32>
    %51 = vector.broadcast %50 : vector<16x1xf32> to vector<16x16xf32>
    %52 = arith.subf %48, %51 : vector<16x16xf32>
    %53 = math.exp %52 : vector<16x16xf32>
    %cst_16 = arith.constant dense<0.000000e+00> : vector<16xf32>
    %54 = vector.multi_reduction <add>, %53, %cst_16 [1] : vector<16x16xf32> to vector<16xf32>
    %55 = vector.shape_cast %54 : vector<16xf32> to vector<16x1xf32>
    %56 = tpu.reciprocal %55 {approx = true} : vector<16x1xf32> -> vector<16x1xf32>
    %57 = vector.broadcast %56 : vector<16x1xf32> to vector<16x16xf32>
    %58 = arith.mulf %53, %57 : vector<16x16xf32>
    %59 = vector.extract_strided_slice %40 {offsets = [0, 0], sizes = [16, 8], strides = [1, 1]} : vector<16x32xf32> to vector<16x8xf32>
    %cst_17 = arith.constant dense<0.000000e+00> : vector<16x8xf32>
    %60 = tpu.matmul %58, %59, %cst_17 {dimension_numbers = #tpu.dot_dimension_numbers<[1], [0], [0], [1], [0, 0, 1, 1], [], []>} : vector<16x16xf32>, vector<16x8xf32>, vector<16x8xf32> -> vector<16x8xf32>
    %61 = vector.extract_strided_slice %38 {offsets = [0, 8], sizes = [16, 8], strides = [1, 1]} : vector<16x32xf32> to vector<16x8xf32>
    %62 = vector.extract_strided_slice %39 {offsets = [0, 8], sizes = [16, 8], strides = [1, 1]} : vector<16x32xf32> to vector<16x8xf32>
    %cst_18 = arith.constant dense<0.000000e+00> : vector<16x16xf32>
    %63 = tpu.matmul %61, %62, %cst_18 {dimension_numbers = #tpu.dot_dimension_numbers<[1], [1], [0], [0], [0, 0, 1, 0], [], []>} : vector<16x8xf32>, vector<16x8xf32>, vector<16x16xf32> -> vector<16x16xf32>
    %cst_19 = arith.constant 0.353553385 : f32
    %64 = vector.broadcast %cst_19 : f32 to vector<16x16xf32>
    %65 = arith.mulf %63, %64 : vector<16x16xf32>
    %66 = arith.addf %65, %2 : vector<16x16xf32>
    %cst_20 = arith.constant dense<0xFF800000> : vector<16xf32>
    %67 = vector.multi_reduction <maximumf>, %66, %cst_20 [1] : vector<16x16xf32> to vector<16xf32>
    %68 = vector.shape_cast %67 : vector<16xf32> to vector<16x1xf32>
    %69 = vector.broadcast %68 : vector<16x1xf32> to vector<16x16xf32>
    %70 = arith.subf %66, %69 : vector<16x16xf32>
    %71 = math.exp %70 : vector<16x16xf32>
    %cst_21 = arith.constant dense<0.000000e+00> : vector<16xf32>
    %72 = vector.multi_reduction <add>, %71, %cst_21 [1] : vector<16x16xf32> to vector<16xf32>
    %73 = vector.shape_cast %72 : vector<16xf32> to vector<16x1xf32>
    %74 = tpu.reciprocal %73 {approx = true} : vector<16x1xf32> -> vector<16x1xf32>
    %75 = vector.broadcast %74 : vector<16x1xf32> to vector<16x16xf32>
    %76 = arith.mulf %71, %75 : vector<16x16xf32>
    %77 = vector.extract_strided_slice %40 {offsets = [0, 8], sizes = [16, 8], strides = [1, 1]} : vector<16x32xf32> to vector<16x8xf32>
    %cst_22 = arith.constant dense<0.000000e+00> : vector<16x8xf32>
    %78 = tpu.matmul %76, %77, %cst_22 {dimension_numbers = #tpu.dot_dimension_numbers<[1], [0], [0], [1], [0, 0, 1, 1], [], []>} : vector<16x16xf32>, vector<16x8xf32>, vector<16x8xf32> -> vector<16x8xf32>
    %79 = vector.extract_strided_slice %38 {offsets = [0, 16], sizes = [16, 8], strides = [1, 1]} : vector<16x32xf32> to vector<16x8xf32>
    %80 = vector.extract_strided_slice %39 {offsets = [0, 16], sizes = [16, 8], strides = [1, 1]} : vector<16x32xf32> to vector<16x8xf32>
    %cst_23 = arith.constant dense<0.000000e+00> : vector<16x16xf32>
    %81 = tpu.matmul %79, %80, %cst_23 {dimension_numbers = #tpu.dot_dimension_numbers<[1], [1], [0], [0], [0, 0, 1, 0], [], []>} : vector<16x8xf32>, vector<16x8xf32>, vector<16x16xf32> -> vector<16x16xf32>
    %cst_24 = arith.constant 0.353553385 : f32
    %82 = vector.broadcast %cst_24 : f32 to vector<16x16xf32>
    %83 = arith.mulf %81, %82 : vector<16x16xf32>
    %84 = arith.addf %83, %2 : vector<16x16xf32>
    %cst_25 = arith.constant dense<0xFF800000> : vector<16xf32>
    %85 = vector.multi_reduction <maximumf>, %84, %cst_25 [1] : vector<16x16xf32> to vector<16xf32>
    %86 = vector.shape_cast %85 : vector<16xf32> to vector<16x1xf32>
    %87 = vector.broadcast %86 : vector<16x1xf32> to vector<16x16xf32>
    %88 = arith.subf %84, %87 : vector<16x16xf32>
    %89 = math.exp %88 : vector<16x16xf32>
    %cst_26 = arith.constant dense<0.000000e+00> : vector<16xf32>
    %90 = vector.multi_reduction <add>, %89, %cst_26 [1] : vector<16x16xf32> to vector<16xf32>
    %91 = vector.shape_cast %90 : vector<16xf32> to vector<16x1xf32>
    %92 = tpu.reciprocal %91 {approx = true} : vector<16x1xf32> -> vector<16x1xf32>
    %93 = vector.broadcast %92 : vector<16x1xf32> to vector<16x16xf32>
    %94 = arith.mulf %89, %93 : vector<16x16xf32>
    %95 = vector.extract_strided_slice %40 {offsets = [0, 16], sizes = [16, 8], strides = [1, 1]} : vector<16x32xf32> to vector<16x8xf32>
    %cst_27 = arith.constant dense<0.000000e+00> : vector<16x8xf32>
    %96 = tpu.matmul %94, %95, %cst_27 {dimension_numbers = #tpu.dot_dimension_numbers<[1], [0], [0], [1], [0, 0, 1, 1], [], []>} : vector<16x16xf32>, vector<16x8xf32>, vector<16x8xf32> -> vector<16x8xf32>
    %97 = vector.extract_strided_slice %38 {offsets = [0, 24], sizes = [16, 8], strides = [1, 1]} : vector<16x32xf32> to vector<16x8xf32>
    %98 = vector.extract_strided_slice %39 {offsets = [0, 24], sizes = [16, 8], strides = [1, 1]} : vector<16x32xf32> to vector<16x8xf32>
    %cst_28 = arith.constant dense<0.000000e+00> : vector<16x16xf32>
    %99 = tpu.matmul %97, %98, %cst_28 {dimension_numbers = #tpu.dot_dimension_numbers<[1], [1], [0], [0], [0, 0, 1, 0], [], []>} : vector<16x8xf32>, vector<16x8xf32>, vector<16x16xf32> -> vector<16x16xf32>
    %cst_29 = arith.constant 0.353553385 : f32
    %100 = vector.broadcast %cst_29 : f32 to vector<16x16xf32>
    %101 = arith.mulf %99, %100 : vector<16x16xf32>
    %102 = arith.addf %101, %2 : vector<16x16xf32>
    %cst_30 = arith.constant dense<0xFF800000> : vector<16xf32>
    %103 = vector.multi_reduction <maximumf>, %102, %cst_30 [1] : vector<16x16xf32> to vector<16xf32>
    %104 = vector.shape_cast %103 : vector<16xf32> to vector<16x1xf32>
    %105 = vector.broadcast %104 : vector<16x1xf32> to vector<16x16xf32>
    %106 = arith.subf %102, %105 : vector<16x16xf32>
    %107 = math.exp %106 : vector<16x16xf32>
    %cst_31 = arith.constant dense<0.000000e+00> : vector<16xf32>
    %108 = vector.multi_reduction <add>, %107, %cst_31 [1] : vector<16x16xf32> to vector<16xf32>
    %109 = vector.shape_cast %108 : vector<16xf32> to vector<16x1xf32>
    %110 = tpu.reciprocal %109 {approx = true} : vector<16x1xf32> -> vector<16x1xf32>
    %111 = vector.broadcast %110 : vector<16x1xf32> to vector<16x16xf32>
    %112 = arith.mulf %107, %111 : vector<16x16xf32>
    %113 = vector.extract_strided_slice %40 {offsets = [0, 24], sizes = [16, 8], strides = [1, 1]} : vector<16x32xf32> to vector<16x8xf32>
    %cst_32 = arith.constant dense<0.000000e+00> : vector<16x8xf32>
    %114 = tpu.matmul %112, %113, %cst_32 {dimension_numbers = #tpu.dot_dimension_numbers<[1], [0], [0], [1], [0, 0, 1, 1], [], []>} : vector<16x16xf32>, vector<16x8xf32>, vector<16x8xf32> -> vector<16x8xf32>
    %115 = tpu.concatenate %60, %78, %96, %114 in 1 : vector<16x8xf32>, vector<16x8xf32>, vector<16x8xf32>, vector<16x8xf32> -> vector<16x32xf32>
    %cst_33 = arith.constant dense<0.000000e+00> : vector<16x32xf32>
    %116 = tpu.matmul %115, %41, %cst_33 {dimension_numbers = #tpu.dot_dimension_numbers<[1], [0], [0], [1], [0, 0, 1, 1], [], []>} : vector<16x32xf32>, vector<32x32xf32>, vector<16x32xf32> -> vector<16x32xf32>
    %117 = vector.broadcast %42 : vector<1x32xf32> to vector<16x32xf32>
    %118 = arith.addf %116, %117 : vector<16x32xf32>
    %119 = arith.addf %6, %118 : vector<16x32xf32>
    %cst_34 = arith.constant dense<0.000000e+00> : vector<16xf32>
    %120 = vector.multi_reduction <add>, %119, %cst_34 [1] : vector<16x32xf32> to vector<16xf32>
    %121 = vector.shape_cast %120 : vector<16xf32> to vector<16x1xf32>
    %cst_35 = arith.constant 3.200000e+01 : f32
    %122 = vector.broadcast %cst_35 : f32 to vector<16x1xf32>
    %123 = arith.divf %121, %122 : vector<16x1xf32>
    %124 = arith.mulf %119, %119 : vector<16x32xf32>
    %cst_36 = arith.constant dense<0.000000e+00> : vector<16xf32>
    %125 = vector.multi_reduction <add>, %124, %cst_36 [1] : vector<16x32xf32> to vector<16xf32>
    %126 = vector.shape_cast %125 : vector<16xf32> to vector<16x1xf32>
    %cst_37 = arith.constant 3.200000e+01 : f32
    %127 = vector.broadcast %cst_37 : f32 to vector<16x1xf32>
    %128 = arith.divf %126, %127 : vector<16x1xf32>
    %129 = arith.mulf %123, %123 : vector<16x1xf32>
    %130 = arith.subf %128, %129 : vector<16x1xf32>
    %131 = vector.broadcast %123 : vector<16x1xf32> to vector<16x32xf32>
    %132 = arith.subf %119, %131 : vector<16x32xf32>
    %cst_38 = arith.constant 9.99999974E-6 : f32
    %133 = vector.broadcast %cst_38 : f32 to vector<16x1xf32>
    %134 = arith.addf %130, %133 : vector<16x1xf32>
    %135 = math.rsqrt %134 : vector<16x1xf32>
    %136 = vector.broadcast %135 : vector<16x1xf32> to vector<16x32xf32>
    %137 = arith.mulf %132, %136 : vector<16x32xf32>
    %138 = vector.extract_strided_slice %0 {offsets = [4, 0], sizes = [1, 32], strides = [1, 1]} : vector<44x96xf32> to vector<1x32xf32>
    %139 = vector.broadcast %138 : vector<1x32xf32> to vector<16x32xf32>
    %140 = arith.mulf %137, %139 : vector<16x32xf32>
    %141 = vector.extract_strided_slice %0 {offsets = [5, 0], sizes = [1, 32], strides = [1, 1]} : vector<44x96xf32> to vector<1x32xf32>
    %142 = vector.broadcast %141 : vector<1x32xf32> to vector<16x32xf32>
    %143 = arith.addf %140, %142 : vector<16x32xf32>
    %c0_39 = arith.constant 0 : index
    %c0_40 = arith.constant 0 : index
    %c0_41 = arith.constant 0 : index
    %144 = vector.load %arg3[%c0_39, %c0_40, %c0_41] : memref<4x32x64xf32, #tpu.memory_space<vmem>>, vector<1x32x64xf32>
    %145 = vector.shape_cast %144 : vector<1x32x64xf32> to vector<32x64xf32>
    %cst_42 = arith.constant dense<0.000000e+00> : vector<16x64xf32>
    %146 = tpu.matmul %143, %145, %cst_42 {dimension_numbers = #tpu.dot_dimension_numbers<[1], [0], [0], [1], [0, 0, 1, 1], [], []>} : vector<16x32xf32>, vector<32x64xf32>, vector<16x64xf32> -> vector<16x64xf32>
    %147 = vector.extract_strided_slice %0 {offsets = [6, 0], sizes = [1, 64], strides = [1, 1]} : vector<44x96xf32> to vector<1x64xf32>
    %148 = vector.broadcast %147 : vector<1x64xf32> to vector<16x64xf32>
    %149 = arith.addf %146, %148 : vector<16x64xf32>
    %cst_43 = arith.constant 0.000000e+00 : f32
    %150 = vector.broadcast %cst_43 : f32 to vector<16x64xf32>
    %151 = arith.maximumf %149, %150 : vector<16x64xf32>
    %c0_44 = arith.constant 0 : index
    %c0_45 = arith.constant 0 : index
    %c0_46 = arith.constant 0 : index
    %152 = vector.load %arg4[%c0_44, %c0_45, %c0_46] : memref<4x64x32xf32, #tpu.memory_space<vmem>>, vector<1x64x32xf32>
    %153 = vector.shape_cast %152 : vector<1x64x32xf32> to vector<64x32xf32>
    %cst_47 = arith.constant dense<0.000000e+00> : vector<16x32xf32>
    %154 = tpu.matmul %151, %153, %cst_47 {dimension_numbers = #tpu.dot_dimension_numbers<[1], [0], [0], [1], [0, 0, 1, 1], [], []>} : vector<16x64xf32>, vector<64x32xf32>, vector<16x32xf32> -> vector<16x32xf32>
    %155 = vector.extract_strided_slice %0 {offsets = [7, 0], sizes = [1, 32], strides = [1, 1]} : vector<44x96xf32> to vector<1x32xf32>
    %156 = vector.broadcast %155 : vector<1x32xf32> to vector<16x32xf32>
    %157 = arith.addf %154, %156 : vector<16x32xf32>
    %158 = arith.addf %119, %157 : vector<16x32xf32>
    %cst_48 = arith.constant dense<0.000000e+00> : vector<16xf32>
    %159 = vector.multi_reduction <add>, %158, %cst_48 [1] : vector<16x32xf32> to vector<16xf32>
    %160 = vector.shape_cast %159 : vector<16xf32> to vector<16x1xf32>
    %cst_49 = arith.constant 3.200000e+01 : f32
    %161 = vector.broadcast %cst_49 : f32 to vector<16x1xf32>
    %162 = arith.divf %160, %161 : vector<16x1xf32>
    %163 = arith.mulf %158, %158 : vector<16x32xf32>
    %cst_50 = arith.constant dense<0.000000e+00> : vector<16xf32>
    %164 = vector.multi_reduction <add>, %163, %cst_50 [1] : vector<16x32xf32> to vector<16xf32>
    %165 = vector.shape_cast %164 : vector<16xf32> to vector<16x1xf32>
    %cst_51 = arith.constant 3.200000e+01 : f32
    %166 = vector.broadcast %cst_51 : f32 to vector<16x1xf32>
    %167 = arith.divf %165, %166 : vector<16x1xf32>
    %168 = arith.mulf %162, %162 : vector<16x1xf32>
    %169 = arith.subf %167, %168 : vector<16x1xf32>
    %170 = vector.broadcast %162 : vector<16x1xf32> to vector<16x32xf32>
    %171 = arith.subf %158, %170 : vector<16x32xf32>
    %cst_52 = arith.constant 9.99999974E-6 : f32
    %172 = vector.broadcast %cst_52 : f32 to vector<16x1xf32>
    %173 = arith.addf %169, %172 : vector<16x1xf32>
    %174 = math.rsqrt %173 : vector<16x1xf32>
    %175 = vector.broadcast %174 : vector<16x1xf32> to vector<16x32xf32>
    %176 = arith.mulf %171, %175 : vector<16x32xf32>
    %177 = vector.extract_strided_slice %0 {offsets = [8, 0], sizes = [1, 32], strides = [1, 1]} : vector<44x96xf32> to vector<1x32xf32>
    %178 = vector.broadcast %177 : vector<1x32xf32> to vector<16x32xf32>
    %179 = arith.mulf %176, %178 : vector<16x32xf32>
    %180 = vector.extract_strided_slice %0 {offsets = [9, 0], sizes = [1, 32], strides = [1, 1]} : vector<44x96xf32> to vector<1x32xf32>
    %181 = vector.broadcast %180 : vector<1x32xf32> to vector<16x32xf32>
    %182 = arith.addf %179, %181 : vector<16x32xf32>
    %c1 = arith.constant 1 : index
    %c0_53 = arith.constant 0 : index
    %c0_54 = arith.constant 0 : index
    %183 = vector.load %arg2[%c1, %c0_53, %c0_54] : memref<6x32x128xf32, #tpu.memory_space<vmem>>, vector<1x32x128xf32>
    %184 = vector.shape_cast %183 : vector<1x32x128xf32> to vector<32x128xf32>
    %185 = vector.extract_strided_slice %184 {offsets = [0, 0], sizes = [32, 96], strides = [1, 1]} : vector<32x128xf32> to vector<32x96xf32>
    %cst_55 = arith.constant dense<0.000000e+00> : vector<16x96xf32>
    %186 = tpu.matmul %182, %185, %cst_55 {dimension_numbers = #tpu.dot_dimension_numbers<[1], [0], [0], [1], [0, 0, 1, 1], [], []>} : vector<16x32xf32>, vector<32x96xf32>, vector<16x96xf32> -> vector<16x96xf32>
    %187 = vector.extract_strided_slice %0 {offsets = [10, 0], sizes = [1, 96], strides = [1, 1]} : vector<44x96xf32> to vector<1x96xf32>
    %188 = vector.broadcast %187 : vector<1x96xf32> to vector<16x96xf32>
    %189 = arith.addf %186, %188 : vector<16x96xf32>
    %190 = vector.extract_strided_slice %189 {offsets = [0, 0], sizes = [16, 32], strides = [1, 1]} : vector<16x96xf32> to vector<16x32xf32>
    %191 = vector.extract_strided_slice %189 {offsets = [0, 32], sizes = [16, 32], strides = [1, 1]} : vector<16x96xf32> to vector<16x32xf32>
    %192 = vector.extract_strided_slice %189 {offsets = [0, 64], sizes = [16, 32], strides = [1, 1]} : vector<16x96xf32> to vector<16x32xf32>
    %193 = vector.extract_strided_slice %184 {offsets = [0, 96], sizes = [32, 32], strides = [1, 1]} : vector<32x128xf32> to vector<32x32xf32>
    %194 = vector.extract_strided_slice %0 {offsets = [11, 0], sizes = [1, 32], strides = [1, 1]} : vector<44x96xf32> to vector<1x32xf32>
    %195 = vector.extract_strided_slice %190 {offsets = [0, 0], sizes = [16, 8], strides = [1, 1]} : vector<16x32xf32> to vector<16x8xf32>
    %196 = vector.extract_strided_slice %191 {offsets = [0, 0], sizes = [16, 8], strides = [1, 1]} : vector<16x32xf32> to vector<16x8xf32>
    %cst_56 = arith.constant dense<0.000000e+00> : vector<16x16xf32>
    %197 = tpu.matmul %195, %196, %cst_56 {dimension_numbers = #tpu.dot_dimension_numbers<[1], [1], [0], [0], [0, 0, 1, 0], [], []>} : vector<16x8xf32>, vector<16x8xf32>, vector<16x16xf32> -> vector<16x16xf32>
    %cst_57 = arith.constant 0.353553385 : f32
    %198 = vector.broadcast %cst_57 : f32 to vector<16x16xf32>
    %199 = arith.mulf %197, %198 : vector<16x16xf32>
    %200 = arith.addf %199, %2 : vector<16x16xf32>
    %cst_58 = arith.constant dense<0xFF800000> : vector<16xf32>
    %201 = vector.multi_reduction <maximumf>, %200, %cst_58 [1] : vector<16x16xf32> to vector<16xf32>
    %202 = vector.shape_cast %201 : vector<16xf32> to vector<16x1xf32>
    %203 = vector.broadcast %202 : vector<16x1xf32> to vector<16x16xf32>
    %204 = arith.subf %200, %203 : vector<16x16xf32>
    %205 = math.exp %204 : vector<16x16xf32>
    %cst_59 = arith.constant dense<0.000000e+00> : vector<16xf32>
    %206 = vector.multi_reduction <add>, %205, %cst_59 [1] : vector<16x16xf32> to vector<16xf32>
    %207 = vector.shape_cast %206 : vector<16xf32> to vector<16x1xf32>
    %208 = tpu.reciprocal %207 {approx = true} : vector<16x1xf32> -> vector<16x1xf32>
    %209 = vector.broadcast %208 : vector<16x1xf32> to vector<16x16xf32>
    %210 = arith.mulf %205, %209 : vector<16x16xf32>
    %211 = vector.extract_strided_slice %192 {offsets = [0, 0], sizes = [16, 8], strides = [1, 1]} : vector<16x32xf32> to vector<16x8xf32>
    %cst_60 = arith.constant dense<0.000000e+00> : vector<16x8xf32>
    %212 = tpu.matmul %210, %211, %cst_60 {dimension_numbers = #tpu.dot_dimension_numbers<[1], [0], [0], [1], [0, 0, 1, 1], [], []>} : vector<16x16xf32>, vector<16x8xf32>, vector<16x8xf32> -> vector<16x8xf32>
    %213 = vector.extract_strided_slice %190 {offsets = [0, 8], sizes = [16, 8], strides = [1, 1]} : vector<16x32xf32> to vector<16x8xf32>
    %214 = vector.extract_strided_slice %191 {offsets = [0, 8], sizes = [16, 8], strides = [1, 1]} : vector<16x32xf32> to vector<16x8xf32>
    %cst_61 = arith.constant dense<0.000000e+00> : vector<16x16xf32>
    %215 = tpu.matmul %213, %214, %cst_61 {dimension_numbers = #tpu.dot_dimension_numbers<[1], [1], [0], [0], [0, 0, 1, 0], [], []>} : vector<16x8xf32>, vector<16x8xf32>, vector<16x16xf32> -> vector<16x16xf32>
    %cst_62 = arith.constant 0.353553385 : f32
    %216 = vector.broadcast %cst_62 : f32 to vector<16x16xf32>
    %217 = arith.mulf %215, %216 : vector<16x16xf32>
    %218 = arith.addf %217, %2 : vector<16x16xf32>
    %cst_63 = arith.constant dense<0xFF800000> : vector<16xf32>
    %219 = vector.multi_reduction <maximumf>, %218, %cst_63 [1] : vector<16x16xf32> to vector<16xf32>
    %220 = vector.shape_cast %219 : vector<16xf32> to vector<16x1xf32>
    %221 = vector.broadcast %220 : vector<16x1xf32> to vector<16x16xf32>
    %222 = arith.subf %218, %221 : vector<16x16xf32>
    %223 = math.exp %222 : vector<16x16xf32>
    %cst_64 = arith.constant dense<0.000000e+00> : vector<16xf32>
    %224 = vector.multi_reduction <add>, %223, %cst_64 [1] : vector<16x16xf32> to vector<16xf32>
    %225 = vector.shape_cast %224 : vector<16xf32> to vector<16x1xf32>
    %226 = tpu.reciprocal %225 {approx = true} : vector<16x1xf32> -> vector<16x1xf32>
    %227 = vector.broadcast %226 : vector<16x1xf32> to vector<16x16xf32>
    %228 = arith.mulf %223, %227 : vector<16x16xf32>
    %229 = vector.extract_strided_slice %192 {offsets = [0, 8], sizes = [16, 8], strides = [1, 1]} : vector<16x32xf32> to vector<16x8xf32>
    %cst_65 = arith.constant dense<0.000000e+00> : vector<16x8xf32>
    %230 = tpu.matmul %228, %229, %cst_65 {dimension_numbers = #tpu.dot_dimension_numbers<[1], [0], [0], [1], [0, 0, 1, 1], [], []>} : vector<16x16xf32>, vector<16x8xf32>, vector<16x8xf32> -> vector<16x8xf32>
    %231 = vector.extract_strided_slice %190 {offsets = [0, 16], sizes = [16, 8], strides = [1, 1]} : vector<16x32xf32> to vector<16x8xf32>
    %232 = vector.extract_strided_slice %191 {offsets = [0, 16], sizes = [16, 8], strides = [1, 1]} : vector<16x32xf32> to vector<16x8xf32>
    %cst_66 = arith.constant dense<0.000000e+00> : vector<16x16xf32>
    %233 = tpu.matmul %231, %232, %cst_66 {dimension_numbers = #tpu.dot_dimension_numbers<[1], [1], [0], [0], [0, 0, 1, 0], [], []>} : vector<16x8xf32>, vector<16x8xf32>, vector<16x16xf32> -> vector<16x16xf32>
    %cst_67 = arith.constant 0.353553385 : f32
    %234 = vector.broadcast %cst_67 : f32 to vector<16x16xf32>
    %235 = arith.mulf %233, %234 : vector<16x16xf32>
    %236 = arith.addf %235, %2 : vector<16x16xf32>
    %cst_68 = arith.constant dense<0xFF800000> : vector<16xf32>
    %237 = vector.multi_reduction <maximumf>, %236, %cst_68 [1] : vector<16x16xf32> to vector<16xf32>
    %238 = vector.shape_cast %237 : vector<16xf32> to vector<16x1xf32>
    %239 = vector.broadcast %238 : vector<16x1xf32> to vector<16x16xf32>
    %240 = arith.subf %236, %239 : vector<16x16xf32>
    %241 = math.exp %240 : vector<16x16xf32>
    %cst_69 = arith.constant dense<0.000000e+00> : vector<16xf32>
    %242 = vector.multi_reduction <add>, %241, %cst_69 [1] : vector<16x16xf32> to vector<16xf32>
    %243 = vector.shape_cast %242 : vector<16xf32> to vector<16x1xf32>
    %244 = tpu.reciprocal %243 {approx = true} : vector<16x1xf32> -> vector<16x1xf32>
    %245 = vector.broadcast %244 : vector<16x1xf32> to vector<16x16xf32>
    %246 = arith.mulf %241, %245 : vector<16x16xf32>
    %247 = vector.extract_strided_slice %192 {offsets = [0, 16], sizes = [16, 8], strides = [1, 1]} : vector<16x32xf32> to vector<16x8xf32>
    %cst_70 = arith.constant dense<0.000000e+00> : vector<16x8xf32>
    %248 = tpu.matmul %246, %247, %cst_70 {dimension_numbers = #tpu.dot_dimension_numbers<[1], [0], [0], [1], [0, 0, 1, 1], [], []>} : vector<16x16xf32>, vector<16x8xf32>, vector<16x8xf32> -> vector<16x8xf32>
    %249 = vector.extract_strided_slice %190 {offsets = [0, 24], sizes = [16, 8], strides = [1, 1]} : vector<16x32xf32> to vector<16x8xf32>
    %250 = vector.extract_strided_slice %191 {offsets = [0, 24], sizes = [16, 8], strides = [1, 1]} : vector<16x32xf32> to vector<16x8xf32>
    %cst_71 = arith.constant dense<0.000000e+00> : vector<16x16xf32>
    %251 = tpu.matmul %249, %250, %cst_71 {dimension_numbers = #tpu.dot_dimension_numbers<[1], [1], [0], [0], [0, 0, 1, 0], [], []>} : vector<16x8xf32>, vector<16x8xf32>, vector<16x16xf32> -> vector<16x16xf32>
    %cst_72 = arith.constant 0.353553385 : f32
    %252 = vector.broadcast %cst_72 : f32 to vector<16x16xf32>
    %253 = arith.mulf %251, %252 : vector<16x16xf32>
    %254 = arith.addf %253, %2 : vector<16x16xf32>
    %cst_73 = arith.constant dense<0xFF800000> : vector<16xf32>
    %255 = vector.multi_reduction <maximumf>, %254, %cst_73 [1] : vector<16x16xf32> to vector<16xf32>
    %256 = vector.shape_cast %255 : vector<16xf32> to vector<16x1xf32>
    %257 = vector.broadcast %256 : vector<16x1xf32> to vector<16x16xf32>
    %258 = arith.subf %254, %257 : vector<16x16xf32>
    %259 = math.exp %258 : vector<16x16xf32>
    %cst_74 = arith.constant dense<0.000000e+00> : vector<16xf32>
    %260 = vector.multi_reduction <add>, %259, %cst_74 [1] : vector<16x16xf32> to vector<16xf32>
    %261 = vector.shape_cast %260 : vector<16xf32> to vector<16x1xf32>
    %262 = tpu.reciprocal %261 {approx = true} : vector<16x1xf32> -> vector<16x1xf32>
    %263 = vector.broadcast %262 : vector<16x1xf32> to vector<16x16xf32>
    %264 = arith.mulf %259, %263 : vector<16x16xf32>
    %265 = vector.extract_strided_slice %192 {offsets = [0, 24], sizes = [16, 8], strides = [1, 1]} : vector<16x32xf32> to vector<16x8xf32>
    %cst_75 = arith.constant dense<0.000000e+00> : vector<16x8xf32>
    %266 = tpu.matmul %264, %265, %cst_75 {dimension_numbers = #tpu.dot_dimension_numbers<[1], [0], [0], [1], [0, 0, 1, 1], [], []>} : vector<16x16xf32>, vector<16x8xf32>, vector<16x8xf32> -> vector<16x8xf32>
    %267 = tpu.concatenate %212, %230, %248, %266 in 1 : vector<16x8xf32>, vector<16x8xf32>, vector<16x8xf32>, vector<16x8xf32> -> vector<16x32xf32>
    %cst_76 = arith.constant dense<0.000000e+00> : vector<16x32xf32>
    %268 = tpu.matmul %267, %193, %cst_76 {dimension_numbers = #tpu.dot_dimension_numbers<[1], [0], [0], [1], [0, 0, 1, 1], [], []>} : vector<16x32xf32>, vector<32x32xf32>, vector<16x32xf32> -> vector<16x32xf32>
    %269 = vector.broadcast %194 : vector<1x32xf32> to vector<16x32xf32>
    %270 = arith.addf %268, %269 : vector<16x32xf32>
    %271 = arith.addf %158, %270 : vector<16x32xf32>
    %cst_77 = arith.constant dense<0.000000e+00> : vector<16xf32>
    %272 = vector.multi_reduction <add>, %271, %cst_77 [1] : vector<16x32xf32> to vector<16xf32>
    %273 = vector.shape_cast %272 : vector<16xf32> to vector<16x1xf32>
    %cst_78 = arith.constant 3.200000e+01 : f32
    %274 = vector.broadcast %cst_78 : f32 to vector<16x1xf32>
    %275 = arith.divf %273, %274 : vector<16x1xf32>
    %276 = arith.mulf %271, %271 : vector<16x32xf32>
    %cst_79 = arith.constant dense<0.000000e+00> : vector<16xf32>
    %277 = vector.multi_reduction <add>, %276, %cst_79 [1] : vector<16x32xf32> to vector<16xf32>
    %278 = vector.shape_cast %277 : vector<16xf32> to vector<16x1xf32>
    %cst_80 = arith.constant 3.200000e+01 : f32
    %279 = vector.broadcast %cst_80 : f32 to vector<16x1xf32>
    %280 = arith.divf %278, %279 : vector<16x1xf32>
    %281 = arith.mulf %275, %275 : vector<16x1xf32>
    %282 = arith.subf %280, %281 : vector<16x1xf32>
    %283 = vector.broadcast %275 : vector<16x1xf32> to vector<16x32xf32>
    %284 = arith.subf %271, %283 : vector<16x32xf32>
    %cst_81 = arith.constant 9.99999974E-6 : f32
    %285 = vector.broadcast %cst_81 : f32 to vector<16x1xf32>
    %286 = arith.addf %282, %285 : vector<16x1xf32>
    %287 = math.rsqrt %286 : vector<16x1xf32>
    %288 = vector.broadcast %287 : vector<16x1xf32> to vector<16x32xf32>
    %289 = arith.mulf %284, %288 : vector<16x32xf32>
    %290 = vector.extract_strided_slice %0 {offsets = [12, 0], sizes = [1, 32], strides = [1, 1]} : vector<44x96xf32> to vector<1x32xf32>
    %291 = vector.broadcast %290 : vector<1x32xf32> to vector<16x32xf32>
    %292 = arith.mulf %289, %291 : vector<16x32xf32>
    %293 = vector.extract_strided_slice %0 {offsets = [13, 0], sizes = [1, 32], strides = [1, 1]} : vector<44x96xf32> to vector<1x32xf32>
    %294 = vector.broadcast %293 : vector<1x32xf32> to vector<16x32xf32>
    %295 = arith.addf %292, %294 : vector<16x32xf32>
    %c1_82 = arith.constant 1 : index
    %c0_83 = arith.constant 0 : index
    %c0_84 = arith.constant 0 : index
    %296 = vector.load %arg3[%c1_82, %c0_83, %c0_84] : memref<4x32x64xf32, #tpu.memory_space<vmem>>, vector<1x32x64xf32>
    %297 = vector.shape_cast %296 : vector<1x32x64xf32> to vector<32x64xf32>
    %cst_85 = arith.constant dense<0.000000e+00> : vector<16x64xf32>
    %298 = tpu.matmul %295, %297, %cst_85 {dimension_numbers = #tpu.dot_dimension_numbers<[1], [0], [0], [1], [0, 0, 1, 1], [], []>} : vector<16x32xf32>, vector<32x64xf32>, vector<16x64xf32> -> vector<16x64xf32>
    %299 = vector.extract_strided_slice %0 {offsets = [14, 0], sizes = [1, 64], strides = [1, 1]} : vector<44x96xf32> to vector<1x64xf32>
    %300 = vector.broadcast %299 : vector<1x64xf32> to vector<16x64xf32>
    %301 = arith.addf %298, %300 : vector<16x64xf32>
    %cst_86 = arith.constant 0.000000e+00 : f32
    %302 = vector.broadcast %cst_86 : f32 to vector<16x64xf32>
    %303 = arith.maximumf %301, %302 : vector<16x64xf32>
    %c1_87 = arith.constant 1 : index
    %c0_88 = arith.constant 0 : index
    %c0_89 = arith.constant 0 : index
    %304 = vector.load %arg4[%c1_87, %c0_88, %c0_89] : memref<4x64x32xf32, #tpu.memory_space<vmem>>, vector<1x64x32xf32>
    %305 = vector.shape_cast %304 : vector<1x64x32xf32> to vector<64x32xf32>
    %cst_90 = arith.constant dense<0.000000e+00> : vector<16x32xf32>
    %306 = tpu.matmul %303, %305, %cst_90 {dimension_numbers = #tpu.dot_dimension_numbers<[1], [0], [0], [1], [0, 0, 1, 1], [], []>} : vector<16x64xf32>, vector<64x32xf32>, vector<16x32xf32> -> vector<16x32xf32>
    %307 = vector.extract_strided_slice %0 {offsets = [15, 0], sizes = [1, 32], strides = [1, 1]} : vector<44x96xf32> to vector<1x32xf32>
    %308 = vector.broadcast %307 : vector<1x32xf32> to vector<16x32xf32>
    %309 = arith.addf %306, %308 : vector<16x32xf32>
    %310 = arith.addf %271, %309 : vector<16x32xf32>
    %cst_91 = arith.constant dense<0.000000e+00> : vector<16xf32>
    %311 = vector.multi_reduction <add>, %310, %cst_91 [1] : vector<16x32xf32> to vector<16xf32>
    %312 = vector.shape_cast %311 : vector<16xf32> to vector<16x1xf32>
    %cst_92 = arith.constant 3.200000e+01 : f32
    %313 = vector.broadcast %cst_92 : f32 to vector<16x1xf32>
    %314 = arith.divf %312, %313 : vector<16x1xf32>
    %315 = arith.mulf %310, %310 : vector<16x32xf32>
    %cst_93 = arith.constant dense<0.000000e+00> : vector<16xf32>
    %316 = vector.multi_reduction <add>, %315, %cst_93 [1] : vector<16x32xf32> to vector<16xf32>
    %317 = vector.shape_cast %316 : vector<16xf32> to vector<16x1xf32>
    %cst_94 = arith.constant 3.200000e+01 : f32
    %318 = vector.broadcast %cst_94 : f32 to vector<16x1xf32>
    %319 = arith.divf %317, %318 : vector<16x1xf32>
    %320 = arith.mulf %314, %314 : vector<16x1xf32>
    %321 = arith.subf %319, %320 : vector<16x1xf32>
    %322 = vector.broadcast %314 : vector<16x1xf32> to vector<16x32xf32>
    %323 = arith.subf %310, %322 : vector<16x32xf32>
    %cst_95 = arith.constant 9.99999974E-6 : f32
    %324 = vector.broadcast %cst_95 : f32 to vector<16x1xf32>
    %325 = arith.addf %321, %324 : vector<16x1xf32>
    %326 = math.rsqrt %325 : vector<16x1xf32>
    %327 = vector.broadcast %326 : vector<16x1xf32> to vector<16x32xf32>
    %328 = arith.mulf %323, %327 : vector<16x32xf32>
    %329 = vector.extract_strided_slice %0 {offsets = [40, 0], sizes = [1, 32], strides = [1, 1]} : vector<44x96xf32> to vector<1x32xf32>
    %330 = vector.broadcast %329 : vector<1x32xf32> to vector<16x32xf32>
    %331 = arith.mulf %328, %330 : vector<16x32xf32>
    %332 = vector.extract_strided_slice %0 {offsets = [41, 0], sizes = [1, 32], strides = [1, 1]} : vector<44x96xf32> to vector<1x32xf32>
    %333 = vector.broadcast %332 : vector<1x32xf32> to vector<16x32xf32>
    %334 = arith.addf %331, %333 : vector<16x32xf32>
    %335 = vector.extract_strided_slice %5 {offsets = [16, 0], sizes = [16, 32], strides = [1, 1]} : vector<32x32xf32> to vector<16x32xf32>
    %cst_96 = arith.constant dense<0.000000e+00> : vector<16xf32>
    %336 = vector.multi_reduction <add>, %335, %cst_96 [1] : vector<16x32xf32> to vector<16xf32>
    %337 = vector.shape_cast %336 : vector<16xf32> to vector<16x1xf32>
    %cst_97 = arith.constant 3.200000e+01 : f32
    %338 = vector.broadcast %cst_97 : f32 to vector<16x1xf32>
    %339 = arith.divf %337, %338 : vector<16x1xf32>
    %340 = arith.mulf %335, %335 : vector<16x32xf32>
    %cst_98 = arith.constant dense<0.000000e+00> : vector<16xf32>
    %341 = vector.multi_reduction <add>, %340, %cst_98 [1] : vector<16x32xf32> to vector<16xf32>
    %342 = vector.shape_cast %341 : vector<16xf32> to vector<16x1xf32>
    %cst_99 = arith.constant 3.200000e+01 : f32
    %343 = vector.broadcast %cst_99 : f32 to vector<16x1xf32>
    %344 = arith.divf %342, %343 : vector<16x1xf32>
    %345 = arith.mulf %339, %339 : vector<16x1xf32>
    %346 = arith.subf %344, %345 : vector<16x1xf32>
    %347 = vector.broadcast %339 : vector<16x1xf32> to vector<16x32xf32>
    %348 = arith.subf %335, %347 : vector<16x32xf32>
    %cst_100 = arith.constant 9.99999974E-6 : f32
    %349 = vector.broadcast %cst_100 : f32 to vector<16x1xf32>
    %350 = arith.addf %346, %349 : vector<16x1xf32>
    %351 = math.rsqrt %350 : vector<16x1xf32>
    %352 = vector.broadcast %351 : vector<16x1xf32> to vector<16x32xf32>
    %353 = arith.mulf %348, %352 : vector<16x32xf32>
    %354 = vector.extract_strided_slice %0 {offsets = [16, 0], sizes = [1, 32], strides = [1, 1]} : vector<44x96xf32> to vector<1x32xf32>
    %355 = vector.broadcast %354 : vector<1x32xf32> to vector<16x32xf32>
    %356 = arith.mulf %353, %355 : vector<16x32xf32>
    %357 = vector.extract_strided_slice %0 {offsets = [17, 0], sizes = [1, 32], strides = [1, 1]} : vector<44x96xf32> to vector<1x32xf32>
    %358 = vector.broadcast %357 : vector<1x32xf32> to vector<16x32xf32>
    %359 = arith.addf %356, %358 : vector<16x32xf32>
    %c2 = arith.constant 2 : index
    %c0_101 = arith.constant 0 : index
    %c0_102 = arith.constant 0 : index
    %360 = vector.load %arg2[%c2, %c0_101, %c0_102] : memref<6x32x128xf32, #tpu.memory_space<vmem>>, vector<1x32x128xf32>
    %361 = vector.shape_cast %360 : vector<1x32x128xf32> to vector<32x128xf32>
    %362 = vector.extract_strided_slice %361 {offsets = [0, 0], sizes = [32, 96], strides = [1, 1]} : vector<32x128xf32> to vector<32x96xf32>
    %cst_103 = arith.constant dense<0.000000e+00> : vector<16x96xf32>
    %363 = tpu.matmul %359, %362, %cst_103 {dimension_numbers = #tpu.dot_dimension_numbers<[1], [0], [0], [1], [0, 0, 1, 1], [], []>} : vector<16x32xf32>, vector<32x96xf32>, vector<16x96xf32> -> vector<16x96xf32>
    %364 = vector.extract_strided_slice %0 {offsets = [18, 0], sizes = [1, 96], strides = [1, 1]} : vector<44x96xf32> to vector<1x96xf32>
    %365 = vector.broadcast %364 : vector<1x96xf32> to vector<16x96xf32>
    %366 = arith.addf %363, %365 : vector<16x96xf32>
    %367 = vector.extract_strided_slice %366 {offsets = [0, 0], sizes = [16, 32], strides = [1, 1]} : vector<16x96xf32> to vector<16x32xf32>
    %368 = vector.extract_strided_slice %366 {offsets = [0, 32], sizes = [16, 32], strides = [1, 1]} : vector<16x96xf32> to vector<16x32xf32>
    %369 = vector.extract_strided_slice %366 {offsets = [0, 64], sizes = [16, 32], strides = [1, 1]} : vector<16x96xf32> to vector<16x32xf32>
    %370 = vector.extract_strided_slice %361 {offsets = [0, 96], sizes = [32, 32], strides = [1, 1]} : vector<32x128xf32> to vector<32x32xf32>
    %371 = vector.extract_strided_slice %0 {offsets = [19, 0], sizes = [1, 32], strides = [1, 1]} : vector<44x96xf32> to vector<1x32xf32>
    %372 = vector.extract_strided_slice %367 {offsets = [0, 0], sizes = [16, 8], strides = [1, 1]} : vector<16x32xf32> to vector<16x8xf32>
    %373 = vector.extract_strided_slice %368 {offsets = [0, 0], sizes = [16, 8], strides = [1, 1]} : vector<16x32xf32> to vector<16x8xf32>
    %cst_104 = arith.constant dense<0.000000e+00> : vector<16x16xf32>
    %374 = tpu.matmul %372, %373, %cst_104 {dimension_numbers = #tpu.dot_dimension_numbers<[1], [1], [0], [0], [0, 0, 1, 0], [], []>} : vector<16x8xf32>, vector<16x8xf32>, vector<16x16xf32> -> vector<16x16xf32>
    %cst_105 = arith.constant 0.353553385 : f32
    %375 = vector.broadcast %cst_105 : f32 to vector<16x16xf32>
    %376 = arith.mulf %374, %375 : vector<16x16xf32>
    %377 = arith.addf %376, %4 : vector<16x16xf32>
    %cst_106 = arith.constant dense<0xFF800000> : vector<16xf32>
    %378 = vector.multi_reduction <maximumf>, %377, %cst_106 [1] : vector<16x16xf32> to vector<16xf32>
    %379 = vector.shape_cast %378 : vector<16xf32> to vector<16x1xf32>
    %380 = vector.broadcast %379 : vector<16x1xf32> to vector<16x16xf32>
    %381 = arith.subf %377, %380 : vector<16x16xf32>
    %382 = math.exp %381 : vector<16x16xf32>
    %cst_107 = arith.constant dense<0.000000e+00> : vector<16xf32>
    %383 = vector.multi_reduction <add>, %382, %cst_107 [1] : vector<16x16xf32> to vector<16xf32>
    %384 = vector.shape_cast %383 : vector<16xf32> to vector<16x1xf32>
    %385 = tpu.reciprocal %384 {approx = true} : vector<16x1xf32> -> vector<16x1xf32>
    %386 = vector.broadcast %385 : vector<16x1xf32> to vector<16x16xf32>
    %387 = arith.mulf %382, %386 : vector<16x16xf32>
    %388 = vector.extract_strided_slice %369 {offsets = [0, 0], sizes = [16, 8], strides = [1, 1]} : vector<16x32xf32> to vector<16x8xf32>
    %cst_108 = arith.constant dense<0.000000e+00> : vector<16x8xf32>
    %389 = tpu.matmul %387, %388, %cst_108 {dimension_numbers = #tpu.dot_dimension_numbers<[1], [0], [0], [1], [0, 0, 1, 1], [], []>} : vector<16x16xf32>, vector<16x8xf32>, vector<16x8xf32> -> vector<16x8xf32>
    %390 = vector.extract_strided_slice %367 {offsets = [0, 8], sizes = [16, 8], strides = [1, 1]} : vector<16x32xf32> to vector<16x8xf32>
    %391 = vector.extract_strided_slice %368 {offsets = [0, 8], sizes = [16, 8], strides = [1, 1]} : vector<16x32xf32> to vector<16x8xf32>
    %cst_109 = arith.constant dense<0.000000e+00> : vector<16x16xf32>
    %392 = tpu.matmul %390, %391, %cst_109 {dimension_numbers = #tpu.dot_dimension_numbers<[1], [1], [0], [0], [0, 0, 1, 0], [], []>} : vector<16x8xf32>, vector<16x8xf32>, vector<16x16xf32> -> vector<16x16xf32>
    %cst_110 = arith.constant 0.353553385 : f32
    %393 = vector.broadcast %cst_110 : f32 to vector<16x16xf32>
    %394 = arith.mulf %392, %393 : vector<16x16xf32>
    %395 = arith.addf %394, %4 : vector<16x16xf32>
    %cst_111 = arith.constant dense<0xFF800000> : vector<16xf32>
    %396 = vector.multi_reduction <maximumf>, %395, %cst_111 [1] : vector<16x16xf32> to vector<16xf32>
    %397 = vector.shape_cast %396 : vector<16xf32> to vector<16x1xf32>
    %398 = vector.broadcast %397 : vector<16x1xf32> to vector<16x16xf32>
    %399 = arith.subf %395, %398 : vector<16x16xf32>
    %400 = math.exp %399 : vector<16x16xf32>
    %cst_112 = arith.constant dense<0.000000e+00> : vector<16xf32>
    %401 = vector.multi_reduction <add>, %400, %cst_112 [1] : vector<16x16xf32> to vector<16xf32>
    %402 = vector.shape_cast %401 : vector<16xf32> to vector<16x1xf32>
    %403 = tpu.reciprocal %402 {approx = true} : vector<16x1xf32> -> vector<16x1xf32>
    %404 = vector.broadcast %403 : vector<16x1xf32> to vector<16x16xf32>
    %405 = arith.mulf %400, %404 : vector<16x16xf32>
    %406 = vector.extract_strided_slice %369 {offsets = [0, 8], sizes = [16, 8], strides = [1, 1]} : vector<16x32xf32> to vector<16x8xf32>
    %cst_113 = arith.constant dense<0.000000e+00> : vector<16x8xf32>
    %407 = tpu.matmul %405, %406, %cst_113 {dimension_numbers = #tpu.dot_dimension_numbers<[1], [0], [0], [1], [0, 0, 1, 1], [], []>} : vector<16x16xf32>, vector<16x8xf32>, vector<16x8xf32> -> vector<16x8xf32>
    %408 = vector.extract_strided_slice %367 {offsets = [0, 16], sizes = [16, 8], strides = [1, 1]} : vector<16x32xf32> to vector<16x8xf32>
    %409 = vector.extract_strided_slice %368 {offsets = [0, 16], sizes = [16, 8], strides = [1, 1]} : vector<16x32xf32> to vector<16x8xf32>
    %cst_114 = arith.constant dense<0.000000e+00> : vector<16x16xf32>
    %410 = tpu.matmul %408, %409, %cst_114 {dimension_numbers = #tpu.dot_dimension_numbers<[1], [1], [0], [0], [0, 0, 1, 0], [], []>} : vector<16x8xf32>, vector<16x8xf32>, vector<16x16xf32> -> vector<16x16xf32>
    %cst_115 = arith.constant 0.353553385 : f32
    %411 = vector.broadcast %cst_115 : f32 to vector<16x16xf32>
    %412 = arith.mulf %410, %411 : vector<16x16xf32>
    %413 = arith.addf %412, %4 : vector<16x16xf32>
    %cst_116 = arith.constant dense<0xFF800000> : vector<16xf32>
    %414 = vector.multi_reduction <maximumf>, %413, %cst_116 [1] : vector<16x16xf32> to vector<16xf32>
    %415 = vector.shape_cast %414 : vector<16xf32> to vector<16x1xf32>
    %416 = vector.broadcast %415 : vector<16x1xf32> to vector<16x16xf32>
    %417 = arith.subf %413, %416 : vector<16x16xf32>
    %418 = math.exp %417 : vector<16x16xf32>
    %cst_117 = arith.constant dense<0.000000e+00> : vector<16xf32>
    %419 = vector.multi_reduction <add>, %418, %cst_117 [1] : vector<16x16xf32> to vector<16xf32>
    %420 = vector.shape_cast %419 : vector<16xf32> to vector<16x1xf32>
    %421 = tpu.reciprocal %420 {approx = true} : vector<16x1xf32> -> vector<16x1xf32>
    %422 = vector.broadcast %421 : vector<16x1xf32> to vector<16x16xf32>
    %423 = arith.mulf %418, %422 : vector<16x16xf32>
    %424 = vector.extract_strided_slice %369 {offsets = [0, 16], sizes = [16, 8], strides = [1, 1]} : vector<16x32xf32> to vector<16x8xf32>
    %cst_118 = arith.constant dense<0.000000e+00> : vector<16x8xf32>
    %425 = tpu.matmul %423, %424, %cst_118 {dimension_numbers = #tpu.dot_dimension_numbers<[1], [0], [0], [1], [0, 0, 1, 1], [], []>} : vector<16x16xf32>, vector<16x8xf32>, vector<16x8xf32> -> vector<16x8xf32>
    %426 = vector.extract_strided_slice %367 {offsets = [0, 24], sizes = [16, 8], strides = [1, 1]} : vector<16x32xf32> to vector<16x8xf32>
    %427 = vector.extract_strided_slice %368 {offsets = [0, 24], sizes = [16, 8], strides = [1, 1]} : vector<16x32xf32> to vector<16x8xf32>
    %cst_119 = arith.constant dense<0.000000e+00> : vector<16x16xf32>
    %428 = tpu.matmul %426, %427, %cst_119 {dimension_numbers = #tpu.dot_dimension_numbers<[1], [1], [0], [0], [0, 0, 1, 0], [], []>} : vector<16x8xf32>, vector<16x8xf32>, vector<16x16xf32> -> vector<16x16xf32>
    %cst_120 = arith.constant 0.353553385 : f32
    %429 = vector.broadcast %cst_120 : f32 to vector<16x16xf32>
    %430 = arith.mulf %428, %429 : vector<16x16xf32>
    %431 = arith.addf %430, %4 : vector<16x16xf32>
    %cst_121 = arith.constant dense<0xFF800000> : vector<16xf32>
    %432 = vector.multi_reduction <maximumf>, %431, %cst_121 [1] : vector<16x16xf32> to vector<16xf32>
    %433 = vector.shape_cast %432 : vector<16xf32> to vector<16x1xf32>
    %434 = vector.broadcast %433 : vector<16x1xf32> to vector<16x16xf32>
    %435 = arith.subf %431, %434 : vector<16x16xf32>
    %436 = math.exp %435 : vector<16x16xf32>
    %cst_122 = arith.constant dense<0.000000e+00> : vector<16xf32>
    %437 = vector.multi_reduction <add>, %436, %cst_122 [1] : vector<16x16xf32> to vector<16xf32>
    %438 = vector.shape_cast %437 : vector<16xf32> to vector<16x1xf32>
    %439 = tpu.reciprocal %438 {approx = true} : vector<16x1xf32> -> vector<16x1xf32>
    %440 = vector.broadcast %439 : vector<16x1xf32> to vector<16x16xf32>
    %441 = arith.mulf %436, %440 : vector<16x16xf32>
    %442 = vector.extract_strided_slice %369 {offsets = [0, 24], sizes = [16, 8], strides = [1, 1]} : vector<16x32xf32> to vector<16x8xf32>
    %cst_123 = arith.constant dense<0.000000e+00> : vector<16x8xf32>
    %443 = tpu.matmul %441, %442, %cst_123 {dimension_numbers = #tpu.dot_dimension_numbers<[1], [0], [0], [1], [0, 0, 1, 1], [], []>} : vector<16x16xf32>, vector<16x8xf32>, vector<16x8xf32> -> vector<16x8xf32>
    %444 = tpu.concatenate %389, %407, %425, %443 in 1 : vector<16x8xf32>, vector<16x8xf32>, vector<16x8xf32>, vector<16x8xf32> -> vector<16x32xf32>
    %cst_124 = arith.constant dense<0.000000e+00> : vector<16x32xf32>
    %445 = tpu.matmul %444, %370, %cst_124 {dimension_numbers = #tpu.dot_dimension_numbers<[1], [0], [0], [1], [0, 0, 1, 1], [], []>} : vector<16x32xf32>, vector<32x32xf32>, vector<16x32xf32> -> vector<16x32xf32>
    %446 = vector.broadcast %371 : vector<1x32xf32> to vector<16x32xf32>
    %447 = arith.addf %445, %446 : vector<16x32xf32>
    %448 = arith.addf %335, %447 : vector<16x32xf32>
    %cst_125 = arith.constant dense<0.000000e+00> : vector<16xf32>
    %449 = vector.multi_reduction <add>, %448, %cst_125 [1] : vector<16x32xf32> to vector<16xf32>
    %450 = vector.shape_cast %449 : vector<16xf32> to vector<16x1xf32>
    %cst_126 = arith.constant 3.200000e+01 : f32
    %451 = vector.broadcast %cst_126 : f32 to vector<16x1xf32>
    %452 = arith.divf %450, %451 : vector<16x1xf32>
    %453 = arith.mulf %448, %448 : vector<16x32xf32>
    %cst_127 = arith.constant dense<0.000000e+00> : vector<16xf32>
    %454 = vector.multi_reduction <add>, %453, %cst_127 [1] : vector<16x32xf32> to vector<16xf32>
    %455 = vector.shape_cast %454 : vector<16xf32> to vector<16x1xf32>
    %cst_128 = arith.constant 3.200000e+01 : f32
    %456 = vector.broadcast %cst_128 : f32 to vector<16x1xf32>
    %457 = arith.divf %455, %456 : vector<16x1xf32>
    %458 = arith.mulf %452, %452 : vector<16x1xf32>
    %459 = arith.subf %457, %458 : vector<16x1xf32>
    %460 = vector.broadcast %452 : vector<16x1xf32> to vector<16x32xf32>
    %461 = arith.subf %448, %460 : vector<16x32xf32>
    %cst_129 = arith.constant 9.99999974E-6 : f32
    %462 = vector.broadcast %cst_129 : f32 to vector<16x1xf32>
    %463 = arith.addf %459, %462 : vector<16x1xf32>
    %464 = math.rsqrt %463 : vector<16x1xf32>
    %465 = vector.broadcast %464 : vector<16x1xf32> to vector<16x32xf32>
    %466 = arith.mulf %461, %465 : vector<16x32xf32>
    %467 = vector.extract_strided_slice %0 {offsets = [20, 0], sizes = [1, 32], strides = [1, 1]} : vector<44x96xf32> to vector<1x32xf32>
    %468 = vector.broadcast %467 : vector<1x32xf32> to vector<16x32xf32>
    %469 = arith.mulf %466, %468 : vector<16x32xf32>
    %470 = vector.extract_strided_slice %0 {offsets = [21, 0], sizes = [1, 32], strides = [1, 1]} : vector<44x96xf32> to vector<1x32xf32>
    %471 = vector.broadcast %470 : vector<1x32xf32> to vector<16x32xf32>
    %472 = arith.addf %469, %471 : vector<16x32xf32>
    %c3 = arith.constant 3 : index
    %c0_130 = arith.constant 0 : index
    %c0_131 = arith.constant 0 : index
    %473 = vector.load %arg2[%c3, %c0_130, %c0_131] : memref<6x32x128xf32, #tpu.memory_space<vmem>>, vector<1x32x128xf32>
    %474 = vector.shape_cast %473 : vector<1x32x128xf32> to vector<32x128xf32>
    %475 = vector.extract_strided_slice %0 {offsets = [22, 0], sizes = [1, 96], strides = [1, 1]} : vector<44x96xf32> to vector<1x96xf32>
    %476 = vector.extract_strided_slice %474 {offsets = [0, 0], sizes = [32, 32], strides = [1, 1]} : vector<32x128xf32> to vector<32x32xf32>
    %cst_132 = arith.constant dense<0.000000e+00> : vector<16x32xf32>
    %477 = tpu.matmul %472, %476, %cst_132 {dimension_numbers = #tpu.dot_dimension_numbers<[1], [0], [0], [1], [0, 0, 1, 1], [], []>} : vector<16x32xf32>, vector<32x32xf32>, vector<16x32xf32> -> vector<16x32xf32>
    %478 = vector.extract_strided_slice %475 {offsets = [0, 0], sizes = [1, 32], strides = [1, 1]} : vector<1x96xf32> to vector<1x32xf32>
    %479 = vector.broadcast %478 : vector<1x32xf32> to vector<16x32xf32>
    %480 = arith.addf %477, %479 : vector<16x32xf32>
    %481 = vector.extract_strided_slice %474 {offsets = [0, 32], sizes = [32, 64], strides = [1, 1]} : vector<32x128xf32> to vector<32x64xf32>
    %cst_133 = arith.constant dense<0.000000e+00> : vector<16x64xf32>
    %482 = tpu.matmul %334, %481, %cst_133 {dimension_numbers = #tpu.dot_dimension_numbers<[1], [0], [0], [1], [0, 0, 1, 1], [], []>} : vector<16x32xf32>, vector<32x64xf32>, vector<16x64xf32> -> vector<16x64xf32>
    %483 = vector.extract_strided_slice %475 {offsets = [0, 32], sizes = [1, 64], strides = [1, 1]} : vector<1x96xf32> to vector<1x64xf32>
    %484 = vector.broadcast %483 : vector<1x64xf32> to vector<16x64xf32>
    %485 = arith.addf %482, %484 : vector<16x64xf32>
    %486 = vector.extract_strided_slice %485 {offsets = [0, 0], sizes = [16, 32], strides = [1, 1]} : vector<16x64xf32> to vector<16x32xf32>
    %487 = vector.extract_strided_slice %485 {offsets = [0, 32], sizes = [16, 32], strides = [1, 1]} : vector<16x64xf32> to vector<16x32xf32>
    %488 = vector.extract_strided_slice %474 {offsets = [0, 96], sizes = [32, 32], strides = [1, 1]} : vector<32x128xf32> to vector<32x32xf32>
    %489 = vector.extract_strided_slice %0 {offsets = [23, 0], sizes = [1, 32], strides = [1, 1]} : vector<44x96xf32> to vector<1x32xf32>
    %490 = vector.extract_strided_slice %480 {offsets = [0, 0], sizes = [16, 8], strides = [1, 1]} : vector<16x32xf32> to vector<16x8xf32>
    %491 = vector.extract_strided_slice %486 {offsets = [0, 0], sizes = [16, 8], strides = [1, 1]} : vector<16x32xf32> to vector<16x8xf32>
    %cst_134 = arith.constant dense<0.000000e+00> : vector<16x16xf32>
    %492 = tpu.matmul %490, %491, %cst_134 {dimension_numbers = #tpu.dot_dimension_numbers<[1], [1], [0], [0], [0, 0, 1, 0], [], []>} : vector<16x8xf32>, vector<16x8xf32>, vector<16x16xf32> -> vector<16x16xf32>
    %cst_135 = arith.constant 0.353553385 : f32
    %493 = vector.broadcast %cst_135 : f32 to vector<16x16xf32>
    %494 = arith.mulf %492, %493 : vector<16x16xf32>
    %495 = arith.addf %494, %3 : vector<16x16xf32>
    %cst_136 = arith.constant dense<0xFF800000> : vector<16xf32>
    %496 = vector.multi_reduction <maximumf>, %495, %cst_136 [1] : vector<16x16xf32> to vector<16xf32>
    %497 = vector.shape_cast %496 : vector<16xf32> to vector<16x1xf32>
    %498 = vector.broadcast %497 : vector<16x1xf32> to vector<16x16xf32>
    %499 = arith.subf %495, %498 : vector<16x16xf32>
    %500 = math.exp %499 : vector<16x16xf32>
    %cst_137 = arith.constant dense<0.000000e+00> : vector<16xf32>
    %501 = vector.multi_reduction <add>, %500, %cst_137 [1] : vector<16x16xf32> to vector<16xf32>
    %502 = vector.shape_cast %501 : vector<16xf32> to vector<16x1xf32>
    %503 = tpu.reciprocal %502 {approx = true} : vector<16x1xf32> -> vector<16x1xf32>
    %504 = vector.broadcast %503 : vector<16x1xf32> to vector<16x16xf32>
    %505 = arith.mulf %500, %504 : vector<16x16xf32>
    %506 = vector.extract_strided_slice %487 {offsets = [0, 0], sizes = [16, 8], strides = [1, 1]} : vector<16x32xf32> to vector<16x8xf32>
    %cst_138 = arith.constant dense<0.000000e+00> : vector<16x8xf32>
    %507 = tpu.matmul %505, %506, %cst_138 {dimension_numbers = #tpu.dot_dimension_numbers<[1], [0], [0], [1], [0, 0, 1, 1], [], []>} : vector<16x16xf32>, vector<16x8xf32>, vector<16x8xf32> -> vector<16x8xf32>
    %508 = vector.extract_strided_slice %480 {offsets = [0, 8], sizes = [16, 8], strides = [1, 1]} : vector<16x32xf32> to vector<16x8xf32>
    %509 = vector.extract_strided_slice %486 {offsets = [0, 8], sizes = [16, 8], strides = [1, 1]} : vector<16x32xf32> to vector<16x8xf32>
    %cst_139 = arith.constant dense<0.000000e+00> : vector<16x16xf32>
    %510 = tpu.matmul %508, %509, %cst_139 {dimension_numbers = #tpu.dot_dimension_numbers<[1], [1], [0], [0], [0, 0, 1, 0], [], []>} : vector<16x8xf32>, vector<16x8xf32>, vector<16x16xf32> -> vector<16x16xf32>
    %cst_140 = arith.constant 0.353553385 : f32
    %511 = vector.broadcast %cst_140 : f32 to vector<16x16xf32>
    %512 = arith.mulf %510, %511 : vector<16x16xf32>
    %513 = arith.addf %512, %3 : vector<16x16xf32>
    %cst_141 = arith.constant dense<0xFF800000> : vector<16xf32>
    %514 = vector.multi_reduction <maximumf>, %513, %cst_141 [1] : vector<16x16xf32> to vector<16xf32>
    %515 = vector.shape_cast %514 : vector<16xf32> to vector<16x1xf32>
    %516 = vector.broadcast %515 : vector<16x1xf32> to vector<16x16xf32>
    %517 = arith.subf %513, %516 : vector<16x16xf32>
    %518 = math.exp %517 : vector<16x16xf32>
    %cst_142 = arith.constant dense<0.000000e+00> : vector<16xf32>
    %519 = vector.multi_reduction <add>, %518, %cst_142 [1] : vector<16x16xf32> to vector<16xf32>
    %520 = vector.shape_cast %519 : vector<16xf32> to vector<16x1xf32>
    %521 = tpu.reciprocal %520 {approx = true} : vector<16x1xf32> -> vector<16x1xf32>
    %522 = vector.broadcast %521 : vector<16x1xf32> to vector<16x16xf32>
    %523 = arith.mulf %518, %522 : vector<16x16xf32>
    %524 = vector.extract_strided_slice %487 {offsets = [0, 8], sizes = [16, 8], strides = [1, 1]} : vector<16x32xf32> to vector<16x8xf32>
    %cst_143 = arith.constant dense<0.000000e+00> : vector<16x8xf32>
    %525 = tpu.matmul %523, %524, %cst_143 {dimension_numbers = #tpu.dot_dimension_numbers<[1], [0], [0], [1], [0, 0, 1, 1], [], []>} : vector<16x16xf32>, vector<16x8xf32>, vector<16x8xf32> -> vector<16x8xf32>
    %526 = vector.extract_strided_slice %480 {offsets = [0, 16], sizes = [16, 8], strides = [1, 1]} : vector<16x32xf32> to vector<16x8xf32>
    %527 = vector.extract_strided_slice %486 {offsets = [0, 16], sizes = [16, 8], strides = [1, 1]} : vector<16x32xf32> to vector<16x8xf32>
    %cst_144 = arith.constant dense<0.000000e+00> : vector<16x16xf32>
    %528 = tpu.matmul %526, %527, %cst_144 {dimension_numbers = #tpu.dot_dimension_numbers<[1], [1], [0], [0], [0, 0, 1, 0], [], []>} : vector<16x8xf32>, vector<16x8xf32>, vector<16x16xf32> -> vector<16x16xf32>
    %cst_145 = arith.constant 0.353553385 : f32
    %529 = vector.broadcast %cst_145 : f32 to vector<16x16xf32>
    %530 = arith.mulf %528, %529 : vector<16x16xf32>
    %531 = arith.addf %530, %3 : vector<16x16xf32>
    %cst_146 = arith.constant dense<0xFF800000> : vector<16xf32>
    %532 = vector.multi_reduction <maximumf>, %531, %cst_146 [1] : vector<16x16xf32> to vector<16xf32>
    %533 = vector.shape_cast %532 : vector<16xf32> to vector<16x1xf32>
    %534 = vector.broadcast %533 : vector<16x1xf32> to vector<16x16xf32>
    %535 = arith.subf %531, %534 : vector<16x16xf32>
    %536 = math.exp %535 : vector<16x16xf32>
    %cst_147 = arith.constant dense<0.000000e+00> : vector<16xf32>
    %537 = vector.multi_reduction <add>, %536, %cst_147 [1] : vector<16x16xf32> to vector<16xf32>
    %538 = vector.shape_cast %537 : vector<16xf32> to vector<16x1xf32>
    %539 = tpu.reciprocal %538 {approx = true} : vector<16x1xf32> -> vector<16x1xf32>
    %540 = vector.broadcast %539 : vector<16x1xf32> to vector<16x16xf32>
    %541 = arith.mulf %536, %540 : vector<16x16xf32>
    %542 = vector.extract_strided_slice %487 {offsets = [0, 16], sizes = [16, 8], strides = [1, 1]} : vector<16x32xf32> to vector<16x8xf32>
    %cst_148 = arith.constant dense<0.000000e+00> : vector<16x8xf32>
    %543 = tpu.matmul %541, %542, %cst_148 {dimension_numbers = #tpu.dot_dimension_numbers<[1], [0], [0], [1], [0, 0, 1, 1], [], []>} : vector<16x16xf32>, vector<16x8xf32>, vector<16x8xf32> -> vector<16x8xf32>
    %544 = vector.extract_strided_slice %480 {offsets = [0, 24], sizes = [16, 8], strides = [1, 1]} : vector<16x32xf32> to vector<16x8xf32>
    %545 = vector.extract_strided_slice %486 {offsets = [0, 24], sizes = [16, 8], strides = [1, 1]} : vector<16x32xf32> to vector<16x8xf32>
    %cst_149 = arith.constant dense<0.000000e+00> : vector<16x16xf32>
    %546 = tpu.matmul %544, %545, %cst_149 {dimension_numbers = #tpu.dot_dimension_numbers<[1], [1], [0], [0], [0, 0, 1, 0], [], []>} : vector<16x8xf32>, vector<16x8xf32>, vector<16x16xf32> -> vector<16x16xf32>
    %cst_150 = arith.constant 0.353553385 : f32
    %547 = vector.broadcast %cst_150 : f32 to vector<16x16xf32>
    %548 = arith.mulf %546, %547 : vector<16x16xf32>
    %549 = arith.addf %548, %3 : vector<16x16xf32>
    %cst_151 = arith.constant dense<0xFF800000> : vector<16xf32>
    %550 = vector.multi_reduction <maximumf>, %549, %cst_151 [1] : vector<16x16xf32> to vector<16xf32>
    %551 = vector.shape_cast %550 : vector<16xf32> to vector<16x1xf32>
    %552 = vector.broadcast %551 : vector<16x1xf32> to vector<16x16xf32>
    %553 = arith.subf %549, %552 : vector<16x16xf32>
    %554 = math.exp %553 : vector<16x16xf32>
    %cst_152 = arith.constant dense<0.000000e+00> : vector<16xf32>
    %555 = vector.multi_reduction <add>, %554, %cst_152 [1] : vector<16x16xf32> to vector<16xf32>
    %556 = vector.shape_cast %555 : vector<16xf32> to vector<16x1xf32>
    %557 = tpu.reciprocal %556 {approx = true} : vector<16x1xf32> -> vector<16x1xf32>
    %558 = vector.broadcast %557 : vector<16x1xf32> to vector<16x16xf32>
    %559 = arith.mulf %554, %558 : vector<16x16xf32>
    %560 = vector.extract_strided_slice %487 {offsets = [0, 24], sizes = [16, 8], strides = [1, 1]} : vector<16x32xf32> to vector<16x8xf32>
    %cst_153 = arith.constant dense<0.000000e+00> : vector<16x8xf32>
    %561 = tpu.matmul %559, %560, %cst_153 {dimension_numbers = #tpu.dot_dimension_numbers<[1], [0], [0], [1], [0, 0, 1, 1], [], []>} : vector<16x16xf32>, vector<16x8xf32>, vector<16x8xf32> -> vector<16x8xf32>
    %562 = tpu.concatenate %507, %525, %543, %561 in 1 : vector<16x8xf32>, vector<16x8xf32>, vector<16x8xf32>, vector<16x8xf32> -> vector<16x32xf32>
    %cst_154 = arith.constant dense<0.000000e+00> : vector<16x32xf32>
    %563 = tpu.matmul %562, %488, %cst_154 {dimension_numbers = #tpu.dot_dimension_numbers<[1], [0], [0], [1], [0, 0, 1, 1], [], []>} : vector<16x32xf32>, vector<32x32xf32>, vector<16x32xf32> -> vector<16x32xf32>
    %564 = vector.broadcast %489 : vector<1x32xf32> to vector<16x32xf32>
    %565 = arith.addf %563, %564 : vector<16x32xf32>
    %566 = arith.addf %448, %565 : vector<16x32xf32>
    %cst_155 = arith.constant dense<0.000000e+00> : vector<16xf32>
    %567 = vector.multi_reduction <add>, %566, %cst_155 [1] : vector<16x32xf32> to vector<16xf32>
    %568 = vector.shape_cast %567 : vector<16xf32> to vector<16x1xf32>
    %cst_156 = arith.constant 3.200000e+01 : f32
    %569 = vector.broadcast %cst_156 : f32 to vector<16x1xf32>
    %570 = arith.divf %568, %569 : vector<16x1xf32>
    %571 = arith.mulf %566, %566 : vector<16x32xf32>
    %cst_157 = arith.constant dense<0.000000e+00> : vector<16xf32>
    %572 = vector.multi_reduction <add>, %571, %cst_157 [1] : vector<16x32xf32> to vector<16xf32>
    %573 = vector.shape_cast %572 : vector<16xf32> to vector<16x1xf32>
    %cst_158 = arith.constant 3.200000e+01 : f32
    %574 = vector.broadcast %cst_158 : f32 to vector<16x1xf32>
    %575 = arith.divf %573, %574 : vector<16x1xf32>
    %576 = arith.mulf %570, %570 : vector<16x1xf32>
    %577 = arith.subf %575, %576 : vector<16x1xf32>
    %578 = vector.broadcast %570 : vector<16x1xf32> to vector<16x32xf32>
    %579 = arith.subf %566, %578 : vector<16x32xf32>
    %cst_159 = arith.constant 9.99999974E-6 : f32
    %580 = vector.broadcast %cst_159 : f32 to vector<16x1xf32>
    %581 = arith.addf %577, %580 : vector<16x1xf32>
    %582 = math.rsqrt %581 : vector<16x1xf32>
    %583 = vector.broadcast %582 : vector<16x1xf32> to vector<16x32xf32>
    %584 = arith.mulf %579, %583 : vector<16x32xf32>
    %585 = vector.extract_strided_slice %0 {offsets = [24, 0], sizes = [1, 32], strides = [1, 1]} : vector<44x96xf32> to vector<1x32xf32>
    %586 = vector.broadcast %585 : vector<1x32xf32> to vector<16x32xf32>
    %587 = arith.mulf %584, %586 : vector<16x32xf32>
    %588 = vector.extract_strided_slice %0 {offsets = [25, 0], sizes = [1, 32], strides = [1, 1]} : vector<44x96xf32> to vector<1x32xf32>
    %589 = vector.broadcast %588 : vector<1x32xf32> to vector<16x32xf32>
    %590 = arith.addf %587, %589 : vector<16x32xf32>
    %c2_160 = arith.constant 2 : index
    %c0_161 = arith.constant 0 : index
    %c0_162 = arith.constant 0 : index
    %591 = vector.load %arg3[%c2_160, %c0_161, %c0_162] : memref<4x32x64xf32, #tpu.memory_space<vmem>>, vector<1x32x64xf32>
    %592 = vector.shape_cast %591 : vector<1x32x64xf32> to vector<32x64xf32>
    %cst_163 = arith.constant dense<0.000000e+00> : vector<16x64xf32>
    %593 = tpu.matmul %590, %592, %cst_163 {dimension_numbers = #tpu.dot_dimension_numbers<[1], [0], [0], [1], [0, 0, 1, 1], [], []>} : vector<16x32xf32>, vector<32x64xf32>, vector<16x64xf32> -> vector<16x64xf32>
    %594 = vector.extract_strided_slice %0 {offsets = [26, 0], sizes = [1, 64], strides = [1, 1]} : vector<44x96xf32> to vector<1x64xf32>
    %595 = vector.broadcast %594 : vector<1x64xf32> to vector<16x64xf32>
    %596 = arith.addf %593, %595 : vector<16x64xf32>
    %cst_164 = arith.constant 0.000000e+00 : f32
    %597 = vector.broadcast %cst_164 : f32 to vector<16x64xf32>
    %598 = arith.maximumf %596, %597 : vector<16x64xf32>
    %c2_165 = arith.constant 2 : index
    %c0_166 = arith.constant 0 : index
    %c0_167 = arith.constant 0 : index
    %599 = vector.load %arg4[%c2_165, %c0_166, %c0_167] : memref<4x64x32xf32, #tpu.memory_space<vmem>>, vector<1x64x32xf32>
    %600 = vector.shape_cast %599 : vector<1x64x32xf32> to vector<64x32xf32>
    %cst_168 = arith.constant dense<0.000000e+00> : vector<16x32xf32>
    %601 = tpu.matmul %598, %600, %cst_168 {dimension_numbers = #tpu.dot_dimension_numbers<[1], [0], [0], [1], [0, 0, 1, 1], [], []>} : vector<16x64xf32>, vector<64x32xf32>, vector<16x32xf32> -> vector<16x32xf32>
    %602 = vector.extract_strided_slice %0 {offsets = [27, 0], sizes = [1, 32], strides = [1, 1]} : vector<44x96xf32> to vector<1x32xf32>
    %603 = vector.broadcast %602 : vector<1x32xf32> to vector<16x32xf32>
    %604 = arith.addf %601, %603 : vector<16x32xf32>
    %605 = arith.addf %566, %604 : vector<16x32xf32>
    %cst_169 = arith.constant dense<0.000000e+00> : vector<16xf32>
    %606 = vector.multi_reduction <add>, %605, %cst_169 [1] : vector<16x32xf32> to vector<16xf32>
    %607 = vector.shape_cast %606 : vector<16xf32> to vector<16x1xf32>
    %cst_170 = arith.constant 3.200000e+01 : f32
    %608 = vector.broadcast %cst_170 : f32 to vector<16x1xf32>
    %609 = arith.divf %607, %608 : vector<16x1xf32>
    %610 = arith.mulf %605, %605 : vector<16x32xf32>
    %cst_171 = arith.constant dense<0.000000e+00> : vector<16xf32>
    %611 = vector.multi_reduction <add>, %610, %cst_171 [1] : vector<16x32xf32> to vector<16xf32>
    %612 = vector.shape_cast %611 : vector<16xf32> to vector<16x1xf32>
    %cst_172 = arith.constant 3.200000e+01 : f32
    %613 = vector.broadcast %cst_172 : f32 to vector<16x1xf32>
    %614 = arith.divf %612, %613 : vector<16x1xf32>
    %615 = arith.mulf %609, %609 : vector<16x1xf32>
    %616 = arith.subf %614, %615 : vector<16x1xf32>
    %617 = vector.broadcast %609 : vector<16x1xf32> to vector<16x32xf32>
    %618 = arith.subf %605, %617 : vector<16x32xf32>
    %cst_173 = arith.constant 9.99999974E-6 : f32
    %619 = vector.broadcast %cst_173 : f32 to vector<16x1xf32>
    %620 = arith.addf %616, %619 : vector<16x1xf32>
    %621 = math.rsqrt %620 : vector<16x1xf32>
    %622 = vector.broadcast %621 : vector<16x1xf32> to vector<16x32xf32>
    %623 = arith.mulf %618, %622 : vector<16x32xf32>
    %624 = vector.extract_strided_slice %0 {offsets = [28, 0], sizes = [1, 32], strides = [1, 1]} : vector<44x96xf32> to vector<1x32xf32>
    %625 = vector.broadcast %624 : vector<1x32xf32> to vector<16x32xf32>
    %626 = arith.mulf %623, %625 : vector<16x32xf32>
    %627 = vector.extract_strided_slice %0 {offsets = [29, 0], sizes = [1, 32], strides = [1, 1]} : vector<44x96xf32> to vector<1x32xf32>
    %628 = vector.broadcast %627 : vector<1x32xf32> to vector<16x32xf32>
    %629 = arith.addf %626, %628 : vector<16x32xf32>
    %c4 = arith.constant 4 : index
    %c0_174 = arith.constant 0 : index
    %c0_175 = arith.constant 0 : index
    %630 = vector.load %arg2[%c4, %c0_174, %c0_175] : memref<6x32x128xf32, #tpu.memory_space<vmem>>, vector<1x32x128xf32>
    %631 = vector.shape_cast %630 : vector<1x32x128xf32> to vector<32x128xf32>
    %632 = vector.extract_strided_slice %631 {offsets = [0, 0], sizes = [32, 96], strides = [1, 1]} : vector<32x128xf32> to vector<32x96xf32>
    %cst_176 = arith.constant dense<0.000000e+00> : vector<16x96xf32>
    %633 = tpu.matmul %629, %632, %cst_176 {dimension_numbers = #tpu.dot_dimension_numbers<[1], [0], [0], [1], [0, 0, 1, 1], [], []>} : vector<16x32xf32>, vector<32x96xf32>, vector<16x96xf32> -> vector<16x96xf32>
    %634 = vector.extract_strided_slice %0 {offsets = [30, 0], sizes = [1, 96], strides = [1, 1]} : vector<44x96xf32> to vector<1x96xf32>
    %635 = vector.broadcast %634 : vector<1x96xf32> to vector<16x96xf32>
    %636 = arith.addf %633, %635 : vector<16x96xf32>
    %637 = vector.extract_strided_slice %636 {offsets = [0, 0], sizes = [16, 32], strides = [1, 1]} : vector<16x96xf32> to vector<16x32xf32>
    %638 = vector.extract_strided_slice %636 {offsets = [0, 32], sizes = [16, 32], strides = [1, 1]} : vector<16x96xf32> to vector<16x32xf32>
    %639 = vector.extract_strided_slice %636 {offsets = [0, 64], sizes = [16, 32], strides = [1, 1]} : vector<16x96xf32> to vector<16x32xf32>
    %640 = vector.extract_strided_slice %631 {offsets = [0, 96], sizes = [32, 32], strides = [1, 1]} : vector<32x128xf32> to vector<32x32xf32>
    %641 = vector.extract_strided_slice %0 {offsets = [31, 0], sizes = [1, 32], strides = [1, 1]} : vector<44x96xf32> to vector<1x32xf32>
    %642 = vector.extract_strided_slice %637 {offsets = [0, 0], sizes = [16, 8], strides = [1, 1]} : vector<16x32xf32> to vector<16x8xf32>
    %643 = vector.extract_strided_slice %638 {offsets = [0, 0], sizes = [16, 8], strides = [1, 1]} : vector<16x32xf32> to vector<16x8xf32>
    %cst_177 = arith.constant dense<0.000000e+00> : vector<16x16xf32>
    %644 = tpu.matmul %642, %643, %cst_177 {dimension_numbers = #tpu.dot_dimension_numbers<[1], [1], [0], [0], [0, 0, 1, 0], [], []>} : vector<16x8xf32>, vector<16x8xf32>, vector<16x16xf32> -> vector<16x16xf32>
    %cst_178 = arith.constant 0.353553385 : f32
    %645 = vector.broadcast %cst_178 : f32 to vector<16x16xf32>
    %646 = arith.mulf %644, %645 : vector<16x16xf32>
    %647 = arith.addf %646, %4 : vector<16x16xf32>
    %cst_179 = arith.constant dense<0xFF800000> : vector<16xf32>
    %648 = vector.multi_reduction <maximumf>, %647, %cst_179 [1] : vector<16x16xf32> to vector<16xf32>
    %649 = vector.shape_cast %648 : vector<16xf32> to vector<16x1xf32>
    %650 = vector.broadcast %649 : vector<16x1xf32> to vector<16x16xf32>
    %651 = arith.subf %647, %650 : vector<16x16xf32>
    %652 = math.exp %651 : vector<16x16xf32>
    %cst_180 = arith.constant dense<0.000000e+00> : vector<16xf32>
    %653 = vector.multi_reduction <add>, %652, %cst_180 [1] : vector<16x16xf32> to vector<16xf32>
    %654 = vector.shape_cast %653 : vector<16xf32> to vector<16x1xf32>
    %655 = tpu.reciprocal %654 {approx = true} : vector<16x1xf32> -> vector<16x1xf32>
    %656 = vector.broadcast %655 : vector<16x1xf32> to vector<16x16xf32>
    %657 = arith.mulf %652, %656 : vector<16x16xf32>
    %658 = vector.extract_strided_slice %639 {offsets = [0, 0], sizes = [16, 8], strides = [1, 1]} : vector<16x32xf32> to vector<16x8xf32>
    %cst_181 = arith.constant dense<0.000000e+00> : vector<16x8xf32>
    %659 = tpu.matmul %657, %658, %cst_181 {dimension_numbers = #tpu.dot_dimension_numbers<[1], [0], [0], [1], [0, 0, 1, 1], [], []>} : vector<16x16xf32>, vector<16x8xf32>, vector<16x8xf32> -> vector<16x8xf32>
    %660 = vector.extract_strided_slice %637 {offsets = [0, 8], sizes = [16, 8], strides = [1, 1]} : vector<16x32xf32> to vector<16x8xf32>
    %661 = vector.extract_strided_slice %638 {offsets = [0, 8], sizes = [16, 8], strides = [1, 1]} : vector<16x32xf32> to vector<16x8xf32>
    %cst_182 = arith.constant dense<0.000000e+00> : vector<16x16xf32>
    %662 = tpu.matmul %660, %661, %cst_182 {dimension_numbers = #tpu.dot_dimension_numbers<[1], [1], [0], [0], [0, 0, 1, 0], [], []>} : vector<16x8xf32>, vector<16x8xf32>, vector<16x16xf32> -> vector<16x16xf32>
    %cst_183 = arith.constant 0.353553385 : f32
    %663 = vector.broadcast %cst_183 : f32 to vector<16x16xf32>
    %664 = arith.mulf %662, %663 : vector<16x16xf32>
    %665 = arith.addf %664, %4 : vector<16x16xf32>
    %cst_184 = arith.constant dense<0xFF800000> : vector<16xf32>
    %666 = vector.multi_reduction <maximumf>, %665, %cst_184 [1] : vector<16x16xf32> to vector<16xf32>
    %667 = vector.shape_cast %666 : vector<16xf32> to vector<16x1xf32>
    %668 = vector.broadcast %667 : vector<16x1xf32> to vector<16x16xf32>
    %669 = arith.subf %665, %668 : vector<16x16xf32>
    %670 = math.exp %669 : vector<16x16xf32>
    %cst_185 = arith.constant dense<0.000000e+00> : vector<16xf32>
    %671 = vector.multi_reduction <add>, %670, %cst_185 [1] : vector<16x16xf32> to vector<16xf32>
    %672 = vector.shape_cast %671 : vector<16xf32> to vector<16x1xf32>
    %673 = tpu.reciprocal %672 {approx = true} : vector<16x1xf32> -> vector<16x1xf32>
    %674 = vector.broadcast %673 : vector<16x1xf32> to vector<16x16xf32>
    %675 = arith.mulf %670, %674 : vector<16x16xf32>
    %676 = vector.extract_strided_slice %639 {offsets = [0, 8], sizes = [16, 8], strides = [1, 1]} : vector<16x32xf32> to vector<16x8xf32>
    %cst_186 = arith.constant dense<0.000000e+00> : vector<16x8xf32>
    %677 = tpu.matmul %675, %676, %cst_186 {dimension_numbers = #tpu.dot_dimension_numbers<[1], [0], [0], [1], [0, 0, 1, 1], [], []>} : vector<16x16xf32>, vector<16x8xf32>, vector<16x8xf32> -> vector<16x8xf32>
    %678 = vector.extract_strided_slice %637 {offsets = [0, 16], sizes = [16, 8], strides = [1, 1]} : vector<16x32xf32> to vector<16x8xf32>
    %679 = vector.extract_strided_slice %638 {offsets = [0, 16], sizes = [16, 8], strides = [1, 1]} : vector<16x32xf32> to vector<16x8xf32>
    %cst_187 = arith.constant dense<0.000000e+00> : vector<16x16xf32>
    %680 = tpu.matmul %678, %679, %cst_187 {dimension_numbers = #tpu.dot_dimension_numbers<[1], [1], [0], [0], [0, 0, 1, 0], [], []>} : vector<16x8xf32>, vector<16x8xf32>, vector<16x16xf32> -> vector<16x16xf32>
    %cst_188 = arith.constant 0.353553385 : f32
    %681 = vector.broadcast %cst_188 : f32 to vector<16x16xf32>
    %682 = arith.mulf %680, %681 : vector<16x16xf32>
    %683 = arith.addf %682, %4 : vector<16x16xf32>
    %cst_189 = arith.constant dense<0xFF800000> : vector<16xf32>
    %684 = vector.multi_reduction <maximumf>, %683, %cst_189 [1] : vector<16x16xf32> to vector<16xf32>
    %685 = vector.shape_cast %684 : vector<16xf32> to vector<16x1xf32>
    %686 = vector.broadcast %685 : vector<16x1xf32> to vector<16x16xf32>
    %687 = arith.subf %683, %686 : vector<16x16xf32>
    %688 = math.exp %687 : vector<16x16xf32>
    %cst_190 = arith.constant dense<0.000000e+00> : vector<16xf32>
    %689 = vector.multi_reduction <add>, %688, %cst_190 [1] : vector<16x16xf32> to vector<16xf32>
    %690 = vector.shape_cast %689 : vector<16xf32> to vector<16x1xf32>
    %691 = tpu.reciprocal %690 {approx = true} : vector<16x1xf32> -> vector<16x1xf32>
    %692 = vector.broadcast %691 : vector<16x1xf32> to vector<16x16xf32>
    %693 = arith.mulf %688, %692 : vector<16x16xf32>
    %694 = vector.extract_strided_slice %639 {offsets = [0, 16], sizes = [16, 8], strides = [1, 1]} : vector<16x32xf32> to vector<16x8xf32>
    %cst_191 = arith.constant dense<0.000000e+00> : vector<16x8xf32>
    %695 = tpu.matmul %693, %694, %cst_191 {dimension_numbers = #tpu.dot_dimension_numbers<[1], [0], [0], [1], [0, 0, 1, 1], [], []>} : vector<16x16xf32>, vector<16x8xf32>, vector<16x8xf32> -> vector<16x8xf32>
    %696 = vector.extract_strided_slice %637 {offsets = [0, 24], sizes = [16, 8], strides = [1, 1]} : vector<16x32xf32> to vector<16x8xf32>
    %697 = vector.extract_strided_slice %638 {offsets = [0, 24], sizes = [16, 8], strides = [1, 1]} : vector<16x32xf32> to vector<16x8xf32>
    %cst_192 = arith.constant dense<0.000000e+00> : vector<16x16xf32>
    %698 = tpu.matmul %696, %697, %cst_192 {dimension_numbers = #tpu.dot_dimension_numbers<[1], [1], [0], [0], [0, 0, 1, 0], [], []>} : vector<16x8xf32>, vector<16x8xf32>, vector<16x16xf32> -> vector<16x16xf32>
    %cst_193 = arith.constant 0.353553385 : f32
    %699 = vector.broadcast %cst_193 : f32 to vector<16x16xf32>
    %700 = arith.mulf %698, %699 : vector<16x16xf32>
    %701 = arith.addf %700, %4 : vector<16x16xf32>
    %cst_194 = arith.constant dense<0xFF800000> : vector<16xf32>
    %702 = vector.multi_reduction <maximumf>, %701, %cst_194 [1] : vector<16x16xf32> to vector<16xf32>
    %703 = vector.shape_cast %702 : vector<16xf32> to vector<16x1xf32>
    %704 = vector.broadcast %703 : vector<16x1xf32> to vector<16x16xf32>
    %705 = arith.subf %701, %704 : vector<16x16xf32>
    %706 = math.exp %705 : vector<16x16xf32>
    %cst_195 = arith.constant dense<0.000000e+00> : vector<16xf32>
    %707 = vector.multi_reduction <add>, %706, %cst_195 [1] : vector<16x16xf32> to vector<16xf32>
    %708 = vector.shape_cast %707 : vector<16xf32> to vector<16x1xf32>
    %709 = tpu.reciprocal %708 {approx = true} : vector<16x1xf32> -> vector<16x1xf32>
    %710 = vector.broadcast %709 : vector<16x1xf32> to vector<16x16xf32>
    %711 = arith.mulf %706, %710 : vector<16x16xf32>
    %712 = vector.extract_strided_slice %639 {offsets = [0, 24], sizes = [16, 8], strides = [1, 1]} : vector<16x32xf32> to vector<16x8xf32>
    %cst_196 = arith.constant dense<0.000000e+00> : vector<16x8xf32>
    %713 = tpu.matmul %711, %712, %cst_196 {dimension_numbers = #tpu.dot_dimension_numbers<[1], [0], [0], [1], [0, 0, 1, 1], [], []>} : vector<16x16xf32>, vector<16x8xf32>, vector<16x8xf32> -> vector<16x8xf32>
    %714 = tpu.concatenate %659, %677, %695, %713 in 1 : vector<16x8xf32>, vector<16x8xf32>, vector<16x8xf32>, vector<16x8xf32> -> vector<16x32xf32>
    %cst_197 = arith.constant dense<0.000000e+00> : vector<16x32xf32>
    %715 = tpu.matmul %714, %640, %cst_197 {dimension_numbers = #tpu.dot_dimension_numbers<[1], [0], [0], [1], [0, 0, 1, 1], [], []>} : vector<16x32xf32>, vector<32x32xf32>, vector<16x32xf32> -> vector<16x32xf32>
    %716 = vector.broadcast %641 : vector<1x32xf32> to vector<16x32xf32>
    %717 = arith.addf %715, %716 : vector<16x32xf32>
    %718 = arith.addf %605, %717 : vector<16x32xf32>
    %cst_198 = arith.constant dense<0.000000e+00> : vector<16xf32>
    %719 = vector.multi_reduction <add>, %718, %cst_198 [1] : vector<16x32xf32> to vector<16xf32>
    %720 = vector.shape_cast %719 : vector<16xf32> to vector<16x1xf32>
    %cst_199 = arith.constant 3.200000e+01 : f32
    %721 = vector.broadcast %cst_199 : f32 to vector<16x1xf32>
    %722 = arith.divf %720, %721 : vector<16x1xf32>
    %723 = arith.mulf %718, %718 : vector<16x32xf32>
    %cst_200 = arith.constant dense<0.000000e+00> : vector<16xf32>
    %724 = vector.multi_reduction <add>, %723, %cst_200 [1] : vector<16x32xf32> to vector<16xf32>
    %725 = vector.shape_cast %724 : vector<16xf32> to vector<16x1xf32>
    %cst_201 = arith.constant 3.200000e+01 : f32
    %726 = vector.broadcast %cst_201 : f32 to vector<16x1xf32>
    %727 = arith.divf %725, %726 : vector<16x1xf32>
    %728 = arith.mulf %722, %722 : vector<16x1xf32>
    %729 = arith.subf %727, %728 : vector<16x1xf32>
    %730 = vector.broadcast %722 : vector<16x1xf32> to vector<16x32xf32>
    %731 = arith.subf %718, %730 : vector<16x32xf32>
    %cst_202 = arith.constant 9.99999974E-6 : f32
    %732 = vector.broadcast %cst_202 : f32 to vector<16x1xf32>
    %733 = arith.addf %729, %732 : vector<16x1xf32>
    %734 = math.rsqrt %733 : vector<16x1xf32>
    %735 = vector.broadcast %734 : vector<16x1xf32> to vector<16x32xf32>
    %736 = arith.mulf %731, %735 : vector<16x32xf32>
    %737 = vector.extract_strided_slice %0 {offsets = [32, 0], sizes = [1, 32], strides = [1, 1]} : vector<44x96xf32> to vector<1x32xf32>
    %738 = vector.broadcast %737 : vector<1x32xf32> to vector<16x32xf32>
    %739 = arith.mulf %736, %738 : vector<16x32xf32>
    %740 = vector.extract_strided_slice %0 {offsets = [33, 0], sizes = [1, 32], strides = [1, 1]} : vector<44x96xf32> to vector<1x32xf32>
    %741 = vector.broadcast %740 : vector<1x32xf32> to vector<16x32xf32>
    %742 = arith.addf %739, %741 : vector<16x32xf32>
    %c5 = arith.constant 5 : index
    %c0_203 = arith.constant 0 : index
    %c0_204 = arith.constant 0 : index
    %743 = vector.load %arg2[%c5, %c0_203, %c0_204] : memref<6x32x128xf32, #tpu.memory_space<vmem>>, vector<1x32x128xf32>
    %744 = vector.shape_cast %743 : vector<1x32x128xf32> to vector<32x128xf32>
    %745 = vector.extract_strided_slice %0 {offsets = [34, 0], sizes = [1, 96], strides = [1, 1]} : vector<44x96xf32> to vector<1x96xf32>
    %746 = vector.extract_strided_slice %744 {offsets = [0, 0], sizes = [32, 32], strides = [1, 1]} : vector<32x128xf32> to vector<32x32xf32>
    %cst_205 = arith.constant dense<0.000000e+00> : vector<16x32xf32>
    %747 = tpu.matmul %742, %746, %cst_205 {dimension_numbers = #tpu.dot_dimension_numbers<[1], [0], [0], [1], [0, 0, 1, 1], [], []>} : vector<16x32xf32>, vector<32x32xf32>, vector<16x32xf32> -> vector<16x32xf32>
    %748 = vector.extract_strided_slice %745 {offsets = [0, 0], sizes = [1, 32], strides = [1, 1]} : vector<1x96xf32> to vector<1x32xf32>
    %749 = vector.broadcast %748 : vector<1x32xf32> to vector<16x32xf32>
    %750 = arith.addf %747, %749 : vector<16x32xf32>
    %751 = vector.extract_strided_slice %744 {offsets = [0, 32], sizes = [32, 64], strides = [1, 1]} : vector<32x128xf32> to vector<32x64xf32>
    %cst_206 = arith.constant dense<0.000000e+00> : vector<16x64xf32>
    %752 = tpu.matmul %334, %751, %cst_206 {dimension_numbers = #tpu.dot_dimension_numbers<[1], [0], [0], [1], [0, 0, 1, 1], [], []>} : vector<16x32xf32>, vector<32x64xf32>, vector<16x64xf32> -> vector<16x64xf32>
    %753 = vector.extract_strided_slice %745 {offsets = [0, 32], sizes = [1, 64], strides = [1, 1]} : vector<1x96xf32> to vector<1x64xf32>
    %754 = vector.broadcast %753 : vector<1x64xf32> to vector<16x64xf32>
    %755 = arith.addf %752, %754 : vector<16x64xf32>
    %756 = vector.extract_strided_slice %755 {offsets = [0, 0], sizes = [16, 32], strides = [1, 1]} : vector<16x64xf32> to vector<16x32xf32>
    %757 = vector.extract_strided_slice %755 {offsets = [0, 32], sizes = [16, 32], strides = [1, 1]} : vector<16x64xf32> to vector<16x32xf32>
    %758 = vector.extract_strided_slice %744 {offsets = [0, 96], sizes = [32, 32], strides = [1, 1]} : vector<32x128xf32> to vector<32x32xf32>
    %759 = vector.extract_strided_slice %0 {offsets = [35, 0], sizes = [1, 32], strides = [1, 1]} : vector<44x96xf32> to vector<1x32xf32>
    %760 = vector.extract_strided_slice %750 {offsets = [0, 0], sizes = [16, 8], strides = [1, 1]} : vector<16x32xf32> to vector<16x8xf32>
    %761 = vector.extract_strided_slice %756 {offsets = [0, 0], sizes = [16, 8], strides = [1, 1]} : vector<16x32xf32> to vector<16x8xf32>
    %cst_207 = arith.constant dense<0.000000e+00> : vector<16x16xf32>
    %762 = tpu.matmul %760, %761, %cst_207 {dimension_numbers = #tpu.dot_dimension_numbers<[1], [1], [0], [0], [0, 0, 1, 0], [], []>} : vector<16x8xf32>, vector<16x8xf32>, vector<16x16xf32> -> vector<16x16xf32>
    %cst_208 = arith.constant 0.353553385 : f32
    %763 = vector.broadcast %cst_208 : f32 to vector<16x16xf32>
    %764 = arith.mulf %762, %763 : vector<16x16xf32>
    %765 = arith.addf %764, %3 : vector<16x16xf32>
    %cst_209 = arith.constant dense<0xFF800000> : vector<16xf32>
    %766 = vector.multi_reduction <maximumf>, %765, %cst_209 [1] : vector<16x16xf32> to vector<16xf32>
    %767 = vector.shape_cast %766 : vector<16xf32> to vector<16x1xf32>
    %768 = vector.broadcast %767 : vector<16x1xf32> to vector<16x16xf32>
    %769 = arith.subf %765, %768 : vector<16x16xf32>
    %770 = math.exp %769 : vector<16x16xf32>
    %cst_210 = arith.constant dense<0.000000e+00> : vector<16xf32>
    %771 = vector.multi_reduction <add>, %770, %cst_210 [1] : vector<16x16xf32> to vector<16xf32>
    %772 = vector.shape_cast %771 : vector<16xf32> to vector<16x1xf32>
    %773 = tpu.reciprocal %772 {approx = true} : vector<16x1xf32> -> vector<16x1xf32>
    %774 = vector.broadcast %773 : vector<16x1xf32> to vector<16x16xf32>
    %775 = arith.mulf %770, %774 : vector<16x16xf32>
    %776 = vector.extract_strided_slice %757 {offsets = [0, 0], sizes = [16, 8], strides = [1, 1]} : vector<16x32xf32> to vector<16x8xf32>
    %cst_211 = arith.constant dense<0.000000e+00> : vector<16x8xf32>
    %777 = tpu.matmul %775, %776, %cst_211 {dimension_numbers = #tpu.dot_dimension_numbers<[1], [0], [0], [1], [0, 0, 1, 1], [], []>} : vector<16x16xf32>, vector<16x8xf32>, vector<16x8xf32> -> vector<16x8xf32>
    %778 = vector.extract_strided_slice %750 {offsets = [0, 8], sizes = [16, 8], strides = [1, 1]} : vector<16x32xf32> to vector<16x8xf32>
    %779 = vector.extract_strided_slice %756 {offsets = [0, 8], sizes = [16, 8], strides = [1, 1]} : vector<16x32xf32> to vector<16x8xf32>
    %cst_212 = arith.constant dense<0.000000e+00> : vector<16x16xf32>
    %780 = tpu.matmul %778, %779, %cst_212 {dimension_numbers = #tpu.dot_dimension_numbers<[1], [1], [0], [0], [0, 0, 1, 0], [], []>} : vector<16x8xf32>, vector<16x8xf32>, vector<16x16xf32> -> vector<16x16xf32>
    %cst_213 = arith.constant 0.353553385 : f32
    %781 = vector.broadcast %cst_213 : f32 to vector<16x16xf32>
    %782 = arith.mulf %780, %781 : vector<16x16xf32>
    %783 = arith.addf %782, %3 : vector<16x16xf32>
    %cst_214 = arith.constant dense<0xFF800000> : vector<16xf32>
    %784 = vector.multi_reduction <maximumf>, %783, %cst_214 [1] : vector<16x16xf32> to vector<16xf32>
    %785 = vector.shape_cast %784 : vector<16xf32> to vector<16x1xf32>
    %786 = vector.broadcast %785 : vector<16x1xf32> to vector<16x16xf32>
    %787 = arith.subf %783, %786 : vector<16x16xf32>
    %788 = math.exp %787 : vector<16x16xf32>
    %cst_215 = arith.constant dense<0.000000e+00> : vector<16xf32>
    %789 = vector.multi_reduction <add>, %788, %cst_215 [1] : vector<16x16xf32> to vector<16xf32>
    %790 = vector.shape_cast %789 : vector<16xf32> to vector<16x1xf32>
    %791 = tpu.reciprocal %790 {approx = true} : vector<16x1xf32> -> vector<16x1xf32>
    %792 = vector.broadcast %791 : vector<16x1xf32> to vector<16x16xf32>
    %793 = arith.mulf %788, %792 : vector<16x16xf32>
    %794 = vector.extract_strided_slice %757 {offsets = [0, 8], sizes = [16, 8], strides = [1, 1]} : vector<16x32xf32> to vector<16x8xf32>
    %cst_216 = arith.constant dense<0.000000e+00> : vector<16x8xf32>
    %795 = tpu.matmul %793, %794, %cst_216 {dimension_numbers = #tpu.dot_dimension_numbers<[1], [0], [0], [1], [0, 0, 1, 1], [], []>} : vector<16x16xf32>, vector<16x8xf32>, vector<16x8xf32> -> vector<16x8xf32>
    %796 = vector.extract_strided_slice %750 {offsets = [0, 16], sizes = [16, 8], strides = [1, 1]} : vector<16x32xf32> to vector<16x8xf32>
    %797 = vector.extract_strided_slice %756 {offsets = [0, 16], sizes = [16, 8], strides = [1, 1]} : vector<16x32xf32> to vector<16x8xf32>
    %cst_217 = arith.constant dense<0.000000e+00> : vector<16x16xf32>
    %798 = tpu.matmul %796, %797, %cst_217 {dimension_numbers = #tpu.dot_dimension_numbers<[1], [1], [0], [0], [0, 0, 1, 0], [], []>} : vector<16x8xf32>, vector<16x8xf32>, vector<16x16xf32> -> vector<16x16xf32>
    %cst_218 = arith.constant 0.353553385 : f32
    %799 = vector.broadcast %cst_218 : f32 to vector<16x16xf32>
    %800 = arith.mulf %798, %799 : vector<16x16xf32>
    %801 = arith.addf %800, %3 : vector<16x16xf32>
    %cst_219 = arith.constant dense<0xFF800000> : vector<16xf32>
    %802 = vector.multi_reduction <maximumf>, %801, %cst_219 [1] : vector<16x16xf32> to vector<16xf32>
    %803 = vector.shape_cast %802 : vector<16xf32> to vector<16x1xf32>
    %804 = vector.broadcast %803 : vector<16x1xf32> to vector<16x16xf32>
    %805 = arith.subf %801, %804 : vector<16x16xf32>
    %806 = math.exp %805 : vector<16x16xf32>
    %cst_220 = arith.constant dense<0.000000e+00> : vector<16xf32>
    %807 = vector.multi_reduction <add>, %806, %cst_220 [1] : vector<16x16xf32> to vector<16xf32>
    %808 = vector.shape_cast %807 : vector<16xf32> to vector<16x1xf32>
    %809 = tpu.reciprocal %808 {approx = true} : vector<16x1xf32> -> vector<16x1xf32>
    %810 = vector.broadcast %809 : vector<16x1xf32> to vector<16x16xf32>
    %811 = arith.mulf %806, %810 : vector<16x16xf32>
    %812 = vector.extract_strided_slice %757 {offsets = [0, 16], sizes = [16, 8], strides = [1, 1]} : vector<16x32xf32> to vector<16x8xf32>
    %cst_221 = arith.constant dense<0.000000e+00> : vector<16x8xf32>
    %813 = tpu.matmul %811, %812, %cst_221 {dimension_numbers = #tpu.dot_dimension_numbers<[1], [0], [0], [1], [0, 0, 1, 1], [], []>} : vector<16x16xf32>, vector<16x8xf32>, vector<16x8xf32> -> vector<16x8xf32>
    %814 = vector.extract_strided_slice %750 {offsets = [0, 24], sizes = [16, 8], strides = [1, 1]} : vector<16x32xf32> to vector<16x8xf32>
    %815 = vector.extract_strided_slice %756 {offsets = [0, 24], sizes = [16, 8], strides = [1, 1]} : vector<16x32xf32> to vector<16x8xf32>
    %cst_222 = arith.constant dense<0.000000e+00> : vector<16x16xf32>
    %816 = tpu.matmul %814, %815, %cst_222 {dimension_numbers = #tpu.dot_dimension_numbers<[1], [1], [0], [0], [0, 0, 1, 0], [], []>} : vector<16x8xf32>, vector<16x8xf32>, vector<16x16xf32> -> vector<16x16xf32>
    %cst_223 = arith.constant 0.353553385 : f32
    %817 = vector.broadcast %cst_223 : f32 to vector<16x16xf32>
    %818 = arith.mulf %816, %817 : vector<16x16xf32>
    %819 = arith.addf %818, %3 : vector<16x16xf32>
    %cst_224 = arith.constant dense<0xFF800000> : vector<16xf32>
    %820 = vector.multi_reduction <maximumf>, %819, %cst_224 [1] : vector<16x16xf32> to vector<16xf32>
    %821 = vector.shape_cast %820 : vector<16xf32> to vector<16x1xf32>
    %822 = vector.broadcast %821 : vector<16x1xf32> to vector<16x16xf32>
    %823 = arith.subf %819, %822 : vector<16x16xf32>
    %824 = math.exp %823 : vector<16x16xf32>
    %cst_225 = arith.constant dense<0.000000e+00> : vector<16xf32>
    %825 = vector.multi_reduction <add>, %824, %cst_225 [1] : vector<16x16xf32> to vector<16xf32>
    %826 = vector.shape_cast %825 : vector<16xf32> to vector<16x1xf32>
    %827 = tpu.reciprocal %826 {approx = true} : vector<16x1xf32> -> vector<16x1xf32>
    %828 = vector.broadcast %827 : vector<16x1xf32> to vector<16x16xf32>
    %829 = arith.mulf %824, %828 : vector<16x16xf32>
    %830 = vector.extract_strided_slice %757 {offsets = [0, 24], sizes = [16, 8], strides = [1, 1]} : vector<16x32xf32> to vector<16x8xf32>
    %cst_226 = arith.constant dense<0.000000e+00> : vector<16x8xf32>
    %831 = tpu.matmul %829, %830, %cst_226 {dimension_numbers = #tpu.dot_dimension_numbers<[1], [0], [0], [1], [0, 0, 1, 1], [], []>} : vector<16x16xf32>, vector<16x8xf32>, vector<16x8xf32> -> vector<16x8xf32>
    %832 = tpu.concatenate %777, %795, %813, %831 in 1 : vector<16x8xf32>, vector<16x8xf32>, vector<16x8xf32>, vector<16x8xf32> -> vector<16x32xf32>
    %cst_227 = arith.constant dense<0.000000e+00> : vector<16x32xf32>
    %833 = tpu.matmul %832, %758, %cst_227 {dimension_numbers = #tpu.dot_dimension_numbers<[1], [0], [0], [1], [0, 0, 1, 1], [], []>} : vector<16x32xf32>, vector<32x32xf32>, vector<16x32xf32> -> vector<16x32xf32>
    %834 = vector.broadcast %759 : vector<1x32xf32> to vector<16x32xf32>
    %835 = arith.addf %833, %834 : vector<16x32xf32>
    %836 = arith.addf %718, %835 : vector<16x32xf32>
    %cst_228 = arith.constant dense<0.000000e+00> : vector<16xf32>
    %837 = vector.multi_reduction <add>, %836, %cst_228 [1] : vector<16x32xf32> to vector<16xf32>
    %838 = vector.shape_cast %837 : vector<16xf32> to vector<16x1xf32>
    %cst_229 = arith.constant 3.200000e+01 : f32
    %839 = vector.broadcast %cst_229 : f32 to vector<16x1xf32>
    %840 = arith.divf %838, %839 : vector<16x1xf32>
    %841 = arith.mulf %836, %836 : vector<16x32xf32>
    %cst_230 = arith.constant dense<0.000000e+00> : vector<16xf32>
    %842 = vector.multi_reduction <add>, %841, %cst_230 [1] : vector<16x32xf32> to vector<16xf32>
    %843 = vector.shape_cast %842 : vector<16xf32> to vector<16x1xf32>
    %cst_231 = arith.constant 3.200000e+01 : f32
    %844 = vector.broadcast %cst_231 : f32 to vector<16x1xf32>
    %845 = arith.divf %843, %844 : vector<16x1xf32>
    %846 = arith.mulf %840, %840 : vector<16x1xf32>
    %847 = arith.subf %845, %846 : vector<16x1xf32>
    %848 = vector.broadcast %840 : vector<16x1xf32> to vector<16x32xf32>
    %849 = arith.subf %836, %848 : vector<16x32xf32>
    %cst_232 = arith.constant 9.99999974E-6 : f32
    %850 = vector.broadcast %cst_232 : f32 to vector<16x1xf32>
    %851 = arith.addf %847, %850 : vector<16x1xf32>
    %852 = math.rsqrt %851 : vector<16x1xf32>
    %853 = vector.broadcast %852 : vector<16x1xf32> to vector<16x32xf32>
    %854 = arith.mulf %849, %853 : vector<16x32xf32>
    %855 = vector.extract_strided_slice %0 {offsets = [36, 0], sizes = [1, 32], strides = [1, 1]} : vector<44x96xf32> to vector<1x32xf32>
    %856 = vector.broadcast %855 : vector<1x32xf32> to vector<16x32xf32>
    %857 = arith.mulf %854, %856 : vector<16x32xf32>
    %858 = vector.extract_strided_slice %0 {offsets = [37, 0], sizes = [1, 32], strides = [1, 1]} : vector<44x96xf32> to vector<1x32xf32>
    %859 = vector.broadcast %858 : vector<1x32xf32> to vector<16x32xf32>
    %860 = arith.addf %857, %859 : vector<16x32xf32>
    %c3_233 = arith.constant 3 : index
    %c0_234 = arith.constant 0 : index
    %c0_235 = arith.constant 0 : index
    %861 = vector.load %arg3[%c3_233, %c0_234, %c0_235] : memref<4x32x64xf32, #tpu.memory_space<vmem>>, vector<1x32x64xf32>
    %862 = vector.shape_cast %861 : vector<1x32x64xf32> to vector<32x64xf32>
    %cst_236 = arith.constant dense<0.000000e+00> : vector<16x64xf32>
    %863 = tpu.matmul %860, %862, %cst_236 {dimension_numbers = #tpu.dot_dimension_numbers<[1], [0], [0], [1], [0, 0, 1, 1], [], []>} : vector<16x32xf32>, vector<32x64xf32>, vector<16x64xf32> -> vector<16x64xf32>
    %864 = vector.extract_strided_slice %0 {offsets = [38, 0], sizes = [1, 64], strides = [1, 1]} : vector<44x96xf32> to vector<1x64xf32>
    %865 = vector.broadcast %864 : vector<1x64xf32> to vector<16x64xf32>
    %866 = arith.addf %863, %865 : vector<16x64xf32>
    %cst_237 = arith.constant 0.000000e+00 : f32
    %867 = vector.broadcast %cst_237 : f32 to vector<16x64xf32>
    %868 = arith.maximumf %866, %867 : vector<16x64xf32>
    %c3_238 = arith.constant 3 : index
    %c0_239 = arith.constant 0 : index
    %c0_240 = arith.constant 0 : index
    %869 = vector.load %arg4[%c3_238, %c0_239, %c0_240] : memref<4x64x32xf32, #tpu.memory_space<vmem>>, vector<1x64x32xf32>
    %870 = vector.shape_cast %869 : vector<1x64x32xf32> to vector<64x32xf32>
    %cst_241 = arith.constant dense<0.000000e+00> : vector<16x32xf32>
    %871 = tpu.matmul %868, %870, %cst_241 {dimension_numbers = #tpu.dot_dimension_numbers<[1], [0], [0], [1], [0, 0, 1, 1], [], []>} : vector<16x64xf32>, vector<64x32xf32>, vector<16x32xf32> -> vector<16x32xf32>
    %872 = vector.extract_strided_slice %0 {offsets = [39, 0], sizes = [1, 32], strides = [1, 1]} : vector<44x96xf32> to vector<1x32xf32>
    %873 = vector.broadcast %872 : vector<1x32xf32> to vector<16x32xf32>
    %874 = arith.addf %871, %873 : vector<16x32xf32>
    %875 = arith.addf %836, %874 : vector<16x32xf32>
    %cst_242 = arith.constant dense<0.000000e+00> : vector<16xf32>
    %876 = vector.multi_reduction <add>, %875, %cst_242 [1] : vector<16x32xf32> to vector<16xf32>
    %877 = vector.shape_cast %876 : vector<16xf32> to vector<16x1xf32>
    %cst_243 = arith.constant 3.200000e+01 : f32
    %878 = vector.broadcast %cst_243 : f32 to vector<16x1xf32>
    %879 = arith.divf %877, %878 : vector<16x1xf32>
    %880 = arith.mulf %875, %875 : vector<16x32xf32>
    %cst_244 = arith.constant dense<0.000000e+00> : vector<16xf32>
    %881 = vector.multi_reduction <add>, %880, %cst_244 [1] : vector<16x32xf32> to vector<16xf32>
    %882 = vector.shape_cast %881 : vector<16xf32> to vector<16x1xf32>
    %cst_245 = arith.constant 3.200000e+01 : f32
    %883 = vector.broadcast %cst_245 : f32 to vector<16x1xf32>
    %884 = arith.divf %882, %883 : vector<16x1xf32>
    %885 = arith.mulf %879, %879 : vector<16x1xf32>
    %886 = arith.subf %884, %885 : vector<16x1xf32>
    %887 = vector.broadcast %879 : vector<16x1xf32> to vector<16x32xf32>
    %888 = arith.subf %875, %887 : vector<16x32xf32>
    %cst_246 = arith.constant 9.99999974E-6 : f32
    %889 = vector.broadcast %cst_246 : f32 to vector<16x1xf32>
    %890 = arith.addf %886, %889 : vector<16x1xf32>
    %891 = math.rsqrt %890 : vector<16x1xf32>
    %892 = vector.broadcast %891 : vector<16x1xf32> to vector<16x32xf32>
    %893 = arith.mulf %888, %892 : vector<16x32xf32>
    %894 = vector.extract_strided_slice %0 {offsets = [42, 0], sizes = [1, 32], strides = [1, 1]} : vector<44x96xf32> to vector<1x32xf32>
    %895 = vector.broadcast %894 : vector<1x32xf32> to vector<16x32xf32>
    %896 = arith.mulf %893, %895 : vector<16x32xf32>
    %897 = vector.extract_strided_slice %0 {offsets = [43, 0], sizes = [1, 32], strides = [1, 1]} : vector<44x96xf32> to vector<1x32xf32>
    %898 = vector.broadcast %897 : vector<1x32xf32> to vector<16x32xf32>
    %899 = arith.addf %896, %898 : vector<16x32xf32>
    %c0_247 = arith.constant 0 : index
    %c0_248 = arith.constant 0 : index
    %900 = vector.load %arg6[%c0_247, %c0_248] : memref<16x32xf32, #tpu.memory_space<vmem>>, vector<16x32xf32>
    tpu.vector_store %arg6[%c0_247, %c0_248], %899 {strides = array<i32>} : memref<16x32xf32, #tpu.memory_space<vmem>>, vector<16x32xf32>,
    return
  }
}

</mosaic_0001>

<bundles_post_ra>
// kernel: encoder_decoder_forward.1
= control target key start
LH: loop header
LB: loop body
LE: loop exit
PB: predicated region body
PF: predicated region fallthrough
CT: control target
= control target key end

     0   :  { %vm40_vm0 = vcmask 261120   ;;  %s10903_s0 = inlined_call_operand.vmem [shape: f32[32,32], index: 0, kind: input, shape index: {}]   ;;  %s10904_s1 = inlined_call_operand.vmem [shape: f32[48,16], index: 1, kind: input, shape index: {}]   ;;  %s10905_s2 = inlined_call_operand.vmem [shape: f32[6,32,128], index: 2, kind: input, shape index: {}]   ;;  %s10906_s3 = inlined_call_operand.vmem [shape: f32[4,32,64], index: 3, kind: input, shape index: {}]   ;;  %s10907_s4 = inlined_call_operand.vmem [shape: f32[4,64,32], index: 4, kind: input, shape index: {}]   ;;  %s10908_s5 = inlined_call_operand.vmem [shape: f32[44,96], index: 5, kind: input, shape index: {}]   ;;  %s10909_s6 = inlined_call_operand.hbm [shape: f32[16,32], index: 6, kind: output, shape index: {}]  }
   0x1   :  { %v9260_v0 = vld [vmem:[%s10903_s0] sm:$0xff]  ;;  %v9265_v1 = vld [vmem:[%s10903_s0 + $0x8] sm:$0xff] }
   0x2   :  { %11 = vsyncpa [#allocation3], 0  ;;  %v41_v2 = vsel %vm40_vm0, %v9260_v0, 0.0  ;;  %v50_v3 = vmul.f32 %v9260_v0, %v9260_v0  ;;  %v51_v4 = vmul.f32 %v9265_v1, %v9265_v1  ;;  %v44_v6 = vsel %vm40_vm0, %v9265_v1, 0.0  ;;  %v9280_v8 = vld [vmem:[%s10905_s2 + $0x18] sm:$0xff]  ;;  %v9285_v9 = vld [vmem:[%s10905_s2 + $0x10] sm:$0xff] }
   0x3   :  { %42 = vadd.xlane.f32.xlu0 %v41_v2  ;;  %8307 = vmatprep.subr.mxu1 %v9280_v8  ;;  %v9292_v10 = vld [vmem:[%s10905_s2 + $0x8] sm:$0xff]  ;;  %v9301_v11 = vld [vmem:[%s10905_s2] sm:$0xff]  ;;  %v72_v25 = vlaneseq  ;;  %vm179_vm1 = vcmask 64512   ;;  %s9205_s11 = smov 96   ;;  %s9206_s12 = smov 120   ;;  %vm267_vm2 = vcmask 130048  }
   0x4   :  { %v52_v5 = vsel %vm40_vm0, %v50_v3, 0.0  ;;  %v55_v7 = vsel %vm40_vm0, %v51_v4, 0.0  ;;  %8308 = vmatpush3.msra.mxu1 %v9280_v8  ;;  %v9313_v29 = vld [vmem:[%s10908_s5] sm:$0xff]  ;;  %s9207_s13 = smov 88   ;;  %v9364_v56 = vld [vmem:[%s10904_s1 + $0x8] sm:$0xff]  ;;  %s9208_s18 = smov 64  }
   0x5   :  { %53 = vadd.xlane.f32.xlu1 %v52_v5  ;;  %8309 = vmatprep.subr.mxu1 %v9285_v9  ;;  %v9305_v27 = vshrl.u32 %v72_v25, 7  ;;  %v9369_v59 = vld [vmem:[%s10904_s1] sm:$0xff]  ;;  %s9209_s19 = smov 56   ;;  %s9210_s20 = smov 80   ;;  %vm1017_vm3 = vcmask 195584   ;;  %vm1268_vm4 = vcmask 523264  }
   0x6   :  { %8310 = vmatpush3.msra.mxu1 %v9285_v9  ;;  %s9211_s21 = smov 112   ;;  %s9212_s22 = smov 48  }
   0x7   :  { %45 = vadd.xlane.f32.xlu0 %v44_v6  ;;  %8311 = vmatprep.subr.mxu1 %v9292_v10  ;;  %v9308_v28 = vsub.s32 0, %v9305_v27  ;;  %v9316_v30 = vsub.s32 1, %v9305_v27  ;;  %v9327_v43 = vsub.s32 2, %v9305_v27  ;;  %s9213_s23 = smov 72   ;;  %s9214_s24 = smov 104  }
   0x8   :  { %8312 = vmatpush3.msra.mxu1 %v9292_v10  ;;  %s9215_s25 = smov 40   ;;  %s9216_s26 = smov 32  }
   0x9   :  { %56 = vadd.xlane.f32.xlu1 %v55_v7  ;;  %8313 = vmatprep.subr.mxu1 %v9301_v11  ;;  %v75_v32 = vrot.slane %v9313_v29, %v9308_v28  ;;  %v81_v35 = vrot.slane %v9313_v29, %v9316_v30  ;;  %v91_v44 = vrot.slane %v9313_v29, %v9327_v43  ;;  %s9217_s27 = smov 16   ;;  %s9218_s28 = smov 8  }
   0xa   :  { %8314 = vmatpush3.msra.mxu1 %v9301_v11  ;;  %s9219_s29 = smov 24   ;;  %s9220_s15 = smov [#allocation2]  }
   0xb   :  { %s7712_s16 = sshll.u32 %s9220_s15, 4  ;;  %s7713_s16 = int_to_ptr.vmem [resolvable:$true] %s7712_s16 }
   0xc   :  { %p9188_p1 = scmp.lt.s32.totalorder %s7713_s16, %s7713_s16 }
  0x8c   :  { %v43_v12 = vpop.xlane.xlu0 %42 }
  0x8d   :  { %v48_v13 = vmul.f32 0.03125, %v43_v12 }
  0x8e   :  { %v54_v14 = vpop.xlane.xlu1 %53 }
  0x8f   :  { %v60_v15 = vmul.f32 %v48_v13, %v48_v13  ;;  %v58_v16 = vmul.f32 0.03125, %v54_v14  ;;  %v64_v31 = vsub.f32 %v9260_v0, %v48_v13 }
  0x90   :  { %v46_v17 = vpop.xlane.xlu0 %45 }
  0x91   :  { %v62_v18 = vsub.f32 %v58_v16, %v60_v15  ;;  %v49_v19 = vmul.f32 0.03125, %v46_v17 }
  0x92   :  { %v57_v20 = vpop.xlane.xlu1 %56 }
  0x93   :  { %v66_v21 = vadd.f32 1e-05, %v62_v18  ;;  %v61_v22 = vmul.f32 %v49_v19, %v49_v19  ;;  %v59_v23 = vmul.f32 0.03125, %v57_v20  ;;  %v65_v36 = vsub.f32 %v9265_v1, %v49_v19 }
  0x95   :  { %8934 = vrsqrt.f32 %v66_v21  ;;  %v63_v24 = vsub.f32 %v59_v23, %v61_v22 }
  0x97   :  { %v67_v26 = vadd.f32 1e-05, %v63_v24 }
  0x99   :  { %8936 = vrsqrt.f32 %v67_v26 }
  0xa2   :  { %v8935_v33 = vpop.eup %8934 }
  0xa3   :  { %v70_v34 = vmul.f32 %v8935_v33, %v64_v31 }
  0xa5   :  { %v76_v37 = vmul.f32 %v75_v32, %v70_v34 }
  0xa6   :  { %v8937_v38 = vpop.eup %8936 }
  0xa7   :  { %v71_v39 = vmul.f32 %v8937_v38, %v65_v36  ;;  %v82_v40 = vadd.f32 %v81_v35, %v76_v37 }
  0xa9   :  { %v77_v41 = vmul.f32 %v75_v32, %v71_v39  ;;  %8315 = vmatprep.mubr.msk.f32.mxu1 %vm40_vm0, %v82_v40 }
  0xab   :  { %v83_v42 = vadd.f32 %v81_v35, %v77_v41 }
  0xad   :  { %8316 = vmatmul.mubr.msk.f32.vlgmr.msra.gmra.mxu1 %vm40_vm0, %v83_v42 }
 0x16d   :  { %v8317_v45 = vpop.f32.mrf.mxu1 }
 0x16e   :  { %v9331_v46 = vadd.f32 %v8317_v45, %v91_v44 }
 0x16f   :  { %v164_v47 = vpop.f32.mrf.mxu1 }
 0x170   :  { %v9333_v48 = vadd.f32 %v164_v47, %v91_v44  ;;  %177 = vrot.lane.b32.xlu0 %v9331_v46, %s9205_s11 }
 0x172   :  { %175 = vrot.lane.b32.xlu1 %v9333_v48, %s9205_s11  ;;  %8322 = vmatprep.mubr.msk.f32.mxu1 %vm179_vm1, %v9333_v48 }
 0x174   :  { %377 = vrot.lane.b32.xlu0 %v9333_v48, %s9206_s12 }
 0x176   :  { %383 = vrot.lane.b32.xlu1 %v9331_v46, %s9207_s13 }
 0x17a   :  { %381 = vrot.lane.b32.xlu1 %v9333_v48, %s9207_s13 }
 0x17e   :  { %379 = vrot.lane.b32.xlu1 %v9331_v46, %s9206_s12 }
 0x1e2   :  { %v178_v49 = vpop.permute.xlu0 %177 }
 0x1e3   :  { %8318 = vmatprep.subr.msk.mxu1 %vm179_vm1, %v178_v49 }
 0x1e4   :  { %8319 = vmatpush3.xpose.msk.msra.mxu1 %vm179_vm1, %v178_v49  ;;  %v176_v50 = vpop.permute.xlu1 %175 }
 0x1e5   :  { %8320 = vmatprep.subr.msk.mxu1 %vm179_vm1, %v176_v50 }
 0x1e6   :  { %v378_v52 = vpop.permute.xlu0 %377 }
 0x1e8   :  { %8321 = vmatpush3.xpose.msk.msra.mxu1 %vm179_vm1, %v176_v50  ;;  %v384_v51 = vpop.permute.xlu1 %383 }
 0x1e9   :  { %8332 = vmatprep.subr.msk.mxu1 %vm179_vm1, %v384_v51 }
 0x1eb   :  { %8323 = vmatmul.mubr.msk.f32.vlgmr.msra.gmra.mxu1 %vm179_vm1, %v9331_v46 }
 0x1ec   :  { %v382_v53 = vpop.permute.xlu1 %381  ;;  %8333 = vmatpush3.xpose.msk.msra.mxu1 %vm179_vm1, %v384_v51  ;;  %8336 = vmatprep.mubr.msk.f32.mxu1 %vm179_vm1, %v378_v52 }
 0x1ed   :  { %8334 = vmatprep.subr.msk.mxu1 %vm179_vm1, %v382_v53 }
 0x1f0   :  { %8335 = vmatpush3.xpose.msk.msra.mxu1 %vm179_vm1, %v382_v53  ;;  %v380_v54 = vpop.permute.xlu1 %379 }
 0x1f3   :  { %8337 = vmatmul.mubr.msk.f32.vlgmr.msra.gmra.mxu1 %vm179_vm1, %v380_v54 }
 0x2ab   :  { %v8324_v55 = vpop.f32.mrf.mxu1 }
 0x2ac   :  { %v264_v57 = vmul.f32 0.35355338, %v8324_v55 }
 0x2ad   :  { %v254_v58 = vpop.f32.mrf.mxu1 }
 0x2ae   :  { %v263_v60 = vmul.f32 0.35355338, %v254_v58  ;;  %v266_v61 = vadd.f32 %v264_v57, %v9364_v56 }
 0x2b0   :  { %v271_v62 = vsel %vm267_vm2, %v266_v61, -inf  ;;  %v265_v63 = vadd.f32 %v263_v60, %v9369_v59 }
 0x2b1   :  { %272 = vmax.xlane.f32.xlu1 %v271_v62 }
 0x2b2   :  { %v268_v2 = vsel %vm267_vm2, %v265_v63, -inf }
 0x2b3   :  { %v8338_v3 = vpop.f32.mrf.mxu1  ;;  %269 = vmax.xlane.f32.xlu0 %v268_v2 }
 0x2b4   :  { %v469_v5 = vmul.f32 0.35355338, %v8338_v3 }
 0x2b5   :  { %v459_v4 = vpop.f32.mrf.mxu1 }
 0x2b6   :  { %v468_v6 = vmul.f32 0.35355338, %v459_v4  ;;  %v471_v13 = vadd.f32 %v469_v5, %v9364_v56 }
 0x2b8   :  { %v470_v7 = vadd.f32 %v468_v6, %v9369_v59  ;;  %v475_v14 = vsel %vm267_vm2, %v471_v13, -inf }
 0x2ba   :  { %v472_v12 = vsel %vm267_vm2, %v470_v7, -inf }
 0x2bb   :  { %473 = vmax.xlane.f32.xlu0 %v472_v12 }
 0x2bf   :  { %476 = vmax.xlane.f32.xlu0 %v475_v14 }
 0x2c2   :  { %290 = vrot.lane.b32.xlu1 %v9333_v48, %s9208_s18 }
 0x2c6   :  { %496 = vrot.lane.b32.xlu1 %v9331_v46, %s9209_s19 }
 0x2ca   :  { %494 = vrot.lane.b32.xlu1 %v9333_v48, %s9209_s19 }
 0x2d5   :  { %292 = vrot.lane.b32.xlu0 %v9331_v46, %s9208_s18 }
 0x33a   :  { %v273_v15 = vpop.xlane.xlu1 %272 }
 0x33b   :  { %v275_v16 = vsub.f32 %v266_v61, %v273_v15 }
 0x33c   :  { %v270_v17 = vpop.xlane.xlu0 %269 }
 0x33d   :  { %v278_v18 = vmul.f32 1.442695, %v275_v16  ;;  %v274_v19 = vsub.f32 %v265_v63, %v270_v17 }
 0x33e   :  { %v291_v26 = vpop.permute.xlu1 %290 }
 0x33f   :  { %8938 = vpow2.f32 %v278_v18  ;;  %v276_v20 = vmul.f32 1.442695, %v274_v19 }
 0x341   :  { %8940 = vpow2.f32 %v276_v20 }
 0x342   :  { %v497_v37 = vpop.permute.xlu1 %496 }
 0x344   :  { %v474_v21 = vpop.xlane.xlu0 %473 }
 0x345   :  { %v478_v22 = vsub.f32 %v470_v7, %v474_v21 }
 0x346   :  { %v495_v42 = vpop.permute.xlu1 %494 }
 0x347   :  { %v480_v23 = vmul.f32 1.442695, %v478_v22 }
 0x348   :  { %v477_v24 = vpop.xlane.xlu0 %476 }
 0x349   :  { %8942 = vpow2.f32 %v480_v23  ;;  %v479_v25 = vsub.f32 %v471_v13, %v477_v24 }
 0x34b   :  { %v482_v31 = vmul.f32 1.442695, %v479_v25 }
 0x34c   :  { %v8939_v32 = vpop.eup %8938  ;;  %v293_v33 = vpop.permute.xlu0 %292 }
 0x34d   :  { %8944 = vpow2.f32 %v482_v31  ;;  %8325 = vmatprep.subr.mxu0 %v293_v33  ;;  %v283_v34 = vsel %vm267_vm2, %v8939_v32, 0.0 }
 0x34e   :  { %v8941_v35 = vpop.eup %8940  ;;  %284 = vadd.xlane.f32.xlu1 %v283_v34  ;;  %8326 = vmatpush3.msra.mxu0 %v293_v33 }
 0x34f   :  { %8327 = vmatprep.subr.mxu0 %v291_v26  ;;  %v280_v36 = vsel %vm267_vm2, %v8941_v35, 0.0 }
 0x350   :  { %281 = vadd.xlane.f32.xlu0 %v280_v36  ;;  %8328 = vmatpush3.msra.mxu0 %v291_v26 }
 0x351   :  { %8339 = vmatprep.subr.mxu0 %v497_v37 }
 0x356   :  { %v8943_v38 = vpop.eup %8942 }
 0x357   :  { %v484_v39 = vsel %vm267_vm2, %v8943_v38, 0.0 }
 0x358   :  { %485 = vadd.xlane.f32.xlu0 %v484_v39 }
 0x35a   :  { %v8945_v40 = vpop.eup %8944 }
 0x35b   :  { %v487_v41 = vsel %vm267_vm2, %v8945_v40, 0.0 }
 0x35c   :  { %488 = vadd.xlane.f32.xlu1 %v487_v41 }
 0x36d   :  { %585 = vrot.lane.b32.xlu1 %v9333_v48, %s9210_s20 }
 0x36e   :  { %587 = vrot.lane.b32.xlu0 %v9331_v46, %s9210_s20 }
 0x371   :  { %583 = vrot.lane.b32.xlu1 %v9331_v46, %s9211_s21 }
 0x372   :  { %581 = vrot.lane.b32.xlu0 %v9333_v48, %s9211_s21 }
 0x3d7   :  { %v285_v44 = vpop.xlane.xlu1 %284 }
 0x3d8   :  { %8946 = vrcp.f32 %v285_v44 }
 0x3d9   :  { %v282_v45 = vpop.xlane.xlu0 %281 }
 0x3da   :  { %8948 = vrcp.f32 %v282_v45 }
 0x3e1   :  { %v486_v47 = vpop.xlane.xlu0 %485 }
 0x3e2   :  { %8950 = vrcp.f32 %v486_v47 }
 0x3e5   :  { %v489_v49 = vpop.xlane.xlu1 %488  ;;  %v8947_v50 = vpop.eup %8946 }
 0x3e6   :  { %8952 = vrcp.f32 %v489_v49  ;;  %v289_v53 = vmul.f32 %v8947_v50, %v8939_v32  ;;  %v588_v54 = vpop.permute.xlu0 %587 }
 0x3e7   :  { %v8949_v51 = vpop.eup %8948 }
 0x3e8   :  { %v288_v52 = vmul.f32 %v8949_v51, %v8941_v35 }
 0x3e9   :  { %v586_v62 = vpop.permute.xlu1 %585 }
 0x3ea   :  { %8329 = vmatprep.mubr.msk.f32.mxu0 %vm267_vm2, %v288_v52  ;;  %v582_v61 = vpop.permute.xlu0 %581 }
 0x3eb   :  { %8330 = vmatmul.mubr.msk.f32.vlgmr.msra.gmra.mxu0 %vm267_vm2, %v289_v53 }
 0x3ec   :  { %8340 = vmatpush3.msra.mxu0 %v497_v37 }
 0x3ed   :  { %8341 = vmatprep.subr.mxu0 %v495_v42  ;;  %v584_v63 = vpop.permute.xlu1 %583 }
 0x3ee   :  { %8342 = vmatpush3.msra.mxu0 %v495_v42 }
 0x3ef   :  { %v8951_v55 = vpop.eup %8950  ;;  %8346 = vmatprep.subr.msk.mxu0 %vm179_vm1, %v588_v54 }
 0x3f0   :  { %v492_v57 = vmul.f32 %v8951_v55, %v8943_v38 }
 0x3f2   :  { %8343 = vmatprep.mubr.msk.f32.mxu0 %vm267_vm2, %v492_v57 }
 0x3f3   :  { %v8953_v58 = vpop.eup %8952 }
 0x3f4   :  { %v493_v60 = vmul.f32 %v8953_v58, %v8945_v40 }
 0x3f6   :  { %8344 = vmatmul.mubr.msk.f32.vlgmr.msra.gmra.mxu0 %vm267_vm2, %v493_v60 }
 0x3f7   :  { %8347 = vmatpush3.xpose.msk.msra.mxu0 %vm179_vm1, %v588_v54  ;;  %8350 = vmatprep.mubr.msk.f32.mxu0 %vm179_vm1, %v582_v61 }
 0x3f8   :  { %8348 = vmatprep.subr.msk.mxu0 %vm179_vm1, %v586_v62 }
 0x3fb   :  { %8349 = vmatpush3.xpose.msk.msra.mxu0 %vm179_vm1, %v586_v62 }
 0x3fe   :  { %8351 = vmatmul.mubr.msk.f32.vlgmr.msra.gmra.mxu0 %vm179_vm1, %v584_v63 }
 0x4ab   :  { %v9409_v2 = vpop.f32.mrf.mxu0 }
 0x4ad   :  { %v9411_v3 = vpop.f32.mrf.mxu0 }
 0x4b6   :  { %v9413_v4 = vpop.f32.mrf.mxu0 }
 0x4b8   :  { %v9415_v5 = vpop.f32.mrf.mxu0 }
 0x4be   :  { %v8352_v6 = vpop.f32.mrf.mxu0 }
 0x4bf   :  { %v673_v7 = vmul.f32 0.35355338, %v8352_v6 }
 0x4c0   :  { %v663_v12 = vpop.f32.mrf.mxu0 }
 0x4c1   :  { %v672_v13 = vmul.f32 0.35355338, %v663_v12  ;;  %v675_v14 = vadd.f32 %v673_v7, %v9364_v56 }
 0x4c3   :  { %v679_v15 = vsel %vm267_vm2, %v675_v14, -inf  ;;  %v674_v16 = vadd.f32 %v672_v13, %v9369_v59 }
 0x4c4   :  { %680 = vmax.xlane.f32.xlu1 %v679_v15 }
 0x4c5   :  { %v676_v17 = vsel %vm267_vm2, %v674_v16, -inf }
 0x4c6   :  { %677 = vmax.xlane.f32.xlu0 %v676_v17 }
 0x4d5   :  { %698 = vrot.lane.b32.xlu1 %v9333_v48, %s9212_s22 }
 0x4d9   :  { %791 = vrot.lane.b32.xlu1 %v9331_v46, %s9213_s23 }
 0x4dd   :  { %789 = vrot.lane.b32.xlu1 %v9333_v48, %s9213_s23 }
 0x4e1   :  { %787 = vrot.lane.b32.xlu1 %v9331_v46, %s9214_s24 }
 0x54d   :  { %v681_v18 = vpop.xlane.xlu1 %680 }
 0x54e   :  { %v683_v19 = vsub.f32 %v675_v14, %v681_v18 }
 0x54f   :  { %v678_v20 = vpop.xlane.xlu0 %677 }
 0x550   :  { %v686_v21 = vmul.f32 1.442695, %v683_v19  ;;  %v682_v22 = vsub.f32 %v674_v16, %v678_v20 }
 0x551   :  { %v699_v34 = vpop.permute.xlu1 %698 }
 0x552   :  { %8954 = vpow2.f32 %v686_v21  ;;  %v684_v23 = vmul.f32 1.442695, %v682_v22 }
 0x554   :  { %8956 = vpow2.f32 %v684_v23 }
 0x555   :  { %v792_v36 = vpop.permute.xlu1 %791 }
 0x559   :  { %v790_v42 = vpop.permute.xlu1 %789 }
 0x55d   :  { %v788_v44 = vpop.permute.xlu1 %787 }
 0x55f   :  { %v8955_v24 = vpop.eup %8954 }
 0x560   :  { %v691_v25 = vsel %vm267_vm2, %v8955_v24, 0.0 }
 0x561   :  { %v8957_v26 = vpop.eup %8956  ;;  %692 = vadd.xlane.f32.xlu0 %v691_v25 }
 0x562   :  { %v688_v31 = vsel %vm267_vm2, %v8957_v26, 0.0 }
 0x565   :  { %689 = vadd.xlane.f32.xlu0 %v688_v31 }
 0x57b   :  { %700 = vrot.lane.b32.xlu0 %v9331_v46, %s9212_s22 }
 0x57f   :  { %785 = vrot.lane.b32.xlu0 %v9333_v48, %s9214_s24 }
 0x5ea   :  { %v693_v32 = vpop.xlane.xlu0 %692 }
 0x5eb   :  { %8958 = vrcp.f32 %v693_v32 }
 0x5ee   :  { %v690_v33 = vpop.xlane.xlu0 %689 }
 0x5ef   :  { %8960 = vrcp.f32 %v690_v33 }
 0x5f2   :  { %v701_v35 = vpop.permute.xlu0 %700 }
 0x5f3   :  { %8353 = vmatprep.subr.mxu1 %v701_v35 }
 0x5f4   :  { %8354 = vmatpush3.msra.mxu1 %v701_v35 }
 0x5f5   :  { %8355 = vmatprep.subr.mxu1 %v699_v34 }
 0x5f6   :  { %8356 = vmatpush3.msra.mxu1 %v699_v34  ;;  %v786_v41 = vpop.permute.xlu0 %785 }
 0x5f7   :  { %8360 = vmatprep.subr.msk.mxu1 %vm179_vm1, %v792_v36 }
 0x5f8   :  { %v8959_v37 = vpop.eup %8958 }
 0x5f9   :  { %v697_v40 = vmul.f32 %v8959_v37, %v8955_v24 }
 0x5fc   :  { %v8961_v38 = vpop.eup %8960 }
 0x5fd   :  { %v696_v39 = vmul.f32 %v8961_v38, %v8957_v26 }
 0x5ff   :  { %8357 = vmatprep.mubr.msk.f32.mxu1 %vm267_vm2, %v696_v39 }
 0x600   :  { %8358 = vmatmul.mubr.msk.f32.vlgmr.msra.gmra.mxu1 %vm267_vm2, %v697_v40 }
 0x601   :  { %8361 = vmatpush3.xpose.msk.msra.mxu1 %vm179_vm1, %v792_v36  ;;  %8364 = vmatprep.mubr.msk.f32.mxu1 %vm179_vm1, %v786_v41 }
 0x602   :  { %8362 = vmatprep.subr.msk.mxu1 %vm179_vm1, %v790_v42 }
 0x605   :  { %8363 = vmatpush3.xpose.msk.msra.mxu1 %vm179_vm1, %v790_v42 }
 0x608   :  { %8365 = vmatmul.mubr.msk.f32.vlgmr.msra.gmra.mxu1 %vm179_vm1, %v788_v44 }
 0x6c0   :  { %v8359_v45 = vpop.f32.mrf.mxu1 }
 0x6c2   :  { %v776_v47 = vpop.f32.mrf.mxu1 }
 0x6c8   :  { %v8366_v49 = vpop.f32.mrf.mxu1 }
 0x6c9   :  { %v877_v50 = vmul.f32 0.35355338, %v8366_v49 }
 0x6ca   :  { %v867_v51 = vpop.f32.mrf.mxu1 }
 0x6cb   :  { %v876_v52 = vmul.f32 0.35355338, %v867_v51  ;;  %v879_v53 = vadd.f32 %v877_v50, %v9364_v56  ;;  %v1168_v50 = vld [vmem:[%s10906_s3 + $0x18] sm:$0xff]  ;;  %v1167_v51 = vld [vmem:[%s10906_s3 + $0x10] sm:$0xff] }
 0x6cc   :  { %8385 = vmatprep.subr.mxu1 %v1168_v50 }
 0x6cd   :  { %v883_v54 = vsel %vm267_vm2, %v879_v53, -inf  ;;  %v878_v55 = vadd.f32 %v876_v52, %v9369_v59  ;;  %8386 = vmatpush3.msra.mxu1 %v1168_v50  ;;  %v1166_v52 = vld [vmem:[%s10906_s3 + $0x8] sm:$0xff] }
 0x6ce   :  { %884 = vmax.xlane.f32.xlu1 %v883_v54  ;;  %8387 = vmatprep.subr.mxu1 %v1167_v51  ;;  %v1263_v54 = vld [vmem:[%s10907_s4 + $0x38] sm:$0xff] }
 0x6cf   :  { %v880_v57 = vsel %vm267_vm2, %v878_v55, -inf  ;;  %8388 = vmatpush3.msra.mxu1 %v1167_v51 }
 0x6d0   :  { %881 = vmax.xlane.f32.xlu0 %v880_v57  ;;  %8389 = vmatprep.subr.mxu1 %v1166_v52  ;;  %v1261_v57 = vld [vmem:[%s10907_s4 + $0x28] sm:$0xff] }
 0x6d1   :  { %8390 = vmatpush3.msra.mxu1 %v1166_v52 }
 0x6df   :  { %902 = vrot.lane.b32.xlu1 %v9333_v48, %s9215_s25 }
 0x6e3   :  { %1034 = vrot.lane.b32.xlu1 %v9280_v8, %s9216_s26 }
 0x6e7   :  { %1032 = vrot.lane.b32.xlu1 %v9285_v9, %s9216_s26 }
 0x6eb   :  { %1030 = vrot.lane.b32.xlu1 %v9292_v10, %s9216_s26 }
 0x6ef   :  { %999 = vrot.lane.b32.xlu1 %v776_v47, %s9217_s27 }
 0x757   :  { %v885_v58 = vpop.xlane.xlu1 %884 }
 0x758   :  { %v887_v60 = vsub.f32 %v879_v53, %v885_v58  ;;  %v1165_v53 = vld [vmem:[%s10906_s3] sm:$0xff] }
 0x759   :  { %v882_v61 = vpop.xlane.xlu0 %881  ;;  %8391 = vmatprep.subr.mxu1 %v1165_v53  ;;  %v1260_v58 = vld [vmem:[%s10907_s4 + $0x20] sm:$0xff] }
 0x75a   :  { %v890_v62 = vmul.f32 1.442695, %v887_v60  ;;  %v886_v63 = vsub.f32 %v878_v55, %v882_v61  ;;  %8392 = vmatpush3.msra.mxu1 %v1165_v53  ;;  %v1262_v55 = vld [vmem:[%s10907_s4 + $0x30] sm:$0xff] }
 0x75b   :  { %v903_v13 = vpop.permute.xlu1 %902 }
 0x75c   :  { %8962 = vpow2.f32 %v890_v62  ;;  %v888_v48 = vmul.f32 1.442695, %v886_v63 }
 0x75e   :  { %8964 = vpow2.f32 %v888_v48 }
 0x769   :  { %v8963_v6 = vpop.eup %8962 }
 0x76a   :  { %v895_v8 = vsel %vm267_vm2, %v8963_v6, 0.0 }
 0x76b   :  { %v8965_v7 = vpop.eup %8964  ;;  %896 = vadd.xlane.f32.xlu0 %v895_v8 }
 0x76c   :  { %v892_v9 = vsel %vm267_vm2, %v8965_v7, 0.0 }
 0x76f   :  { %893 = vadd.xlane.f32.xlu0 %v892_v9 }
 0x785   :  { %904 = vrot.lane.b32.xlu0 %v9331_v46, %s9215_s25  ;;  %v1035_v46 = vpop.permute.xlu1 %1034 }
 0x789   :  { %991 = vrot.lane.b32.xlu0 %v9415_v5, %s9218_s28 }
 0x78d   :  { %993 = vrot.lane.b32.xlu0 %v9413_v4, %s9218_s28  ;;  %v1033_v4 = vpop.permute.xlu1 %1032 }
 0x791   :  { %1001 = vrot.lane.b32.xlu0 %v8359_v45, %s9217_s27 }
 0x795   :  { %1028 = vrot.lane.b32.xlu0 %v9301_v11, %s9216_s26  ;;  %v1031_v11 = vpop.permute.xlu1 %1030 }
 0x799   :  { %v1000_v24 = vpop.permute.xlu1 %999 }
 0x7f4   :  { %v897_v10 = vpop.xlane.xlu0 %896 }
 0x7f5   :  { %8966 = vrcp.f32 %v897_v10 }
 0x7f8   :  { %v894_v12 = vpop.xlane.xlu0 %893 }
 0x7f9   :  { %8968 = vrcp.f32 %v894_v12 }
 0x7fc   :  { %v905_v14 = vpop.permute.xlu0 %904 }
 0x7fd   :  { %8367 = vmatprep.subr.mxu0 %v905_v14 }
 0x7fe   :  { %8368 = vmatpush3.msra.mxu0 %v905_v14 }
 0x7ff   :  { %8369 = vmatprep.subr.mxu0 %v903_v13 }
 0x800   :  { %8370 = vmatpush3.msra.mxu0 %v903_v13  ;;  %v992_v18 = vpop.permute.xlu0 %991 }
 0x801   :  { %8374 = vmatprep.subr.mxu0 %v1035_v46  ;;  %v1013_v25 = vsel %vm179_vm1, %v9411_v3, %v992_v18  ;;  %v9482_v3 = vsub.s32 3, %v9305_v27 }
 0x802   :  { %v8967_v5 = vpop.eup %8966  ;;  %v1015_v31 = vsel %vm267_vm2, %v1013_v25, %v1000_v24 }
 0x803   :  { %v901_v17 = vmul.f32 %v8967_v5, %v8963_v6  ;;  %v1023_v37 = vrot.slane %v9313_v29, %v9482_v3  ;;  %v9527_v5 = vsub.s32 4, %v9305_v27 }
 0x804   :  { %v994_v19 = vpop.permute.xlu0 %993 }
 0x805   :  { %v1014_v33 = vsel %vm179_vm1, %v9409_v2, %v994_v19 }
 0x806   :  { %v8969_v15 = vpop.eup %8968 }
 0x807   :  { %v900_v16 = vmul.f32 %v8969_v15, %v8965_v7  ;;  %v9530_v15 = vsub.s32 5, %v9305_v27 }
 0x808   :  { %v1002_v20 = vpop.permute.xlu0 %1001 }
 0x809   :  { %8371 = vmatprep.mubr.msk.f32.mxu0 %vm267_vm2, %v900_v16  ;;  %v1016_v34 = vsel %vm267_vm2, %v1014_v33, %v1002_v20  ;;  %v1156_v16 = vrot.slane %v9313_v29, %v9527_v5  ;;  %v1162_v18 = vrot.slane %v9313_v29, %v9530_v15  ;;  %v1256_v33 = vld [vmem:[%s10907_s4] sm:$0xff] }
 0x80a   :  { %8372 = vmatmul.mubr.msk.f32.vlgmr.msra.gmra.mxu0 %vm267_vm2, %v901_v17 }
 0x80b   :  { %8375 = vmatpush3.msra.mxu0 %v1035_v46 }
 0x80c   :  { %8376 = vmatprep.subr.mxu0 %v1033_v4  ;;  %v1029_v21 = vpop.permute.xlu0 %1028 }
 0x80d   :  { %8377 = vmatpush3.msra.mxu0 %v1033_v4 }
 0x80e   :  { %8378 = vmatprep.subr.mxu0 %v1031_v11 }
 0x80f   :  { %8379 = vmatpush3.msra.mxu0 %v1031_v11 }
 0x810   :  { %8380 = vmatprep.subr.mxu0 %v1029_v21 }
 0x811   :  { %8381 = vmatpush3.msra.mxu0 %v1029_v21 }
 0x812   :  { %8396 = vmatprep.subr.mxu0 %v1263_v54 }
 0x8ca   :  { %v8373_v22 = vpop.f32.mrf.mxu0 }
 0x8cc   :  { %v980_v23 = vpop.f32.mrf.mxu0 }
 0x8cd   :  { %1007 = vrot.lane.b32.xlu1 %v980_v23, %s9219_s29 }
 0x8d1   :  { %1009 = vrot.lane.b32.xlu1 %v8373_v22, %s9219_s29 }
 0x93f   :  { %v1008_v26 = vpop.permute.xlu1 %1007 }
 0x940   :  { %v1018_v32 = vsel %vm1017_vm3, %v1015_v31, %v1008_v26  ;;  %v1259_v26 = vld [vmem:[%s10907_s4 + $0x18] sm:$0xff]  ;;  %v1258_v31 = vld [vmem:[%s10907_s4 + $0x10] sm:$0xff] }
 0x941   :  { %8382 = vmatprep.mubr.msk.f32.mxu0 %vm40_vm0, %v1018_v32  ;;  %v1257_v32 = vld [vmem:[%s10907_s4 + $0x8] sm:$0xff] }
 0x943   :  { %v1010_v35 = vpop.permute.xlu1 %1009 }
 0x944   :  { %v1019_v36 = vsel %vm1017_vm3, %v1016_v34, %v1010_v35  ;;  %v9553_v34 = vsub.s32 6, %v9305_v27 }
 0x945   :  { %8383 = vmatmul.mubr.msk.f32.vlgmr.msra.gmra.mxu0 %vm40_vm0, %v1019_v36 }
 0x946   :  { %8397 = vmatpush3.msra.mxu0 %v1263_v54  ;;  %v1172_v35 = vrot.slane %v9313_v29, %v9553_v34  ;;  %v9583_v54 = vld [vmem:[%s10905_s2 + $0x38] sm:$0xff] }
 0x947   :  { %8398 = vmatprep.subr.mxu0 %v1262_v55  ;;  %8415 = vmatprep.subr.mxu1 %v9583_v54 }
 0x948   :  { %8399 = vmatpush3.msra.mxu0 %v1262_v55  ;;  %v9588_v55 = vld [vmem:[%s10905_s2 + $0x30] sm:$0xff] }
 0x949   :  { %8400 = vmatprep.subr.mxu0 %v1261_v57 }
 0x94a   :  { %8401 = vmatpush3.msra.mxu0 %v1261_v57  ;;  %v9595_v57 = vld [vmem:[%s10905_s2 + $0x28] sm:$0xff] }
 0x94b   :  { %8402 = vmatprep.subr.mxu0 %v1260_v58 }
 0x94c   :  { %8403 = vmatpush3.msra.mxu0 %v1260_v58  ;;  %v9602_v58 = vld [vmem:[%s10905_s2 + $0x20] sm:$0xff] }
 0x94d   :  { %8404 = vmatprep.subr.mxu0 %v1259_v26 }
 0x94e   :  { %8405 = vmatpush3.msra.mxu0 %v1259_v26 }
 0x94f   :  { %8406 = vmatprep.subr.mxu0 %v1258_v31 }
 0x950   :  { %8407 = vmatpush3.msra.mxu0 %v1258_v31 }
 0x951   :  { %8408 = vmatprep.subr.mxu0 %v1257_v32 }
 0x952   :  { %8409 = vmatpush3.msra.mxu0 %v1257_v32 }
 0x953   :  { %8410 = vmatprep.subr.mxu0 %v1256_v33 }
 0x954   :  { %8411 = vmatpush3.msra.mxu0 %v1256_v33 }
 0xa05   :  { %v8384_v38 = vpop.f32.mrf.mxu0 }
 0xa06   :  { %v1118_v39 = vadd.f32 %v8384_v38, %v1023_v37 }
 0xa07   :  { %v1112_v40 = vpop.f32.mrf.mxu0 }
 0xa08   :  { %v9487_v41 = vadd.f32 %v1118_v39, %v9265_v1  ;;  %v1113_v2 = vadd.f32 %v1112_v40, %v1023_v37 }
 0xa0a   :  { %v9490_v42 = vadd.f32 %v1113_v2, %v9260_v0  ;;  %v1126_v44 = vsel %vm40_vm0, %v9487_v41, 0.0  ;;  %v1132_v1 = vmul.f32 %v9487_v41, %v9487_v41 }
 0xa0b   :  { %1127 = vadd.xlane.f32.xlu1 %v1126_v44  ;;  %v9560_v44 = vsub.s32 7, %v9305_v27 }
 0xa0c   :  { %v1123_v45 = vsel %vm40_vm0, %v9490_v42, 0.0  ;;  %v1131_v47 = vmul.f32 %v9490_v42, %v9490_v42  ;;  %v1136_v0 = vsel %vm40_vm0, %v1132_v1, 0.0 }
 0xa0d   :  { %1124 = vadd.xlane.f32.xlu0 %v1123_v45  ;;  %v1267_v45 = vrot.slane %v9313_v29, %v9560_v44 }
 0xa0e   :  { %v1133_v49 = vsel %vm40_vm0, %v1131_v47, 0.0 }
 0xa11   :  { %1134 = vadd.xlane.f32.xlu0 %v1133_v49 }
 0xa15   :  { %1137 = vadd.xlane.f32.xlu0 %v1136_v0 }
 0xa94   :  { %v1128_v62 = vpop.xlane.xlu1 %1127 }
 0xa95   :  { %v1130_v48 = vmul.f32 0.03125, %v1128_v62 }
 0xa96   :  { %v1125_v60 = vpop.xlane.xlu0 %1124 }
 0xa97   :  { %v1129_v61 = vmul.f32 0.03125, %v1125_v60  ;;  %v1142_v10 = vmul.f32 %v1130_v48, %v1130_v48  ;;  %v1146_v19 = vsub.f32 %v9487_v41, %v1130_v48 }
 0xa99   :  { %v1141_v6 = vmul.f32 %v1129_v61, %v1129_v61  ;;  %v1145_v4 = vsub.f32 %v9490_v42, %v1129_v61 }
 0xa9a   :  { %v1135_v63 = vpop.xlane.xlu0 %1134 }
 0xa9b   :  { %v1139_v8 = vmul.f32 0.03125, %v1135_v63 }
 0xa9d   :  { %v1143_v7 = vsub.f32 %v1139_v8, %v1141_v6 }
 0xa9e   :  { %v1138_v9 = vpop.xlane.xlu0 %1137 }
 0xa9f   :  { %v1147_v12 = vadd.f32 1e-05, %v1143_v7  ;;  %v1140_v13 = vmul.f32 0.03125, %v1138_v9 }
 0xaa1   :  { %8970 = vrsqrt.f32 %v1147_v12  ;;  %v1144_v14 = vsub.f32 %v1140_v13, %v1142_v10 }
 0xaa3   :  { %v1148_v46 = vadd.f32 1e-05, %v1144_v14 }
 0xaa5   :  { %8972 = vrsqrt.f32 %v1148_v46 }
 0xaae   :  { %v8971_v17 = vpop.eup %8970 }
 0xaaf   :  { %v1151_v11 = vmul.f32 %v8971_v17, %v1145_v4  ;;  %v9611_v4 = vld [vmem:[%s10908_s5 + $0x8] sm:$0xff] }
 0xab0   :  { %v1402_v31 = vrot.slane %v9611_v4, %v9327_v43 }
 0xab1   :  { %v1157_v20 = vmul.f32 %v1156_v16, %v1151_v11  ;;  %v1385_v11 = vrot.slane %v9611_v4, %v9308_v28 }
 0xab2   :  { %v8973_v21 = vpop.eup %8972 }
 0xab3   :  { %v1152_v22 = vmul.f32 %v8973_v21, %v1146_v19  ;;  %v1163_v23 = vadd.f32 %v1162_v18, %v1157_v20 }
 0xab5   :  { %v1158_v24 = vmul.f32 %v1156_v16, %v1152_v22  ;;  %8393 = vmatprep.mubr.msk.f32.mxu1 %vm40_vm0, %v1163_v23  ;;  %v1391_v23 = vrot.slane %v9611_v4, %v9316_v30 }
 0xab7   :  { %v1164_v25 = vadd.f32 %v1162_v18, %v1158_v24 }
 0xab9   :  { %8394 = vmatmul.mubr.msk.f32.vlgmr.msra.gmra.mxu1 %vm40_vm0, %v1164_v25 }
 0xaba   :  { %8416 = vmatpush3.msra.mxu1 %v9583_v54 }
 0xabb   :  { %8417 = vmatprep.subr.mxu1 %v9588_v55 }
 0xabc   :  { %8418 = vmatpush3.msra.mxu1 %v9588_v55 }
 0xabd   :  { %8419 = vmatprep.subr.mxu1 %v9595_v57 }
 0xabe   :  { %8420 = vmatpush3.msra.mxu1 %v9595_v57 }
 0xabf   :  { %8421 = vmatprep.subr.mxu1 %v9602_v58 }
 0xac0   :  { %8422 = vmatpush3.msra.mxu1 %v9602_v58 }
 0xb79   :  { %v8395_v36 = vpop.f32.mrf.mxu1 }
 0xb7a   :  { %v1251_v37 = vadd.f32 %v8395_v36, %v1172_v35 }
 0xb7b   :  { %v1245_v38 = vpop.f32.mrf.mxu1 }
 0xb7c   :  { %v1246_v39 = vadd.f32 %v1245_v38, %v1172_v35  ;;  %v1255_v2 = vmax.f32 %v1251_v37, 0.0 }
 0xb7e   :  { %v1254_v40 = vmax.f32 %v1246_v39, 0.0 }
 0xb80   :  { %8412 = vmatprep.mubr.msk.f32.mxu0 %vm1268_vm4, %v1254_v40 }
 0xb81   :  { %8413 = vmatmul.mubr.msk.f32.vlgmr.msra.gmra.mxu0 %vm1268_vm4, %v1255_v2 }
 0xc41   :  { %v8414_v47 = vpop.f32.mrf.mxu0 }
 0xc42   :  { %v1347_v49 = vadd.f32 %v8414_v47, %v1267_v45 }
 0xc43   :  { %v1341_v1 = vpop.f32.mrf.mxu0 }
 0xc44   :  { %v9565_v0 = vadd.f32 %v1347_v49, %v9487_v41  ;;  %v1342_v50 = vadd.f32 %v1341_v1, %v1267_v45 }
 0xc46   :  { %v9568_v51 = vadd.f32 %v1342_v50, %v9490_v42  ;;  %v1355_v52 = vsel %vm40_vm0, %v9565_v0, 0.0  ;;  %v1361_v27 = vmul.f32 %v9565_v0, %v9565_v0 }
 0xc47   :  { %1356 = vadd.xlane.f32.xlu1 %v1355_v52 }
 0xc48   :  { %v1352_v29 = vsel %vm40_vm0, %v9568_v51, 0.0  ;;  %v1360_v53 = vmul.f32 %v9568_v51, %v9568_v51  ;;  %v1365_v41 = vsel %vm40_vm0, %v1361_v27, 0.0 }
 0xc49   :  { %1353 = vadd.xlane.f32.xlu0 %v1352_v29 }
 0xc4a   :  { %v1362_v42 = vsel %vm40_vm0, %v1360_v53, 0.0 }
 0xc4b   :  { %1366 = vadd.xlane.f32.xlu1 %v1365_v41 }
 0xc4d   :  { %1363 = vadd.xlane.f32.xlu0 %v1362_v42 }
 0xcd0   :  { %v1357_v60 = vpop.xlane.xlu1 %1356 }
 0xcd1   :  { %v1359_v61 = vmul.f32 0.03125, %v1357_v60 }
 0xcd2   :  { %v1354_v62 = vpop.xlane.xlu0 %1353 }
 0xcd3   :  { %v1358_v63 = vmul.f32 0.03125, %v1354_v62  ;;  %v1371_v6 = vmul.f32 %v1359_v61, %v1359_v61  ;;  %v1375_v16 = vsub.f32 %v9565_v0, %v1359_v61 }
 0xcd4   :  { %v1367_v48 = vpop.xlane.xlu1 %1366 }
 0xcd5   :  { %v1369_v8 = vmul.f32 0.03125, %v1367_v48  ;;  %v1370_v9 = vmul.f32 %v1358_v63, %v1358_v63  ;;  %v1374_v18 = vsub.f32 %v9568_v51, %v1358_v63 }
 0xcd6   :  { %v1364_v7 = vpop.xlane.xlu0 %1363 }
 0xcd7   :  { %v1373_v10 = vsub.f32 %v1369_v8, %v1371_v6  ;;  %v1368_v12 = vmul.f32 0.03125, %v1364_v7 }
 0xcd9   :  { %v1377_v13 = vadd.f32 1e-05, %v1373_v10  ;;  %v1372_v14 = vsub.f32 %v1368_v12, %v1370_v9 }
 0xcdb   :  { %8974 = vrsqrt.f32 %v1377_v13  ;;  %v1376_v46 = vadd.f32 1e-05, %v1372_v14 }
 0xcdd   :  { %8976 = vrsqrt.f32 %v1376_v46 }
 0xce8   :  { %v8975_v17 = vpop.eup %8974 }
 0xce9   :  { %v1381_v19 = vmul.f32 %v8975_v17, %v1375_v16 }
 0xcea   :  { %v8977_v20 = vpop.eup %8976 }
 0xceb   :  { %v1380_v21 = vmul.f32 %v8977_v20, %v1374_v18  ;;  %v1387_v22 = vmul.f32 %v1385_v11, %v1381_v19 }
 0xced   :  { %v1386_v24 = vmul.f32 %v1385_v11, %v1380_v21  ;;  %v1393_v26 = vadd.f32 %v1391_v23, %v1387_v22 }
 0xcef   :  { %v1392_v25 = vadd.f32 %v1391_v23, %v1386_v24 }
 0xcf1   :  { %8423 = vmatprep.mubr.msk.f32.mxu1 %vm40_vm0, %v1392_v25 }
 0xcf2   :  { %8424 = vmatmul.mubr.msk.f32.vlgmr.msra.gmra.mxu1 %vm40_vm0, %v1393_v26 }
 0xdb2   :  { %v8425_v32 = vpop.f32.mrf.mxu1 }
 0xdb3   :  { %v9623_v33 = vadd.f32 %v8425_v32, %v1402_v31 }
 0xdb4   :  { %v1475_v35 = vpop.f32.mrf.mxu1 }
 0xdb5   :  { %v9625_v36 = vadd.f32 %v1475_v35, %v1402_v31  ;;  %1488 = vrot.lane.b32.xlu0 %v9623_v33, %s9205_s11 }
 0xdb7   :  { %1486 = vrot.lane.b32.xlu1 %v9625_v36, %s9205_s11  ;;  %8430 = vmatprep.mubr.msk.f32.mxu1 %vm179_vm1, %v9625_v36 }
 0xdb9   :  { %1686 = vrot.lane.b32.xlu0 %v9625_v36, %s9206_s12 }
 0xdbb   :  { %1692 = vrot.lane.b32.xlu1 %v9623_v33, %s9207_s13 }
 0xdbf   :  { %1690 = vrot.lane.b32.xlu1 %v9625_v36, %s9207_s13 }
 0xdc3   :  { %1688 = vrot.lane.b32.xlu1 %v9623_v33, %s9206_s12 }
 0xe27   :  { %v1489_v37 = vpop.permute.xlu0 %1488 }
 0xe28   :  { %8426 = vmatprep.subr.msk.mxu1 %vm179_vm1, %v1489_v37 }
 0xe29   :  { %8427 = vmatpush3.xpose.msk.msra.mxu1 %vm179_vm1, %v1489_v37  ;;  %v1487_v38 = vpop.permute.xlu1 %1486 }
 0xe2a   :  { %8428 = vmatprep.subr.msk.mxu1 %vm179_vm1, %v1487_v38 }
 0xe2b   :  { %v1687_v40 = vpop.permute.xlu0 %1686 }
 0xe2d   :  { %8429 = vmatpush3.xpose.msk.msra.mxu1 %vm179_vm1, %v1487_v38  ;;  %v1693_v39 = vpop.permute.xlu1 %1692 }
 0xe2e   :  { %8440 = vmatprep.subr.msk.mxu1 %vm179_vm1, %v1693_v39 }
 0xe30   :  { %8431 = vmatmul.mubr.msk.f32.vlgmr.msra.gmra.mxu1 %vm179_vm1, %v9623_v33 }
 0xe31   :  { %v1691_v2 = vpop.permute.xlu1 %1690  ;;  %8441 = vmatpush3.xpose.msk.msra.mxu1 %vm179_vm1, %v1693_v39  ;;  %8444 = vmatprep.mubr.msk.f32.mxu1 %vm179_vm1, %v1687_v40 }
 0xe32   :  { %8442 = vmatprep.subr.msk.mxu1 %vm179_vm1, %v1691_v2 }
 0xe35   :  { %8443 = vmatpush3.xpose.msk.msra.mxu1 %vm179_vm1, %v1691_v2  ;;  %v1689_v45 = vpop.permute.xlu1 %1688 }
 0xe38   :  { %8445 = vmatmul.mubr.msk.f32.vlgmr.msra.gmra.mxu1 %vm179_vm1, %v1689_v45 }
 0xef0   :  { %v8432_v47 = vpop.f32.mrf.mxu1 }
 0xef1   :  { %v1574_v49 = vmul.f32 0.35355338, %v8432_v47 }
 0xef2   :  { %v1564_v1 = vpop.f32.mrf.mxu1 }
 0xef3   :  { %v1573_v50 = vmul.f32 0.35355338, %v1564_v1  ;;  %v1576_v52 = vadd.f32 %v1574_v49, %v9364_v56 }
 0xef5   :  { %v1580_v27 = vsel %vm267_vm2, %v1576_v52, -inf  ;;  %v1575_v29 = vadd.f32 %v1573_v50, %v9369_v59 }
 0xef6   :  { %1581 = vmax.xlane.f32.xlu1 %v1580_v27 }
 0xef7   :  { %v1577_v53 = vsel %vm267_vm2, %v1575_v29, -inf }
 0xef8   :  { %v8446_v41 = vpop.f32.mrf.mxu1  ;;  %1578 = vmax.xlane.f32.xlu0 %v1577_v53 }
 0xef9   :  { %v1778_v60 = vmul.f32 0.35355338, %v8446_v41 }
 0xefa   :  { %v1768_v42 = vpop.f32.mrf.mxu1 }
 0xefb   :  { %v1777_v61 = vmul.f32 0.35355338, %v1768_v42  ;;  %v1780_v48 = vadd.f32 %v1778_v60, %v9364_v56 }
 0xefd   :  { %v1779_v62 = vadd.f32 %v1777_v61, %v9369_v59  ;;  %v1784_v6 = vsel %vm267_vm2, %v1780_v48, -inf }
 0xeff   :  { %v1781_v63 = vsel %vm267_vm2, %v1779_v62, -inf }
 0xf00   :  { %1782 = vmax.xlane.f32.xlu0 %v1781_v63 }
 0xf04   :  { %1785 = vmax.xlane.f32.xlu0 %v1784_v6 }
 0xf07   :  { %1599 = vrot.lane.b32.xlu1 %v9625_v36, %s9208_s18 }
 0xf0b   :  { %1805 = vrot.lane.b32.xlu1 %v9623_v33, %s9209_s19 }
 0xf0f   :  { %1803 = vrot.lane.b32.xlu1 %v9625_v36, %s9209_s19 }
 0xf1a   :  { %1601 = vrot.lane.b32.xlu0 %v9623_v33, %s9208_s18 }
 0xf7f   :  { %v1582_v59 = vpop.xlane.xlu1 %1581 }
 0xf80   :  { %v1584_v8 = vsub.f32 %v1576_v52, %v1582_v59 }
 0xf81   :  { %v1579_v7 = vpop.xlane.xlu0 %1578 }
 0xf82   :  { %v1587_v56 = vmul.f32 1.442695, %v1584_v8  ;;  %v1583_v9 = vsub.f32 %v1575_v29, %v1579_v7  ;;  %v9174_v8 = vld [vmem:[%s10904_s1 + $0x8] sm:$0xff] }
 0xf83   :  { %v1600_v17 = vpop.permute.xlu1 %1599 }
 0xf84   :  { %8978 = vpow2.f32 %v1587_v56  ;;  %v1585_v10 = vmul.f32 1.442695, %v1583_v9  ;;  %v9175_v9 = vld [vmem:[%s10904_s1] sm:$0xff] }
 0xf86   :  { %8980 = vpow2.f32 %v1585_v10 }
 0xf87   :  { %v1806_v23 = vpop.permute.xlu1 %1805 }
 0xf89   :  { %v1783_v12 = vpop.xlane.xlu0 %1782 }
 0xf8a   :  { %v1787_v13 = vsub.f32 %v1779_v62, %v1783_v12 }
 0xf8b   :  { %v1804_v32 = vpop.permute.xlu1 %1803 }
 0xf8c   :  { %v1789_v14 = vmul.f32 1.442695, %v1787_v13 }
 0xf8d   :  { %v1786_v46 = vpop.xlane.xlu0 %1785 }
 0xf8e   :  { %8982 = vpow2.f32 %v1789_v14  ;;  %v1788_v16 = vsub.f32 %v1780_v48, %v1786_v46 }
 0xf90   :  { %v1791_v11 = vmul.f32 1.442695, %v1788_v16 }
 0xf91   :  { %v8979_v18 = vpop.eup %8978  ;;  %v1602_v19 = vpop.permute.xlu0 %1601 }
 0xf92   :  { %8984 = vpow2.f32 %v1791_v11  ;;  %8433 = vmatprep.subr.mxu0 %v1602_v19  ;;  %v1592_v20 = vsel %vm267_vm2, %v8979_v18, 0.0 }
 0xf93   :  { %v8981_v21 = vpop.eup %8980  ;;  %1593 = vadd.xlane.f32.xlu1 %v1592_v20  ;;  %8434 = vmatpush3.msra.mxu0 %v1602_v19 }
 0xf94   :  { %8435 = vmatprep.subr.mxu0 %v1600_v17  ;;  %v1589_v22 = vsel %vm267_vm2, %v8981_v21, 0.0 }
 0xf95   :  { %1590 = vadd.xlane.f32.xlu0 %v1589_v22  ;;  %8436 = vmatpush3.msra.mxu0 %v1600_v17 }
 0xf96   :  { %8447 = vmatprep.subr.mxu0 %v1806_v23 }
 0xf9b   :  { %v8983_v24 = vpop.eup %8982 }
 0xf9c   :  { %v1793_v25 = vsel %vm267_vm2, %v8983_v24, 0.0 }
 0xf9d   :  { %1794 = vadd.xlane.f32.xlu0 %v1793_v25 }
 0xf9f   :  { %v8985_v26 = vpop.eup %8984 }
 0xfa0   :  { %v1796_v31 = vsel %vm267_vm2, %v8985_v26, 0.0 }
 0xfa1   :  { %1797 = vadd.xlane.f32.xlu1 %v1796_v31 }
 0xfb2   :  { %1894 = vrot.lane.b32.xlu1 %v9625_v36, %s9210_s20 }
 0xfb3   :  { %1896 = vrot.lane.b32.xlu0 %v9623_v33, %s9210_s20 }
 0xfb6   :  { %1892 = vrot.lane.b32.xlu1 %v9623_v33, %s9211_s21 }
 0xfb7   :  { %1890 = vrot.lane.b32.xlu0 %v9625_v36, %s9211_s21 }
0x101c   :  { %v1594_v35 = vpop.xlane.xlu1 %1593 }
0x101d   :  { %8986 = vrcp.f32 %v1594_v35 }
0x101e   :  { %v1591_v37 = vpop.xlane.xlu0 %1590 }
0x101f   :  { %8988 = vrcp.f32 %v1591_v37 }
0x1026   :  { %v1795_v38 = vpop.xlane.xlu0 %1794 }
0x1027   :  { %8990 = vrcp.f32 %v1795_v38 }
0x102a   :  { %v1798_v39 = vpop.xlane.xlu1 %1797  ;;  %v8987_v40 = vpop.eup %8986 }
0x102b   :  { %8992 = vrcp.f32 %v1798_v39  ;;  %v1598_v47 = vmul.f32 %v8987_v40, %v8979_v18  ;;  %v1897_v49 = vpop.permute.xlu0 %1896 }
0x102c   :  { %v8989_v2 = vpop.eup %8988 }
0x102d   :  { %v1597_v45 = vmul.f32 %v8989_v2, %v8981_v21 }
0x102e   :  { %v1895_v53 = vpop.permute.xlu1 %1894 }
0x102f   :  { %8437 = vmatprep.mubr.msk.f32.mxu0 %vm267_vm2, %v1597_v45  ;;  %v1891_v29 = vpop.permute.xlu0 %1890 }
0x1030   :  { %8438 = vmatmul.mubr.msk.f32.vlgmr.msra.gmra.mxu0 %vm267_vm2, %v1598_v47 }
0x1031   :  { %8448 = vmatpush3.msra.mxu0 %v1806_v23 }
0x1032   :  { %8449 = vmatprep.subr.mxu0 %v1804_v32  ;;  %v1893_v41 = vpop.permute.xlu1 %1892 }
0x1033   :  { %8450 = vmatpush3.msra.mxu0 %v1804_v32 }
0x1034   :  { %v8991_v1 = vpop.eup %8990  ;;  %8454 = vmatprep.subr.msk.mxu0 %vm179_vm1, %v1897_v49 }
0x1035   :  { %v1801_v50 = vmul.f32 %v8991_v1, %v8983_v24 }
0x1037   :  { %8451 = vmatprep.mubr.msk.f32.mxu0 %vm267_vm2, %v1801_v50 }
0x1038   :  { %v8993_v52 = vpop.eup %8992 }
0x1039   :  { %v1802_v27 = vmul.f32 %v8993_v52, %v8985_v26 }
0x103b   :  { %8452 = vmatmul.mubr.msk.f32.vlgmr.msra.gmra.mxu0 %vm267_vm2, %v1802_v27 }
0x103c   :  { %8455 = vmatpush3.xpose.msk.msra.mxu0 %vm179_vm1, %v1897_v49  ;;  %8458 = vmatprep.mubr.msk.f32.mxu0 %vm179_vm1, %v1891_v29 }
0x103d   :  { %8456 = vmatprep.subr.msk.mxu0 %vm179_vm1, %v1895_v53 }
0x1040   :  { %8457 = vmatpush3.xpose.msk.msra.mxu0 %vm179_vm1, %v1895_v53 }
0x1043   :  { %8459 = vmatmul.mubr.msk.f32.vlgmr.msra.gmra.mxu0 %vm179_vm1, %v1893_v41 }
0x10f0   :  { %v9691_v42 = vpop.f32.mrf.mxu0 }
0x10f2   :  { %v9693_v60 = vpop.f32.mrf.mxu0 }
0x10fb   :  { %v9695_v61 = vpop.f32.mrf.mxu0 }
0x10fd   :  { %v9697_v62 = vpop.f32.mrf.mxu0 }
0x1103   :  { %v8460_v63 = vpop.f32.mrf.mxu0 }
0x1104   :  { %v1982_v48 = vmul.f32 0.35355338, %v8460_v63 }
0x1105   :  { %v1972_v6 = vpop.f32.mrf.mxu0 }
0x1106   :  { %v1981_v59 = vmul.f32 0.35355338, %v1972_v6  ;;  %v1984_v7 = vadd.f32 %v9174_v8, %v1982_v48 }
0x1108   :  { %v1988_v56 = vsel %vm267_vm2, %v1984_v7, -inf  ;;  %v1983_v10 = vadd.f32 %v9175_v9, %v1981_v59 }
0x1109   :  { %1989 = vmax.xlane.f32.xlu1 %v1988_v56 }
0x110a   :  { %v1985_v12 = vsel %vm267_vm2, %v1983_v10, -inf }
0x110b   :  { %1986 = vmax.xlane.f32.xlu0 %v1985_v12 }
0x111a   :  { %2007 = vrot.lane.b32.xlu1 %v9625_v36, %s9212_s22 }
0x111e   :  { %2100 = vrot.lane.b32.xlu1 %v9623_v33, %s9213_s23 }
0x1122   :  { %2098 = vrot.lane.b32.xlu1 %v9625_v36, %s9213_s23 }
0x1126   :  { %2096 = vrot.lane.b32.xlu1 %v9623_v33, %s9214_s24 }
0x1192   :  { %v1990_v13 = vpop.xlane.xlu1 %1989 }
0x1193   :  { %v1992_v14 = vsub.f32 %v1984_v7, %v1990_v13 }
0x1194   :  { %v1987_v46 = vpop.xlane.xlu0 %1986 }
0x1195   :  { %v1995_v16 = vmul.f32 1.442695, %v1992_v14  ;;  %v1991_v17 = vsub.f32 %v1983_v10, %v1987_v46 }
0x1196   :  { %v2008_v24 = vpop.permute.xlu1 %2007 }
0x1197   :  { %8994 = vpow2.f32 %v1995_v16  ;;  %v1993_v11 = vmul.f32 1.442695, %v1991_v17 }
0x1199   :  { %8996 = vpow2.f32 %v1993_v11 }
0x119a   :  { %v2101_v26 = vpop.permute.xlu1 %2100 }
0x119e   :  { %v2099_v39 = vpop.permute.xlu1 %2098 }
0x11a2   :  { %v2097_v40 = vpop.permute.xlu1 %2096 }
0x11a4   :  { %v8995_v18 = vpop.eup %8994 }
0x11a5   :  { %v2000_v19 = vsel %vm267_vm2, %v8995_v18, 0.0 }
0x11a6   :  { %v8997_v20 = vpop.eup %8996  ;;  %2001 = vadd.xlane.f32.xlu0 %v2000_v19 }
0x11a7   :  { %v1997_v21 = vsel %vm267_vm2, %v8997_v20, 0.0 }
0x11aa   :  { %1998 = vadd.xlane.f32.xlu0 %v1997_v21 }
0x11c0   :  { %2009 = vrot.lane.b32.xlu0 %v9623_v33, %s9212_s22 }
0x11c4   :  { %2094 = vrot.lane.b32.xlu0 %v9625_v36, %s9214_s24 }
0x122f   :  { %v2002_v22 = vpop.xlane.xlu0 %2001 }
0x1230   :  { %8998 = vrcp.f32 %v2002_v22 }
0x1233   :  { %v1999_v23 = vpop.xlane.xlu0 %1998 }
0x1234   :  { %9000 = vrcp.f32 %v1999_v23 }
0x1237   :  { %v2010_v25 = vpop.permute.xlu0 %2009 }
0x1238   :  { %8461 = vmatprep.subr.mxu1 %v2010_v25 }
0x1239   :  { %8462 = vmatpush3.msra.mxu1 %v2010_v25 }
0x123a   :  { %8463 = vmatprep.subr.mxu1 %v2008_v24 }
0x123b   :  { %8464 = vmatpush3.msra.mxu1 %v2008_v24  ;;  %v2095_v38 = vpop.permute.xlu0 %2094 }
0x123c   :  { %8468 = vmatprep.subr.msk.mxu1 %vm179_vm1, %v2101_v26 }
0x123d   :  { %v8999_v31 = vpop.eup %8998 }
0x123e   :  { %v2006_v37 = vmul.f32 %v8999_v31, %v8995_v18 }
0x1241   :  { %v9001_v32 = vpop.eup %9000 }
0x1242   :  { %v2005_v35 = vmul.f32 %v9001_v32, %v8997_v20 }
0x1244   :  { %8465 = vmatprep.mubr.msk.f32.mxu1 %vm267_vm2, %v2005_v35 }
0x1245   :  { %8466 = vmatmul.mubr.msk.f32.vlgmr.msra.gmra.mxu1 %vm267_vm2, %v2006_v37 }
0x1246   :  { %8469 = vmatpush3.xpose.msk.msra.mxu1 %vm179_vm1, %v2101_v26  ;;  %8472 = vmatprep.mubr.msk.f32.mxu1 %vm179_vm1, %v2095_v38 }
0x1247   :  { %8470 = vmatprep.subr.msk.mxu1 %vm179_vm1, %v2099_v39 }
0x124a   :  { %8471 = vmatpush3.xpose.msk.msra.mxu1 %vm179_vm1, %v2099_v39 }
0x124d   :  { %8473 = vmatmul.mubr.msk.f32.vlgmr.msra.gmra.mxu1 %vm179_vm1, %v2097_v40 }
0x1305   :  { %v8467_v2 = vpop.f32.mrf.mxu1 }
0x1307   :  { %v2085_v45 = vpop.f32.mrf.mxu1 }
0x130d   :  { %v8474_v47 = vpop.f32.mrf.mxu1 }
0x130e   :  { %v2186_v49 = vmul.f32 0.35355338, %v8474_v47 }
0x130f   :  { %v2176_v1 = vpop.f32.mrf.mxu1 }
0x1310   :  { %v2185_v50 = vmul.f32 0.35355338, %v2176_v1  ;;  %v2188_v52 = vadd.f32 %v9174_v8, %v2186_v49 }
0x1312   :  { %v2192_v27 = vsel %vm267_vm2, %v2188_v52, -inf  ;;  %v2187_v29 = vadd.f32 %v9175_v9, %v2185_v50 }
0x1313   :  { %2193 = vmax.xlane.f32.xlu1 %v2192_v27  ;;  %v9795_v27 = vld [vmem:[%s10903_s0 + $0x10] sm:$0xff] }
0x1314   :  { %v2189_v53 = vsel %vm267_vm2, %v2187_v29, -inf }
0x1315   :  { %2190 = vmax.xlane.f32.xlu0 %v2189_v53  ;;  %v2703_v53 = vsel %vm40_vm0, %v9795_v27, 0.0 }
0x1324   :  { %2211 = vrot.lane.b32.xlu1 %v9625_v36, %s9215_s25 }
0x1328   :  { %2342 = vrot.lane.b32.xlu1 %v9583_v54, %s9216_s26 }
0x132c   :  { %2340 = vrot.lane.b32.xlu1 %v9588_v55, %s9216_s26 }
0x1330   :  { %2338 = vrot.lane.b32.xlu1 %v9595_v57, %s9216_s26 }
0x1334   :  { %2308 = vrot.lane.b32.xlu1 %v2085_v45, %s9217_s27 }
0x139c   :  { %v2194_v41 = vpop.xlane.xlu1 %2193 }
0x139d   :  { %v2196_v63 = vsub.f32 %v2188_v52, %v2194_v41  ;;  %v2711_v41 = vmul.f32 %v9795_v27, %v9795_v27 }
0x139e   :  { %v2191_v48 = vpop.xlane.xlu0 %2190 }
0x139f   :  { %v2199_v6 = vmul.f32 1.442695, %v2196_v63  ;;  %v2195_v59 = vsub.f32 %v2187_v29, %v2191_v48  ;;  %v2713_v63 = vsel %vm40_vm0, %v2711_v41, 0.0  ;;  %v7790_v48 = vld [vmem:[%s10906_s3 + $0x38] sm:$0xff] }
0x13a0   :  { %v2212_v9 = vpop.permute.xlu1 %2211  ;;  %8493 = vmatprep.subr.mxu1 %v7790_v48 }
0x13a1   :  { %9002 = vpow2.f32 %v2199_v6  ;;  %v2197_v8 = vmul.f32 1.442695, %v2195_v59  ;;  %v7789_v6 = vld [vmem:[%s10906_s3 + $0x30] sm:$0xff]  ;;  %8494 = vmatpush3.msra.mxu1 %v7790_v48  ;;  %v7788_v59 = vld [vmem:[%s10906_s3 + $0x28] sm:$0xff] }
0x13a2   :  { %8495 = vmatprep.subr.mxu1 %v7789_v6 }
0x13a3   :  { %9004 = vpow2.f32 %v2197_v8  ;;  %8496 = vmatpush3.msra.mxu1 %v7789_v6  ;;  %v7787_v8 = vld [vmem:[%s10906_s3 + $0x20] sm:$0xff] }
0x13a4   :  { %8497 = vmatprep.subr.mxu1 %v7788_v59 }
0x13a5   :  { %8498 = vmatpush3.msra.mxu1 %v7788_v59 }
0x13a6   :  { %8499 = vmatprep.subr.mxu1 %v7787_v8 }
0x13a7   :  { %8500 = vmatpush3.msra.mxu1 %v7787_v8 }
0x13ae   :  { %v9003_v36 = vpop.eup %9002 }
0x13af   :  { %v2204_v7 = vsel %vm267_vm2, %v9003_v36, 0.0 }
0x13b0   :  { %v9005_v54 = vpop.eup %9004  ;;  %2205 = vadd.xlane.f32.xlu0 %v2204_v7  ;;  %v7800_v7 = vld [vmem:[%s10907_s4 + $0x78] sm:$0xff] }
0x13b1   :  { %v2201_v55 = vsel %vm267_vm2, %v9005_v54, 0.0 }
0x13b4   :  { %2202 = vadd.xlane.f32.xlu0 %v2201_v55  ;;  %v7798_v55 = vld [vmem:[%s10907_s4 + $0x68] sm:$0xff] }
0x13ca   :  { %2213 = vrot.lane.b32.xlu0 %v9623_v33, %s9215_s25  ;;  %v2343_v33 = vpop.permute.xlu1 %2342 }
0x13ce   :  { %2300 = vrot.lane.b32.xlu0 %v9697_v62, %s9218_s28 }
0x13d2   :  { %2302 = vrot.lane.b32.xlu0 %v9695_v61, %s9218_s28  ;;  %v2341_v61 = vpop.permute.xlu1 %2340 }
0x13d6   :  { %2310 = vrot.lane.b32.xlu0 %v8467_v2, %s9217_s27 }
0x13da   :  { %2336 = vrot.lane.b32.xlu0 %v9602_v58, %s9216_s26  ;;  %v2339_v58 = vpop.permute.xlu1 %2338 }
0x13de   :  { %v2309_v20 = vpop.permute.xlu1 %2308 }
0x1439   :  { %v2206_v57 = vpop.xlane.xlu0 %2205 }
0x143a   :  { %9006 = vrcp.f32 %v2206_v57  ;;  %v7797_v57 = vld [vmem:[%s10907_s4 + $0x60] sm:$0xff] }
0x143d   :  { %v2203_v56 = vpop.xlane.xlu0 %2202 }
0x143e   :  { %9008 = vrcp.f32 %v2203_v56 }
0x1441   :  { %v2214_v10 = vpop.permute.xlu0 %2213 }
0x1442   :  { %8475 = vmatprep.subr.mxu0 %v2214_v10 }
0x1443   :  { %8476 = vmatpush3.msra.mxu0 %v2214_v10 }
0x1444   :  { %8477 = vmatprep.subr.mxu0 %v2212_v9 }
0x1445   :  { %8478 = vmatpush3.msra.mxu0 %v2212_v9  ;;  %v2301_v46 = vpop.permute.xlu0 %2300 }
0x1446   :  { %8482 = vmatprep.subr.mxu0 %v2343_v33  ;;  %v2322_v21 = vsel %vm179_vm1, %v9693_v60, %v2301_v46  ;;  %v2331_v60 = vrot.slane %v9611_v4, %v9482_v3 }
0x1447   :  { %v9007_v62 = vpop.eup %9006  ;;  %v2324_v23 = vsel %vm267_vm2, %v2322_v21, %v2309_v20 }
0x1448   :  { %v2210_v14 = vmul.f32 %v9007_v62, %v9003_v36  ;;  %v9818_v36 = vld [vmem:[%s10905_s2 + $0x58] sm:$0xff] }
0x1449   :  { %v2303_v16 = vpop.permute.xlu0 %2302  ;;  %8523 = vmatprep.subr.mxu1 %v9818_v36 }
0x144a   :  { %v2323_v25 = vsel %vm179_vm1, %v9691_v42, %v2303_v16  ;;  %v9773_v42 = vld [vmem:[%s10903_s0 + $0x18] sm:$0xff] }
0x144b   :  { %v9009_v12 = vpop.eup %9008  ;;  %v2712_v1 = vmul.f32 %v9773_v42, %v9773_v42 }
0x144c   :  { %v2209_v13 = vmul.f32 %v9009_v12, %v9005_v54  ;;  %v7799_v54 = vld [vmem:[%s10907_s4 + $0x70] sm:$0xff] }
0x144d   :  { %v2311_v17 = vpop.permute.xlu0 %2310  ;;  %v2716_v50 = vsel %vm40_vm0, %v2712_v1, 0.0 }
0x144e   :  { %8479 = vmatprep.mubr.msk.f32.mxu0 %vm267_vm2, %v2209_v13  ;;  %v2325_v26 = vsel %vm267_vm2, %v2323_v25, %v2311_v17 }
0x144f   :  { %8480 = vmatmul.mubr.msk.f32.vlgmr.msra.gmra.mxu0 %vm267_vm2, %v2210_v14 }
0x1450   :  { %8483 = vmatpush3.msra.mxu0 %v2343_v33 }
0x1451   :  { %8484 = vmatprep.subr.mxu0 %v2341_v61  ;;  %v2337_v11 = vpop.permute.xlu0 %2336 }
0x1452   :  { %8485 = vmatpush3.msra.mxu0 %v2341_v61 }
0x1453   :  { %8486 = vmatprep.subr.mxu0 %v2339_v58 }
0x1454   :  { %8487 = vmatpush3.msra.mxu0 %v2339_v58 }
0x1455   :  { %8488 = vmatprep.subr.mxu0 %v2337_v11 }
0x1456   :  { %8489 = vmatpush3.msra.mxu0 %v2337_v11 }
0x1457   :  { %8504 = vmatprep.subr.mxu0 %v7800_v7 }
0x150f   :  { %v8481_v18 = vpop.f32.mrf.mxu0 }
0x1511   :  { %v2289_v19 = vpop.f32.mrf.mxu0 }
0x1512   :  { %2316 = vrot.lane.b32.xlu1 %v2289_v19, %s9219_s29 }
0x1516   :  { %2318 = vrot.lane.b32.xlu1 %v8481_v18, %s9219_s29 }
0x1584   :  { %v2317_v22 = vpop.permute.xlu1 %2316 }
0x1585   :  { %v2326_v24 = vsel %vm1017_vm3, %v2324_v23, %v2317_v22 }
0x1586   :  { %8490 = vmatprep.mubr.msk.f32.mxu0 %vm40_vm0, %v2326_v24 }
0x1588   :  { %v2319_v31 = vpop.permute.xlu1 %2318 }
0x1589   :  { %v2327_v32 = vsel %vm1017_vm3, %v2325_v26, %v2319_v31 }
0x158a   :  { %8491 = vmatmul.mubr.msk.f32.vlgmr.msra.gmra.mxu0 %vm40_vm0, %v2327_v32 }
0x158b   :  { %8505 = vmatpush3.msra.mxu0 %v7800_v7  ;;  %v9852_v7 = vld [vmem:[%s10905_s2 + $0x50] sm:$0xff] }
0x158c   :  { %8506 = vmatprep.subr.mxu0 %v7799_v54 }
0x158d   :  { %8507 = vmatpush3.msra.mxu0 %v7799_v54 }
0x158e   :  { %8508 = vmatprep.subr.mxu0 %v7798_v55 }
0x158f   :  { %8509 = vmatpush3.msra.mxu0 %v7798_v55  ;;  %v9859_v55 = vld [vmem:[%s10905_s2 + $0x48] sm:$0xff] }
0x1590   :  { %8510 = vmatprep.subr.mxu0 %v7797_v57 }
0x1591   :  { %8511 = vmatpush3.msra.mxu0 %v7797_v57 }
0x164a   :  { %v8492_v35 = vpop.f32.mrf.mxu0 }
0x164b   :  { %v2426_v37 = vadd.f32 %v8492_v35, %v2331_v60 }
0x164c   :  { %v2420_v38 = vpop.f32.mrf.mxu0 }
0x164d   :  { %v9768_v39 = vadd.f32 %v2426_v37, %v9565_v0  ;;  %v2421_v40 = vadd.f32 %v2420_v38, %v2331_v60  ;;  %v2706_v0 = vsel %vm40_vm0, %v9773_v42, 0.0 }
0x164f   :  { %v9776_v2 = vadd.f32 %v2421_v40, %v9568_v51  ;;  %v2434_v45 = vsel %vm40_vm0, %v9768_v39, 0.0  ;;  %v2440_v49 = vmul.f32 %v9768_v39, %v9768_v39 }
0x1650   :  { %2435 = vadd.xlane.f32.xlu1 %v2434_v45 }
0x1651   :  { %v2431_v47 = vsel %vm40_vm0, %v9776_v2, 0.0  ;;  %v2444_v51 = vsel %vm40_vm0, %v2440_v49, 0.0  ;;  %v2439_v52 = vmul.f32 %v9776_v2, %v9776_v2 }
0x1652   :  { %2432 = vadd.xlane.f32.xlu0 %v2431_v47  ;;  %v2464_v47 = vrot.slane %v9611_v4, %v9527_v5 }
0x1653   :  { %v2441_v29 = vsel %vm40_vm0, %v2439_v52, 0.0 }
0x1654   :  { %2707 = vadd.xlane.f32.xlu1 %v2706_v0 }
0x1656   :  { %2445 = vadd.xlane.f32.xlu0 %v2444_v51 }
0x1658   :  { %2717 = vadd.xlane.f32.xlu1 %v2716_v50  ;;  %v2470_v50 = vrot.slane %v9611_v4, %v9530_v15 }
0x165a   :  { %2442 = vadd.xlane.f32.xlu0 %v2441_v29 }
0x165e   :  { %2704 = vadd.xlane.f32.xlu0 %v2703_v53  ;;  %v9842_v53 = vld [vmem:[%s10908_s5 + $0x10] sm:$0xff] }
0x165f   :  { %v2736_v59 = vrot.slane %v9842_v53, %v9308_v28 }
0x1662   :  { %2714 = vadd.xlane.f32.xlu0 %v2713_v63 }
0x16d9   :  { %v2436_v56 = vpop.xlane.xlu1 %2435 }
0x16da   :  { %v2438_v10 = vmul.f32 0.03125, %v2436_v56 }
0x16db   :  { %v2433_v9 = vpop.xlane.xlu0 %2432 }
0x16dc   :  { %v2450_v61 = vmul.f32 %v2438_v10, %v2438_v10  ;;  %v2437_v13 = vmul.f32 0.03125, %v2433_v9  ;;  %v2454_v40 = vsub.f32 %v9768_v39, %v2438_v10  ;;  %v2742_v9 = vrot.slane %v9842_v53, %v9316_v30  ;;  %v9868_v10 = vld [vmem:[%s10905_s2 + $0x40] sm:$0xff] }
0x16dd   :  { %v2708_v33 = vpop.xlane.xlu1 %2707 }
0x16de   :  { %v2710_v62 = vmul.f32 0.03125, %v2708_v33  ;;  %v2449_v18 = vmul.f32 %v2437_v13, %v2437_v13  ;;  %v2453_v0 = vsub.f32 %v9776_v2, %v2437_v13  ;;  %v7795_v13 = vld [vmem:[%s10907_s4 + $0x50] sm:$0xff] }
0x16df   :  { %v2446_v12 = vpop.xlane.xlu0 %2445 }
0x16e0   :  { %v2448_v14 = vmul.f32 0.03125, %v2446_v12  ;;  %v2722_v58 = vmul.f32 %v2710_v62, %v2710_v62  ;;  %v2726_v41 = vsub.f32 %v9773_v42, %v2710_v62 }
0x16e1   :  { %v2718_v46 = vpop.xlane.xlu1 %2717 }
0x16e2   :  { %v2452_v16 = vsub.f32 %v2448_v14, %v2450_v61  ;;  %v2720_v17 = vmul.f32 0.03125, %v2718_v46  ;;  %v7796_v61 = vld [vmem:[%s10907_s4 + $0x58] sm:$0xff]  ;;  %v7794_v14 = vld [vmem:[%s10907_s4 + $0x48] sm:$0xff]  ;;  %v2481_v46 = vrot.slane %v9611_v4, %v9553_v34 }
0x16e3   :  { %v2443_v11 = vpop.xlane.xlu0 %2442  ;;  %8512 = vmatprep.subr.mxu0 %v7796_v61 }
0x16e4   :  { %v2456_v19 = vadd.f32 1e-05, %v2452_v16  ;;  %v2447_v20 = vmul.f32 0.03125, %v2443_v11  ;;  %v2724_v21 = vsub.f32 %v2720_v17, %v2722_v58  ;;  %8513 = vmatpush3.msra.mxu0 %v7796_v61  ;;  %v7793_v58 = vld [vmem:[%s10907_s4 + $0x40] sm:$0xff] }
0x16e5   :  { %8514 = vmatprep.subr.mxu0 %v7795_v13 }
0x16e6   :  { %9010 = vrsqrt.f32 %v2456_v19  ;;  %v2451_v22 = vsub.f32 %v2447_v20, %v2449_v18  ;;  %v2728_v26 = vadd.f32 1e-05, %v2724_v21  ;;  %8515 = vmatpush3.msra.mxu0 %v7795_v13  ;;  %v2753_v20 = vrot.slane %v9842_v53, %v9327_v43 }
0x16e7   :  { %v2705_v23 = vpop.xlane.xlu0 %2704  ;;  %8516 = vmatprep.subr.mxu0 %v7794_v14 }
0x16e8   :  { %v2455_v24 = vadd.f32 1e-05, %v2451_v22  ;;  %v2709_v25 = vmul.f32 0.03125, %v2705_v23  ;;  %8517 = vmatpush3.msra.mxu0 %v7794_v14 }
0x16e9   :  { %8518 = vmatprep.subr.mxu0 %v7793_v58 }
0x16ea   :  { %9012 = vrsqrt.f32 %v2455_v24  ;;  %v2721_v32 = vmul.f32 %v2709_v25, %v2709_v25  ;;  %v2725_v8 = vsub.f32 %v9795_v27, %v2709_v25  ;;  %8519 = vmatpush3.msra.mxu0 %v7793_v58 }
0x16eb   :  { %v2715_v31 = vpop.xlane.xlu0 %2714  ;;  %9014 = vrsqrt.f32 %v2728_v26 }
0x16ec   :  { %v2719_v60 = vmul.f32 0.03125, %v2715_v31 }
0x16ee   :  { %v2723_v35 = vsub.f32 %v2719_v60, %v2721_v32 }
0x16f0   :  { %v2727_v37 = vadd.f32 1e-05, %v2723_v35 }
0x16f2   :  { %9016 = vrsqrt.f32 %v2727_v37  ;;  %v9927_v37 = vld [vmem:[%s10904_s1 + $0x28] sm:$0xff] }
0x16f3   :  { %v9011_v38 = vpop.eup %9010 }
0x16f4   :  { %v2460_v45 = vmul.f32 %v9011_v38, %v2454_v40 }
0x16f6   :  { %v2466_v51 = vmul.f32 %v2464_v47, %v2460_v45  ;;  %v9932_v45 = vld [vmem:[%s10904_s1 + $0x20] sm:$0xff] }
0x16f7   :  { %v9013_v49 = vpop.eup %9012 }
0x16f8   :  { %v2459_v1 = vmul.f32 %v9013_v49, %v2453_v0  ;;  %v9015_v52 = vpop.eup %9014  ;;  %v2472_v48 = vadd.f32 %v2470_v50, %v2466_v51 }
0x16f9   :  { %v2732_v6 = vmul.f32 %v9015_v52, %v2726_v41 }
0x16fa   :  { %v2465_v29 = vmul.f32 %v2464_v47, %v2459_v1 }
0x16fb   :  { %v2738_v56 = vmul.f32 %v2736_v59, %v2732_v6 }
0x16fc   :  { %v2471_v63 = vadd.f32 %v2470_v50, %v2465_v29 }
0x16fd   :  { %v2744_v12 = vadd.f32 %v2742_v9, %v2738_v56 }
0x16fe   :  { %8501 = vmatprep.mubr.msk.f32.mxu1 %vm40_vm0, %v2471_v63 }
0x16ff   :  { %v9017_v54 = vpop.eup %9016  ;;  %8502 = vmatmul.mubr.msk.f32.vlgmr.msra.gmra.mxu1 %vm40_vm0, %v2472_v48 }
0x1700   :  { %8524 = vmatpush3.msra.mxu1 %v9818_v36  ;;  %v2731_v57 = vmul.f32 %v9017_v54, %v2725_v8 }
0x1701   :  { %8525 = vmatprep.subr.mxu1 %v9852_v7 }
0x1702   :  { %8526 = vmatpush3.msra.mxu1 %v9852_v7  ;;  %v2737_v33 = vmul.f32 %v2736_v59, %v2731_v57 }
0x1703   :  { %8527 = vmatprep.subr.mxu1 %v9859_v55 }
0x1704   :  { %8528 = vmatpush3.msra.mxu1 %v9859_v55  ;;  %v2743_v62 = vadd.f32 %v2742_v9, %v2737_v33 }
0x1705   :  { %8529 = vmatprep.subr.mxu1 %v9868_v10 }
0x1706   :  { %8530 = vmatpush3.msra.mxu1 %v9868_v10  ;;  %8531 = vmatprep.mubr.msk.f32.mxu1 %vm40_vm0, %v2743_v62 }
0x1707   :  { %8532 = vmatmul.mubr.msk.f32.vlgmr.msra.gmra.mxu1 %vm40_vm0, %v2744_v12 }
0x17bf   :  { %v8503_v16 = vpop.f32.mrf.mxu1 }
0x17c0   :  { %v2560_v17 = vadd.f32 %v8503_v16, %v2481_v46 }
0x17c1   :  { %v2554_v11 = vpop.f32.mrf.mxu1 }
0x17c2   :  { %v2555_v18 = vadd.f32 %v2554_v11, %v2481_v46  ;;  %v2564_v21 = vmax.f32 %v2560_v17, 0.0 }
0x17c4   :  { %v2563_v19 = vmax.f32 %v2555_v18, 0.0 }
0x17c6   :  { %8520 = vmatprep.mubr.msk.f32.mxu0 %vm1268_vm4, %v2563_v19 }
0x17c7   :  { %8521 = vmatmul.mubr.msk.f32.vlgmr.msra.gmra.mxu0 %vm1268_vm4, %v2564_v21  ;;  %v8533_v22 = vpop.f32.mrf.mxu1 }
0x17c8   :  { %v9894_v23 = vadd.f32 %v8533_v22, %v2753_v20 }
0x17c9   :  { %v2826_v24 = vpop.f32.mrf.mxu1 }
0x17ca   :  { %v9896_v25 = vadd.f32 %v2826_v24, %v2753_v20  ;;  %2839 = vrot.lane.b32.xlu0 %v9894_v23, %s9205_s11 }
0x17cc   :  { %2837 = vrot.lane.b32.xlu1 %v9896_v25, %s9205_s11  ;;  %8538 = vmatprep.mubr.msk.f32.mxu1 %vm179_vm1, %v9896_v25 }
0x17ce   :  { %3037 = vrot.lane.b32.xlu0 %v9896_v25, %s9206_s12 }
0x17d0   :  { %3043 = vrot.lane.b32.xlu1 %v9894_v23, %s9207_s13 }
0x17d4   :  { %3041 = vrot.lane.b32.xlu1 %v9896_v25, %s9207_s13 }
0x17d8   :  { %3039 = vrot.lane.b32.xlu1 %v9894_v23, %s9206_s12 }
0x183c   :  { %v2840_v4 = vpop.permute.xlu0 %2839 }
0x183d   :  { %8534 = vmatprep.subr.msk.mxu1 %vm179_vm1, %v2840_v4 }
0x183e   :  { %8535 = vmatpush3.xpose.msk.msra.mxu1 %vm179_vm1, %v2840_v4  ;;  %v2838_v26 = vpop.permute.xlu1 %2837 }
0x183f   :  { %8536 = vmatprep.subr.msk.mxu1 %vm179_vm1, %v2838_v26 }
0x1840   :  { %v3038_v32 = vpop.permute.xlu0 %3037 }
0x1842   :  { %8537 = vmatpush3.xpose.msk.msra.mxu1 %vm179_vm1, %v2838_v26  ;;  %v3044_v31 = vpop.permute.xlu1 %3043 }
0x1843   :  { %8548 = vmatprep.subr.msk.mxu1 %vm179_vm1, %v3044_v31 }
0x1845   :  { %8539 = vmatmul.mubr.msk.f32.vlgmr.msra.gmra.mxu1 %vm179_vm1, %v9894_v23 }
0x1846   :  { %v3042_v60 = vpop.permute.xlu1 %3041  ;;  %8549 = vmatpush3.xpose.msk.msra.mxu1 %vm179_vm1, %v3044_v31  ;;  %8552 = vmatprep.mubr.msk.f32.mxu1 %vm179_vm1, %v3038_v32 }
0x1847   :  { %8550 = vmatprep.subr.msk.mxu1 %vm179_vm1, %v3042_v60 }
0x184a   :  { %8551 = vmatpush3.xpose.msk.msra.mxu1 %vm179_vm1, %v3042_v60  ;;  %v3040_v35 = vpop.permute.xlu1 %3039 }
0x184d   :  { %8553 = vmatmul.mubr.msk.f32.vlgmr.msra.gmra.mxu1 %vm179_vm1, %v3040_v35 }
0x1905   :  { %v8540_v38 = vpop.f32.mrf.mxu1 }
0x1906   :  { %v2925_v40 = vmul.f32 0.35355338, %v8540_v38 }
0x1907   :  { %v2915_v47 = vpop.f32.mrf.mxu1 }
0x1908   :  { %v2927_v0 = vadd.f32 %v2925_v40, %v9927_v37  ;;  %v2924_v49 = vmul.f32 0.35355338, %v2915_v47 }
0x190a   :  { %v2926_v1 = vadd.f32 %v2924_v49, %v9932_v45  ;;  %v2931_v51 = vsel %vm267_vm2, %v2927_v0, -inf }
0x190b   :  { %2932 = vmax.xlane.f32.xlu1 %v2931_v51 }
0x190c   :  { %v2928_v50 = vsel %vm267_vm2, %v2926_v1, -inf }
0x190d   :  { %v8554_v52 = vpop.f32.mrf.mxu1  ;;  %2929 = vmax.xlane.f32.xlu0 %v2928_v50 }
0x190e   :  { %v3129_v41 = vmul.f32 0.35355338, %v8554_v52 }
0x190f   :  { %v3119_v29 = vpop.f32.mrf.mxu1 }
0x1910   :  { %v3128_v63 = vmul.f32 0.35355338, %v3119_v29  ;;  %v3131_v6 = vadd.f32 %v3129_v41, %v9927_v37 }
0x1912   :  { %v3130_v48 = vadd.f32 %v3128_v63, %v9932_v45  ;;  %v3135_v8 = vsel %vm267_vm2, %v3131_v6, -inf }
0x1914   :  { %v3132_v59 = vsel %vm267_vm2, %v3130_v48, -inf }
0x1915   :  { %3133 = vmax.xlane.f32.xlu0 %v3132_v59 }
0x1919   :  { %3136 = vmax.xlane.f32.xlu0 %v3135_v8 }
0x191c   :  { %2950 = vrot.lane.b32.xlu1 %v9896_v25, %s9208_s18 }
0x1920   :  { %3156 = vrot.lane.b32.xlu1 %v9894_v23, %s9209_s19 }
0x1924   :  { %3154 = vrot.lane.b32.xlu1 %v9896_v25, %s9209_s19 }
0x192f   :  { %2952 = vrot.lane.b32.xlu0 %v9894_v23, %s9208_s18 }
0x1994   :  { %v2933_v54 = vpop.xlane.xlu1 %2932 }
0x1995   :  { %v2935_v57 = vsub.f32 %v2927_v0, %v2933_v54 }
0x1996   :  { %v2930_v56 = vpop.xlane.xlu0 %2929 }
0x1997   :  { %v2938_v9 = vmul.f32 1.442695, %v2935_v57  ;;  %v2934_v33 = vsub.f32 %v2926_v1, %v2930_v56 }
0x1998   :  { %v2951_v46 = vpop.permute.xlu1 %2950 }
0x1999   :  { %9018 = vpow2.f32 %v2938_v9  ;;  %v2936_v62 = vmul.f32 1.442695, %v2934_v33 }
0x199b   :  { %9020 = vpow2.f32 %v2936_v62 }
0x199c   :  { %v3157_v21 = vpop.permute.xlu1 %3156 }
0x199e   :  { %v3134_v12 = vpop.xlane.xlu0 %3133 }
0x199f   :  { %v3138_v61 = vsub.f32 %v3130_v48, %v3134_v12 }
0x19a0   :  { %v3155_v31 = vpop.permute.xlu1 %3154 }
0x19a1   :  { %v3140_v13 = vmul.f32 1.442695, %v3138_v61 }
0x19a2   :  { %v3137_v14 = vpop.xlane.xlu0 %3136 }
0x19a3   :  { %9022 = vpow2.f32 %v3140_v13  ;;  %v3139_v58 = vsub.f32 %v3131_v6, %v3137_v14  ;;  %v9972_v6 = vpop.f32.mrf.mxu0 }
0x19a5   :  { %v3142_v16 = vmul.f32 1.442695, %v3139_v58  ;;  %v9974_v59 = vpop.f32.mrf.mxu0 }
0x19a6   :  { %v9019_v17 = vpop.eup %9018  ;;  %v2953_v11 = vpop.permute.xlu0 %2952 }
0x19a7   :  { %9024 = vpow2.f32 %v3142_v16  ;;  %8541 = vmatprep.subr.mxu0 %v2953_v11  ;;  %v2943_v18 = vsel %vm267_vm2, %v9019_v17, 0.0 }
0x19a8   :  { %v9021_v19 = vpop.eup %9020  ;;  %2944 = vadd.xlane.f32.xlu1 %v2943_v18  ;;  %8542 = vmatpush3.msra.mxu0 %v2953_v11 }
0x19a9   :  { %8543 = vmatprep.subr.mxu0 %v2951_v46  ;;  %v2940_v20 = vsel %vm267_vm2, %v9021_v19, 0.0 }
0x19aa   :  { %2941 = vadd.xlane.f32.xlu0 %v2940_v20  ;;  %8544 = vmatpush3.msra.mxu0 %v2951_v46 }
0x19ab   :  { %8555 = vmatprep.subr.mxu0 %v3157_v21 }
0x19b0   :  { %v9023_v22 = vpop.eup %9022 }
0x19b1   :  { %v3144_v24 = vsel %vm267_vm2, %v9023_v22, 0.0 }
0x19b2   :  { %3145 = vadd.xlane.f32.xlu0 %v3144_v24 }
0x19b4   :  { %v9025_v4 = vpop.eup %9024 }
0x19b5   :  { %v3147_v26 = vsel %vm267_vm2, %v9025_v4, 0.0 }
0x19b6   :  { %3148 = vadd.xlane.f32.xlu1 %v3147_v26 }
0x19c7   :  { %3245 = vrot.lane.b32.xlu1 %v9896_v25, %s9210_s20 }
0x19c8   :  { %3247 = vrot.lane.b32.xlu0 %v9894_v23, %s9210_s20 }
0x19cb   :  { %3243 = vrot.lane.b32.xlu1 %v9894_v23, %s9211_s21 }
0x19cc   :  { %3241 = vrot.lane.b32.xlu0 %v9896_v25, %s9211_s21 }
0x1a31   :  { %v2945_v32 = vpop.xlane.xlu1 %2944 }
0x1a32   :  { %9026 = vrcp.f32 %v2945_v32 }
0x1a33   :  { %v2942_v60 = vpop.xlane.xlu0 %2941 }
0x1a34   :  { %9028 = vrcp.f32 %v2942_v60 }
0x1a3b   :  { %v3146_v35 = vpop.xlane.xlu0 %3145 }
0x1a3c   :  { %9030 = vrcp.f32 %v3146_v35 }
0x1a3f   :  { %v3149_v38 = vpop.xlane.xlu1 %3148  ;;  %v9027_v40 = vpop.eup %9026 }
0x1a40   :  { %9032 = vrcp.f32 %v3149_v38  ;;  %v2949_v49 = vmul.f32 %v9027_v40, %v9019_v17  ;;  %v3248_v1 = vpop.permute.xlu0 %3247 }
0x1a41   :  { %v9029_v47 = vpop.eup %9028 }
0x1a42   :  { %v2948_v0 = vmul.f32 %v9029_v47, %v9021_v19 }
0x1a43   :  { %v3246_v63 = vpop.permute.xlu1 %3245 }
0x1a44   :  { %8545 = vmatprep.mubr.msk.f32.mxu0 %vm267_vm2, %v2948_v0  ;;  %v3242_v41 = vpop.permute.xlu0 %3241 }
0x1a45   :  { %8546 = vmatmul.mubr.msk.f32.vlgmr.msra.gmra.mxu0 %vm267_vm2, %v2949_v49 }
0x1a46   :  { %8556 = vmatpush3.msra.mxu0 %v3157_v21 }
0x1a47   :  { %8557 = vmatprep.subr.mxu0 %v3155_v31  ;;  %v3244_v48 = vpop.permute.xlu1 %3243 }
0x1a48   :  { %8558 = vmatpush3.msra.mxu0 %v3155_v31 }
0x1a49   :  { %v9031_v51 = vpop.eup %9030  ;;  %8562 = vmatprep.subr.msk.mxu0 %vm179_vm1, %v3248_v1 }
0x1a4a   :  { %v3152_v50 = vmul.f32 %v9031_v51, %v9023_v22 }
0x1a4c   :  { %8559 = vmatprep.mubr.msk.f32.mxu0 %vm267_vm2, %v3152_v50 }
0x1a4d   :  { %v9033_v52 = vpop.eup %9032 }
0x1a4e   :  { %v3153_v29 = vmul.f32 %v9033_v52, %v9025_v4 }
0x1a50   :  { %8560 = vmatmul.mubr.msk.f32.vlgmr.msra.gmra.mxu0 %vm267_vm2, %v3153_v29 }
0x1a51   :  { %8563 = vmatpush3.xpose.msk.msra.mxu0 %vm179_vm1, %v3248_v1  ;;  %8566 = vmatprep.mubr.msk.f32.mxu0 %vm179_vm1, %v3242_v41 }
0x1a52   :  { %8564 = vmatprep.subr.msk.mxu0 %vm179_vm1, %v3246_v63 }
0x1a55   :  { %8565 = vmatpush3.xpose.msk.msra.mxu0 %vm179_vm1, %v3246_v63 }
0x1a58   :  { %8567 = vmatmul.mubr.msk.f32.vlgmr.msra.gmra.mxu0 %vm179_vm1, %v3244_v48 }
0x1b05   :  { %v9976_v8 = vpop.f32.mrf.mxu0 }
0x1b07   :  { %v9978_v54 = vpop.f32.mrf.mxu0 }
0x1b10   :  { %v9980_v57 = vpop.f32.mrf.mxu0 }
0x1b12   :  { %v9982_v56 = vpop.f32.mrf.mxu0 }
0x1b18   :  { %v8568_v9 = vpop.f32.mrf.mxu0 }
0x1b19   :  { %v3333_v33 = vmul.f32 0.35355338, %v8568_v9 }
0x1b1a   :  { %v3323_v62 = vpop.f32.mrf.mxu0 }
0x1b1b   :  { %v3335_v12 = vadd.f32 %v3333_v33, %v9927_v37  ;;  %v3332_v61 = vmul.f32 0.35355338, %v3323_v62 }
0x1b1d   :  { %v3334_v13 = vadd.f32 %v3332_v61, %v9932_v45  ;;  %v3339_v14 = vsel %vm267_vm2, %v3335_v12, -inf }
0x1b1e   :  { %3340 = vmax.xlane.f32.xlu1 %v3339_v14 }
0x1b1f   :  { %v3336_v58 = vsel %vm267_vm2, %v3334_v13, -inf }
0x1b20   :  { %3337 = vmax.xlane.f32.xlu0 %v3336_v58 }
0x1b2f   :  { %3358 = vrot.lane.b32.xlu1 %v9896_v25, %s9212_s22 }
0x1b33   :  { %3451 = vrot.lane.b32.xlu1 %v9894_v23, %s9213_s23 }
0x1b37   :  { %3449 = vrot.lane.b32.xlu1 %v9896_v25, %s9213_s23 }
0x1b3b   :  { %3447 = vrot.lane.b32.xlu1 %v9894_v23, %s9214_s24 }
0x1ba7   :  { %v3341_v46 = vpop.xlane.xlu1 %3340 }
0x1ba8   :  { %v3343_v16 = vsub.f32 %v3335_v12, %v3341_v46 }
0x1ba9   :  { %v3338_v17 = vpop.xlane.xlu0 %3337 }
0x1baa   :  { %v3346_v11 = vmul.f32 1.442695, %v3343_v16  ;;  %v3342_v18 = vsub.f32 %v3334_v13, %v3338_v17 }
0x1bab   :  { %v3359_v31 = vpop.permute.xlu1 %3358 }
0x1bac   :  { %9034 = vpow2.f32 %v3346_v11  ;;  %v3344_v19 = vmul.f32 1.442695, %v3342_v18 }
0x1bae   :  { %9036 = vpow2.f32 %v3344_v19 }
0x1baf   :  { %v3452_v60 = vpop.permute.xlu1 %3451 }
0x1bb3   :  { %v3450_v49 = vpop.permute.xlu1 %3449 }
0x1bb7   :  { %v3448_v1 = vpop.permute.xlu1 %3447 }
0x1bb9   :  { %v9035_v20 = vpop.eup %9034 }
0x1bba   :  { %v3351_v21 = vsel %vm267_vm2, %v9035_v20, 0.0 }
0x1bbb   :  { %v9037_v22 = vpop.eup %9036  ;;  %3352 = vadd.xlane.f32.xlu0 %v3351_v21 }
0x1bbc   :  { %v3348_v24 = vsel %vm267_vm2, %v9037_v22, 0.0 }
0x1bbf   :  { %3349 = vadd.xlane.f32.xlu0 %v3348_v24 }
0x1bd5   :  { %3360 = vrot.lane.b32.xlu0 %v9894_v23, %s9212_s22 }
0x1bd9   :  { %3445 = vrot.lane.b32.xlu0 %v9896_v25, %s9214_s24 }
0x1c44   :  { %v3353_v4 = vpop.xlane.xlu0 %3352 }
0x1c45   :  { %9038 = vrcp.f32 %v3353_v4 }
0x1c48   :  { %v3350_v26 = vpop.xlane.xlu0 %3349 }
0x1c49   :  { %9040 = vrcp.f32 %v3350_v26 }
0x1c4c   :  { %v3361_v32 = vpop.permute.xlu0 %3360 }
0x1c4d   :  { %8569 = vmatprep.subr.mxu1 %v3361_v32 }
0x1c4e   :  { %8570 = vmatpush3.msra.mxu1 %v3361_v32 }
0x1c4f   :  { %8571 = vmatprep.subr.mxu1 %v3359_v31 }
0x1c50   :  { %8572 = vmatpush3.msra.mxu1 %v3359_v31  ;;  %v3446_v0 = vpop.permute.xlu0 %3445 }
0x1c51   :  { %8576 = vmatprep.subr.msk.mxu1 %vm179_vm1, %v3452_v60 }
0x1c52   :  { %v9039_v35 = vpop.eup %9038 }
0x1c53   :  { %v3357_v47 = vmul.f32 %v9039_v35, %v9035_v20 }
0x1c56   :  { %v9041_v38 = vpop.eup %9040 }
0x1c57   :  { %v3356_v40 = vmul.f32 %v9041_v38, %v9037_v22 }
0x1c59   :  { %8573 = vmatprep.mubr.msk.f32.mxu1 %vm267_vm2, %v3356_v40 }
0x1c5a   :  { %8574 = vmatmul.mubr.msk.f32.vlgmr.msra.gmra.mxu1 %vm267_vm2, %v3357_v47 }
0x1c5b   :  { %8577 = vmatpush3.xpose.msk.msra.mxu1 %vm179_vm1, %v3452_v60  ;;  %8580 = vmatprep.mubr.msk.f32.mxu1 %vm179_vm1, %v3446_v0 }
0x1c5c   :  { %8578 = vmatprep.subr.msk.mxu1 %vm179_vm1, %v3450_v49 }
0x1c5f   :  { %8579 = vmatpush3.xpose.msk.msra.mxu1 %vm179_vm1, %v3450_v49 }
0x1c62   :  { %8581 = vmatmul.mubr.msk.f32.vlgmr.msra.gmra.mxu1 %vm179_vm1, %v3448_v1 }
0x1d1a   :  { %v8575_v51 = vpop.f32.mrf.mxu1 }
0x1d1c   :  { %v3436_v50 = vpop.f32.mrf.mxu1 }
0x1d22   :  { %v8582_v52 = vpop.f32.mrf.mxu1 }
0x1d23   :  { %v3537_v29 = vmul.f32 0.35355338, %v8582_v52 }
0x1d24   :  { %v3527_v41 = vpop.f32.mrf.mxu1 }
0x1d25   :  { %v3539_v63 = vadd.f32 %v3537_v29, %v9927_v37  ;;  %v3536_v48 = vmul.f32 0.35355338, %v3527_v41 }
0x1d27   :  { %v3538_v9 = vadd.f32 %v3536_v48, %v9932_v45  ;;  %v3543_v33 = vsel %vm267_vm2, %v3539_v63, -inf  ;;  %v29_v48 = vld [vmem:[%s10908_s5 + $0x28] sm:$0xf] }
0x1d28   :  { %3544 = vmax.xlane.f32.xlu1 %v3543_v33 }
0x1d29   :  { %v3540_v62 = vsel %vm267_vm2, %v3538_v9, -inf }
0x1d2a   :  { %3541 = vmax.xlane.f32.xlu0 %v3540_v62 }
0x1d39   :  { %3562 = vrot.lane.b32.xlu1 %v9896_v25, %s9215_s25 }
0x1d3d   :  { %3693 = vrot.lane.b32.xlu1 %v9818_v36, %s9216_s26 }
0x1d41   :  { %3691 = vrot.lane.b32.xlu1 %v9852_v7, %s9216_s26 }
0x1d45   :  { %3689 = vrot.lane.b32.xlu1 %v9859_v55, %s9216_s26  ;;  %v9176_v55 = vld [vmem:[%s10908_s5 + $0x8] sm:$0xff] }
0x1d46   :  { %v2577_v46 = vrot.slane %v9176_v55, %v9560_v44 }
0x1d48   :  { %v2651_v16 = vadd.f32 %v9974_v59, %v2577_v46 }
0x1d49   :  { %3659 = vrot.lane.b32.xlu1 %v3436_v50, %s9217_s27 }
0x1db1   :  { %v3545_v37 = vpop.xlane.xlu1 %3544 }
0x1db2   :  { %v3547_v45 = vsub.f32 %v3539_v63, %v3545_v37 }
0x1db3   :  { %v3542_v12 = vpop.xlane.xlu0 %3541 }
0x1db4   :  { %v3550_v61 = vmul.f32 1.442695, %v3547_v45  ;;  %v3546_v13 = vsub.f32 %v3538_v9, %v3542_v12  ;;  %v10061_v45 = vrot.slane %v29_v48, %v9308_v28 }
0x1db6   :  { %9042 = vpow2.f32 %v3550_v61  ;;  %v3548_v14 = vmul.f32 1.442695, %v3546_v13 }
0x1db8   :  { %9044 = vpow2.f32 %v3548_v14 }
0x1dc3   :  { %v9043_v25 = vpop.eup %9042 }
0x1dc4   :  { %v3555_v58 = vsel %vm267_vm2, %v9043_v25, 0.0 }
0x1dc5   :  { %v9045_v36 = vpop.eup %9044  ;;  %3556 = vadd.xlane.f32.xlu0 %v3555_v58 }
0x1dc6   :  { %v3552_v7 = vsel %vm267_vm2, %v9045_v36, 0.0 }
0x1dc9   :  { %3553 = vadd.xlane.f32.xlu0 %v3552_v7 }
0x1ddf   :  { %3564 = vrot.lane.b32.xlu0 %v9894_v23, %s9215_s25  ;;  %v2656_v23 = vadd.f32 %v9972_v6, %v2577_v46  ;;  %v10083_v46 = vld [vmem:[%s10905_s2 + $0x78] sm:$0xff] }
0x1de0   :  { %8601 = vmatprep.subr.mxu1 %v10083_v46 }
0x1de1   :  { %v10042_v17 = vadd.f32 %v2656_v23, %v9768_v39  ;;  %8602 = vmatpush3.msra.mxu1 %v10083_v46  ;;  %v10103_v23 = vld [vmem:[%s10905_s2 + $0x60] sm:$0xff] }
0x1de3   :  { %3651 = vrot.lane.b32.xlu0 %v9982_v56, %s9218_s28  ;;  %v2659_v56 = vadd.f32 %v2651_v16, %v9776_v2  ;;  %v2670_v18 = vmul.f32 %v10042_v17, %v10042_v17  ;;  %v3563_v2 = vpop.permute.xlu1 %3562  ;;  %v2664_v0 = vsel %vm40_vm0, %v10042_v17, 0.0  ;;  %v10097_v16 = vld [vmem:[%s10905_s2 + $0x68] sm:$0xff] }
0x1de5   :  { %v2669_v11 = vmul.f32 %v2659_v56, %v2659_v56  ;;  %v2674_v19 = vsel %vm40_vm0, %v2670_v18, 0.0 }
0x1de7   :  { %3653 = vrot.lane.b32.xlu0 %v9980_v57, %s9218_s28  ;;  %v2661_v57 = vsel %vm40_vm0, %v2659_v56, 0.0  ;;  %v3694_v20 = vpop.permute.xlu1 %3693 }
0x1deb   :  { %3661 = vrot.lane.b32.xlu0 %v8575_v51, %s9217_s27  ;;  %v3692_v26 = vpop.permute.xlu1 %3691 }
0x1def   :  { %3687 = vrot.lane.b32.xlu0 %v9868_v10, %s9216_s26  ;;  %v2671_v10 = vsel %vm40_vm0, %v2669_v11, 0.0  ;;  %v3690_v35 = vpop.permute.xlu1 %3689 }
0x1df3   :  { %v3660_v33 = vpop.permute.xlu1 %3659 }
0x1e0e   :  { %2662 = vadd.xlane.f32.xlu0 %v2661_v57 }
0x1e12   :  { %2672 = vadd.xlane.f32.xlu0 %v2671_v10 }
0x1e16   :  { %2675 = vadd.xlane.f32.xlu0 %v2674_v19 }
0x1e4e   :  { %v3557_v59 = vpop.xlane.xlu0 %3556 }
0x1e4f   :  { %9046 = vrcp.f32 %v3557_v59 }
0x1e52   :  { %v3554_v6 = vpop.xlane.xlu0 %3553 }
0x1e53   :  { %9048 = vrcp.f32 %v3554_v6 }
0x1e56   :  { %v3565_v39 = vpop.permute.xlu0 %3564 }
0x1e57   :  { %8583 = vmatprep.subr.mxu0 %v3565_v39 }
0x1e58   :  { %8584 = vmatpush3.msra.mxu0 %v3565_v39 }
0x1e59   :  { %8585 = vmatprep.subr.mxu0 %v3563_v2 }
0x1e5a   :  { %8586 = vmatpush3.msra.mxu0 %v3563_v2  ;;  %v3652_v21 = vpop.permute.xlu0 %3651 }
0x1e5b   :  { %8590 = vmatprep.subr.mxu0 %v3694_v20  ;;  %v3673_v62 = vsel %vm179_vm1, %v9978_v54, %v3652_v21  ;;  %v10136_v21 = vrot.slane %v9842_v53, %v9553_v34 }
0x1e5c   :  { %v9047_v22 = vpop.eup %9046  ;;  %v3675_v61 = vsel %vm267_vm2, %v3673_v62, %v3660_v33 }
0x1e5d   :  { %v3561_v32 = vmul.f32 %v9047_v22, %v9043_v25  ;;  %v10067_v25 = vrot.slane %v29_v48, %v9316_v30 }
0x1e5e   :  { %v3654_v24 = vpop.permute.xlu0 %3653 }
0x1e5f   :  { %v3674_v58 = vsel %vm179_vm1, %v9976_v8, %v3654_v24  ;;  %v10089_v8 = vld [vmem:[%s10905_s2 + $0x70] sm:$0xff] }
0x1e60   :  { %v9049_v4 = vpop.eup %9048  ;;  %8603 = vmatprep.subr.mxu1 %v10089_v8 }
0x1e61   :  { %v3560_v31 = vmul.f32 %v9049_v4, %v9045_v36  ;;  %8604 = vmatpush3.msra.mxu1 %v10089_v8 }
0x1e62   :  { %v3662_v60 = vpop.permute.xlu0 %3661  ;;  %8605 = vmatprep.subr.mxu1 %v10097_v16 }
0x1e63   :  { %8587 = vmatprep.mubr.msk.f32.mxu0 %vm267_vm2, %v3560_v31  ;;  %v3676_v54 = vsel %vm267_vm2, %v3674_v58, %v3662_v60  ;;  %8606 = vmatpush3.msra.mxu1 %v10097_v16 }
0x1e64   :  { %8588 = vmatmul.mubr.msk.f32.vlgmr.msra.gmra.mxu0 %vm267_vm2, %v3561_v32  ;;  %8607 = vmatprep.subr.mxu1 %v10103_v23 }
0x1e65   :  { %8591 = vmatpush3.msra.mxu0 %v3694_v20  ;;  %8608 = vmatpush3.msra.mxu1 %v10103_v23 }
0x1e66   :  { %8592 = vmatprep.subr.mxu0 %v3692_v26  ;;  %v3688_v38 = vpop.permute.xlu0 %3687 }
0x1e67   :  { %8593 = vmatpush3.msra.mxu0 %v3692_v26 }
0x1e68   :  { %8594 = vmatprep.subr.mxu0 %v3690_v35 }
0x1e69   :  { %8595 = vmatpush3.msra.mxu0 %v3690_v35 }
0x1e6a   :  { %8596 = vmatprep.subr.mxu0 %v3688_v38 }
0x1e6b   :  { %8597 = vmatpush3.msra.mxu0 %v3688_v38 }
0x1e97   :  { %v2663_v49 = vpop.xlane.xlu0 %2662 }
0x1e98   :  { %v2667_v51 = vmul.f32 0.03125, %v2663_v49 }
0x1e9a   :  { %v2679_v52 = vmul.f32 %v2667_v51, %v2667_v51  ;;  %v2683_v9 = vsub.f32 %v2659_v56, %v2667_v51  ;;  %v3682_v56 = vrot.slane %v9842_v53, %v9482_v3 }
0x1e9b   :  { %v2673_v1 = vpop.xlane.xlu0 %2672 }
0x1e9c   :  { %v2677_v50 = vmul.f32 0.03125, %v2673_v1 }
0x1e9e   :  { %v2681_v29 = vsub.f32 %v2677_v50, %v2679_v52 }
0x1e9f   :  { %v2676_v4 = vpop.xlane.xlu0 %2675 }
0x1ea0   :  { %v2685_v41 = vadd.f32 1e-05, %v2681_v29  ;;  %v2678_v31 = vmul.f32 0.03125, %v2676_v4 }
0x1ea2   :  { %9050 = vrsqrt.f32 %v2685_v41 }
0x1eaf   :  { %v9051_v63 = vpop.eup %9050 }
0x1eb0   :  { %v2689_v37 = vmul.f32 %v9051_v63, %v2683_v9 }
0x1eb2   :  { %v2695_v14 = vmul.f32 %v10061_v45, %v2689_v37 }
0x1eb4   :  { %v10075_v55 = vadd.f32 %v10067_v25, %v2695_v14 }
0x1f24   :  { %v8589_v40 = vpop.f32.mrf.mxu0 }
0x1f26   :  { %v3640_v47 = vpop.f32.mrf.mxu0 }
0x1f27   :  { %3667 = vrot.lane.b32.xlu1 %v3640_v47, %s9219_s29 }
0x1f2b   :  { %3669 = vrot.lane.b32.xlu1 %v8589_v40, %s9219_s29 }
0x1f4f   :  { %2665 = vadd.xlane.f32.xlu1 %v2664_v0 }
0x1f99   :  { %v3668_v12 = vpop.permute.xlu1 %3667 }
0x1f9a   :  { %v3677_v13 = vsel %vm1017_vm3, %v3675_v61, %v3668_v12 }
0x1f9b   :  { %8598 = vmatprep.mubr.msk.f32.mxu0 %vm40_vm0, %v3677_v13 }
0x1f9d   :  { %v3670_v36 = vpop.permute.xlu1 %3669 }
0x1f9e   :  { %v3678_v7 = vsel %vm1017_vm3, %v3676_v54, %v3670_v36 }
0x1f9f   :  { %8599 = vmatmul.mubr.msk.f32.vlgmr.msra.gmra.mxu0 %vm40_vm0, %v3678_v7 }
0x1fa0   :  { %8620 = vmatprep.mubr.msk.f32.mxu0 %vm40_vm0, %v10075_v55 }
0x1fd8   :  { %v2666_v22 = vpop.xlane.xlu1 %2665 }
0x1fd9   :  { %v2668_v24 = vmul.f32 0.03125, %v2666_v22 }
0x1fdb   :  { %v2680_v26 = vmul.f32 %v2668_v24, %v2668_v24  ;;  %v2684_v52 = vsub.f32 %v10042_v17, %v2668_v24 }
0x1fdd   :  { %v2682_v32 = vsub.f32 %v2678_v31, %v2680_v26 }
0x1fdf   :  { %v2686_v60 = vadd.f32 1e-05, %v2682_v32 }
0x1fe1   :  { %9052 = vrsqrt.f32 %v2686_v60  ;;  %v10194_v60 = vld [vmem:[%s10904_s1 + $0x18] sm:$0xff] }
0x1fee   :  { %v9053_v51 = vpop.eup %9052 }
0x1fef   :  { %v2690_v9 = vmul.f32 %v9053_v51, %v2684_v52 }
0x1ff1   :  { %v2696_v13 = vmul.f32 %v10061_v45, %v2690_v9  ;;  %v3815_v45 = vrot.slane %v9842_v53, %v9527_v5 }
0x1ff3   :  { %v10143_v14 = vadd.f32 %v10067_v25, %v2696_v13  ;;  %v3821_v25 = vrot.slane %v9842_v53, %v9530_v15 }
0x205f   :  { %v8600_v57 = vpop.f32.mrf.mxu0 }
0x2060   :  { %v3777_v11 = vadd.f32 %v8600_v57, %v3682_v56 }
0x2061   :  { %v3771_v10 = vpop.f32.mrf.mxu0 }
0x2062   :  { %v10111_v18 = vadd.f32 %v3777_v11, %v9773_v42  ;;  %v3772_v19 = vadd.f32 %v3771_v10, %v3682_v56 }
0x2064   :  { %v10114_v59 = vadd.f32 %v3772_v19, %v9795_v27  ;;  %v3785_v6 = vsel %vm40_vm0, %v10111_v18, 0.0  ;;  %v3791_v2 = vmul.f32 %v10111_v18, %v10111_v18 }
0x2065   :  { %3786 = vadd.xlane.f32.xlu1 %v3785_v6 }
0x2066   :  { %v3782_v39 = vsel %vm40_vm0, %v10114_v59, 0.0  ;;  %v3790_v20 = vmul.f32 %v10114_v59, %v10114_v59  ;;  %v3795_v42 = vsel %vm40_vm0, %v3791_v2, 0.0 }
0x2067   :  { %3783 = vadd.xlane.f32.xlu0 %v3782_v39 }
0x2068   :  { %v3792_v27 = vsel %vm40_vm0, %v3790_v20, 0.0 }
0x2069   :  { %3796 = vadd.xlane.f32.xlu1 %v3795_v42 }
0x206b   :  { %3793 = vadd.xlane.f32.xlu0 %v3792_v27 }
0x207a   :  { %3922 = vrot.lane.b32.xlu1 %v10089_v8, %s9205_s11 }
0x207e   :  { %3920 = vrot.lane.b32.xlu1 %v10097_v16, %s9205_s11 }
0x2081   :  { %3924 = vrot.lane.b32.xlu0 %v10083_v46, %s9205_s11 }
0x2082   :  { %3918 = vrot.lane.b32.xlu1 %v10103_v23, %s9205_s11 }
0x2085   :  { %3931 = vrot.lane.b32.xlu0 %v10136_v21, %s9205_s11 }
0x20ee   :  { %v3787_v35 = vpop.xlane.xlu1 %3786 }
0x20ef   :  { %v3789_v38 = vmul.f32 0.03125, %v3787_v35 }
0x20f0   :  { %v3784_v40 = vpop.xlane.xlu0 %3783 }
0x20f1   :  { %v3788_v47 = vmul.f32 0.03125, %v3784_v40  ;;  %v3801_v49 = vmul.f32 %v3789_v38, %v3789_v38  ;;  %v3805_v58 = vsub.f32 %v10111_v18, %v3789_v38  ;;  %v10199_v40 = vld [vmem:[%s10904_s1 + $0x10] sm:$0xff] }
0x20f2   :  { %v3797_v0 = vpop.xlane.xlu1 %3796 }
0x20f3   :  { %v3799_v1 = vmul.f32 0.03125, %v3797_v0  ;;  %v3800_v29 = vmul.f32 %v3788_v47, %v3788_v47  ;;  %v3804_v36 = vsub.f32 %v10114_v59, %v3788_v47 }
0x20f4   :  { %v3794_v50 = vpop.xlane.xlu0 %3793 }
0x20f5   :  { %v3803_v41 = vsub.f32 %v3799_v1, %v3801_v49  ;;  %v3798_v63 = vmul.f32 0.03125, %v3794_v50 }
0x20f6   :  { %v3923_v48 = vpop.permute.xlu1 %3922 }
0x20f7   :  { %v3807_v33 = vadd.f32 1e-05, %v3803_v41  ;;  %v3802_v62 = vsub.f32 %v3798_v63, %v3800_v29 }
0x20f8   :  { %v3925_v37 = vpop.permute.xlu0 %3924 }
0x20f9   :  { %9054 = vrsqrt.f32 %v3807_v33  ;;  %v3806_v12 = vadd.f32 1e-05, %v3802_v62  ;;  %8612 = vmatprep.subr.mxu0 %v3925_v37 }
0x20fa   :  { %v3921_v61 = vpop.permute.xlu1 %3920  ;;  %8613 = vmatpush3.msra.mxu0 %v3925_v37 }
0x20fb   :  { %9056 = vrsqrt.f32 %v3806_v12  ;;  %8614 = vmatprep.subr.mxu0 %v3923_v48 }
0x20fc   :  { %8615 = vmatpush3.msra.mxu0 %v3923_v48  ;;  %v3932_v2 = vpop.permute.xlu0 %3931 }
0x20fd   :  { %8616 = vmatprep.subr.mxu0 %v3921_v61 }
0x20fe   :  { %v3919_v17 = vpop.permute.xlu1 %3918  ;;  %8617 = vmatpush3.msra.mxu0 %v3921_v61 }
0x20ff   :  { %8618 = vmatprep.subr.mxu0 %v3919_v17 }
0x2100   :  { %8619 = vmatpush3.msra.mxu0 %v3919_v17 }
0x2101   :  { %8621 = vmatmul.mubr.msk.f32.vlgmr.msra.gmra.mxu0 %vm40_vm0, %v10143_v14 }
0x2106   :  { %v9055_v54 = vpop.eup %9054 }
0x2107   :  { %v3811_v7 = vmul.f32 %v9055_v54, %v3805_v58 }
0x2108   :  { %v9057_v56 = vpop.eup %9056 }
0x2109   :  { %v3810_v57 = vmul.f32 %v9057_v56, %v3804_v36  ;;  %v3817_v11 = vmul.f32 %v3815_v45, %v3811_v7 }
0x210b   :  { %v3816_v10 = vmul.f32 %v3815_v45, %v3810_v57  ;;  %v3823_v6 = vadd.f32 %v3821_v25, %v3817_v11 }
0x210d   :  { %v3822_v19 = vadd.f32 %v3821_v25, %v3816_v10 }
0x210f   :  { %8609 = vmatprep.mubr.msk.f32.mxu1 %vm40_vm0, %v3822_v19 }
0x2110   :  { %8610 = vmatmul.mubr.msk.f32.vlgmr.msra.gmra.mxu1 %vm40_vm0, %v3823_v6 }
0x21c1   :  { %v8622_v39 = vpop.f32.mrf.mxu0 }
0x21c2   :  { %v10155_v20 = vadd.f32 %v8622_v39, %v3932_v2 }
0x21c3   :  { %v4006_v42 = vpop.f32.mrf.mxu0 }
0x21c4   :  { %v10157_v27 = vadd.f32 %v4006_v42, %v3932_v2  ;;  %4221 = vrot.lane.b32.xlu1 %v10155_v20, %s9206_s12  ;;  %8623 = vmatprep.subr.msk.mxu1 %vm179_vm1, %v10155_v20 }
0x21c5   :  { %8624 = vmatpush3.xpose.msk.msra.mxu1 %vm179_vm1, %v10155_v20 }
0x21c6   :  { %4219 = vrot.lane.b32.xlu0 %v10157_v27, %s9206_s12  ;;  %8625 = vmatprep.subr.msk.mxu1 %vm179_vm1, %v10157_v27 }
0x21c9   :  { %8626 = vmatpush3.xpose.msk.msra.mxu1 %vm179_vm1, %v10157_v27 }
0x21d0   :  { %v8611_v53 = vpop.f32.mrf.mxu1 }
0x21d1   :  { %v10172_v22 = vadd.f32 %v8611_v53, %v10136_v21 }
0x21d2   :  { %v3905_v24 = vpop.f32.mrf.mxu1 }
0x21d3   :  { %v10175_v4 = vadd.f32 %v3905_v24, %v10136_v21  ;;  %4217 = vrot.lane.b32.xlu0 %v10172_v22, %s9206_s12 }
0x21d5   :  { %8627 = vmatprep.mubr.msk.f32.mxu1 %vm179_vm1, %v10175_v4  ;;  %4215 = vrot.lane.b32.xlu1 %v10175_v4, %s9206_s12 }
0x21d6   :  { %8628 = vmatmul.mubr.msk.f32.vlgmr.msra.gmra.mxu1 %vm179_vm1, %v10172_v22 }
0x2236   :  { %v4222_v26 = vpop.permute.xlu1 %4221 }
0x2237   :  { %8637 = vmatprep.subr.msk.mxu1 %vm179_vm1, %v4222_v26 }
0x2238   :  { %v4220_v31 = vpop.permute.xlu0 %4219  ;;  %8638 = vmatpush3.xpose.msk.msra.mxu1 %vm179_vm1, %v4222_v26 }
0x2239   :  { %8639 = vmatprep.subr.msk.mxu1 %vm179_vm1, %v4220_v31 }
0x223c   :  { %8640 = vmatpush3.xpose.msk.msra.mxu1 %vm179_vm1, %v4220_v31 }
0x2245   :  { %v4218_v32 = vpop.permute.xlu0 %4217 }
0x2247   :  { %v4216_v21 = vpop.permute.xlu1 %4215 }
0x2248   :  { %8641 = vmatprep.mubr.msk.f32.mxu1 %vm179_vm1, %v4216_v21 }
0x2249   :  { %8642 = vmatmul.mubr.msk.f32.vlgmr.msra.gmra.mxu1 %vm179_vm1, %v4218_v32 }
0x2296   :  { %v8629_v35 = vpop.f32.mrf.mxu1 }
0x2297   :  { %v4103_v38 = vmul.f32 0.35355338, %v8629_v35 }
0x2298   :  { %v4093_v47 = vpop.f32.mrf.mxu1 }
0x2299   :  { %v4105_v0 = vadd.f32 %v4103_v38, %v10194_v60  ;;  %v4102_v49 = vmul.f32 0.35355338, %v4093_v47 }
0x229b   :  { %v4104_v1 = vadd.f32 %v4102_v49, %v10199_v40  ;;  %v4109_v51 = vsel %vm267_vm2, %v4105_v0, -inf }
0x229c   :  { %4110 = vmax.xlane.f32.xlu0 %v4109_v51 }
0x229d   :  { %v4106_v50 = vsel %vm267_vm2, %v4104_v1, -inf }
0x229e   :  { %4107 = vmax.xlane.f32.xlu1 %v4106_v50 }
0x22af   :  { %4130 = vrot.lane.b32.xlu1 %v10155_v20, %s9205_s11 }
0x22b3   :  { %4334 = vrot.lane.b32.xlu1 %v10155_v20, %s9207_s13 }
0x22b7   :  { %4332 = vrot.lane.b32.xlu1 %v10157_v27, %s9207_s13 }
0x22bb   :  { %4425 = vrot.lane.b32.xlu1 %v10155_v20, %s9211_s21 }
0x2309   :  { %v8643_v52 = vpop.f32.mrf.mxu1 }
0x230a   :  { %v4307_v41 = vmul.f32 0.35355338, %v8643_v52 }
0x230b   :  { %v4297_v29 = vpop.f32.mrf.mxu1 }
0x230c   :  { %v4306_v63 = vmul.f32 0.35355338, %v4297_v29  ;;  %v4309_v9 = vadd.f32 %v4307_v41, %v10194_v60 }
0x230e   :  { %v4308_v48 = vadd.f32 %v4306_v63, %v10199_v40  ;;  %v4313_v62 = vsel %vm267_vm2, %v4309_v9, -inf }
0x2310   :  { %v4310_v33 = vsel %vm267_vm2, %v4308_v48, -inf }
0x2311   :  { %4311 = vmax.xlane.f32.xlu0 %v4310_v33 }
0x2315   :  { %4314 = vmax.xlane.f32.xlu0 %v4313_v62 }
0x2325   :  { %v4111_v17 = vpop.xlane.xlu0 %4110 }
0x2326   :  { %v4113_v58 = vsub.f32 %v4105_v0, %v4111_v17 }
0x2327   :  { %v4108_v37 = vpop.xlane.xlu1 %4107 }
0x2328   :  { %v4112_v12 = vsub.f32 %v4104_v1, %v4108_v37  ;;  %v4116_v54 = vmul.f32 1.442695, %v4113_v58 }
0x232a   :  { %v4114_v61 = vmul.f32 1.442695, %v4112_v12 }
0x232b   :  { %4128 = vrot.lane.b32.xlu0 %v10157_v27, %s9205_s11  ;;  %v4131_v13 = vpop.permute.xlu1 %4130 }
0x232c   :  { %9058 = vpow2.f32 %v4114_v61  ;;  %8630 = vmatprep.subr.mxu0 %v4131_v13 }
0x232d   :  { %8631 = vmatpush3.msra.mxu0 %v4131_v13  ;;  %9060 = vpow2.f32 %v4116_v54 }
0x232f   :  { %v4335_v39 = vpop.permute.xlu1 %4334 }
0x2333   :  { %v4333_v31 = vpop.permute.xlu1 %4332 }
0x2337   :  { %v4426_v21 = vpop.permute.xlu1 %4425 }
0x2339   :  { %v9059_v45 = vpop.eup %9058 }
0x233a   :  { %v4118_v36 = vsel %vm267_vm2, %v9059_v45, 0.0  ;;  %v9061_v7 = vpop.eup %9060 }
0x233b   :  { %4119 = vadd.xlane.f32.xlu1 %v4118_v36  ;;  %v4121_v56 = vsel %vm267_vm2, %v9061_v7, 0.0 }
0x234a   :  { %4122 = vadd.xlane.f32.xlu0 %v4121_v56 }
0x239a   :  { %v4312_v57 = vpop.xlane.xlu0 %4311 }
0x239b   :  { %v4316_v11 = vsub.f32 %v4308_v48, %v4312_v57 }
0x239d   :  { %v4318_v25 = vmul.f32 1.442695, %v4316_v11 }
0x239e   :  { %v4315_v10 = vpop.xlane.xlu0 %4314 }
0x239f   :  { %9062 = vpow2.f32 %v4318_v25  ;;  %v4317_v19 = vsub.f32 %v4309_v9, %v4315_v10 }
0x23a1   :  { %v4320_v6 = vmul.f32 1.442695, %v4317_v19 }
0x23a2   :  { %v4129_v2 = vpop.permute.xlu0 %4128 }
0x23a3   :  { %9064 = vpow2.f32 %v4320_v6  ;;  %8632 = vmatprep.subr.mxu0 %v4129_v2 }
0x23a4   :  { %8633 = vmatpush3.msra.mxu0 %v4129_v2 }
0x23a5   :  { %8644 = vmatprep.subr.mxu0 %v4335_v39 }
0x23ac   :  { %v9063_v42 = vpop.eup %9062 }
0x23ad   :  { %v4322_v53 = vsel %vm267_vm2, %v9063_v42, 0.0 }
0x23ae   :  { %4323 = vadd.xlane.f32.xlu1 %v4322_v53 }
0x23b0   :  { %v9065_v24 = vpop.eup %9064 }
0x23b1   :  { %v4325_v26 = vsel %vm267_vm2, %v9065_v24, 0.0 }
0x23b2   :  { %4326 = vadd.xlane.f32.xlu0 %v4325_v26 }
0x23bf   :  { %4419 = vrot.lane.b32.xlu1 %v10175_v4, %s9211_s21 }
0x23c4   :  { %v4120_v32 = vpop.xlane.xlu1 %4119 }
0x23c5   :  { %9066 = vrcp.f32 %v4120_v32 }
0x23c8   :  { %4423 = vrot.lane.b32.xlu0 %v10157_v27, %s9211_s21 }
0x23cc   :  { %4421 = vrot.lane.b32.xlu0 %v10172_v22, %s9211_s21 }
0x23d2   :  { %v9067_v35 = vpop.eup %9066 }
0x23d3   :  { %v4123_v38 = vpop.xlane.xlu0 %4122  ;;  %v4126_v47 = vmul.f32 %v9067_v35, %v9059_v45 }
0x23d4   :  { %9068 = vrcp.f32 %v4123_v38 }
0x23d5   :  { %8634 = vmatprep.mubr.msk.f32.mxu0 %vm267_vm2, %v4126_v47 }
0x23e1   :  { %v9069_v0 = vpop.eup %9068 }
0x23e2   :  { %v4127_v49 = vmul.f32 %v9069_v0, %v9061_v7 }
0x23e4   :  { %8635 = vmatmul.mubr.msk.f32.vlgmr.msra.gmra.mxu0 %vm267_vm2, %v4127_v49 }
0x23e5   :  { %8645 = vmatpush3.msra.mxu0 %v4335_v39 }
0x23e6   :  { %8646 = vmatprep.subr.mxu0 %v4333_v31 }
0x23e7   :  { %8647 = vmatpush3.msra.mxu0 %v4333_v31 }
0x23e8   :  { %8651 = vmatprep.subr.msk.mxu0 %vm179_vm1, %v4426_v21 }
0x2437   :  { %v4324_v1 = vpop.xlane.xlu1 %4323 }
0x2438   :  { %9070 = vrcp.f32 %v4324_v1 }
0x243b   :  { %v4327_v51 = vpop.xlane.xlu0 %4326  ;;  %v4420_v63 = vpop.permute.xlu1 %4419 }
0x243c   :  { %9072 = vrcp.f32 %v4327_v51 }
0x243f   :  { %v4424_v48 = vpop.permute.xlu0 %4423 }
0x2443   :  { %v4422_v9 = vpop.permute.xlu0 %4421 }
0x2445   :  { %v9071_v50 = vpop.eup %9070 }
0x2446   :  { %v4330_v52 = vmul.f32 %v9071_v50, %v9063_v42 }
0x2448   :  { %8648 = vmatprep.mubr.msk.f32.mxu0 %vm267_vm2, %v4330_v52 }
0x2449   :  { %v9073_v29 = vpop.eup %9072 }
0x244a   :  { %v4331_v41 = vmul.f32 %v9073_v29, %v9065_v24 }
0x244c   :  { %8649 = vmatmul.mubr.msk.f32.vlgmr.msra.gmra.mxu0 %vm267_vm2, %v4331_v41 }
0x244d   :  { %8652 = vmatpush3.xpose.msk.msra.mxu0 %vm179_vm1, %v4426_v21  ;;  %8655 = vmatprep.mubr.msk.f32.mxu0 %vm179_vm1, %v4420_v63 }
0x244e   :  { %8653 = vmatprep.subr.msk.mxu0 %vm179_vm1, %v4424_v48 }
0x2451   :  { %8654 = vmatpush3.xpose.msk.msra.mxu0 %vm179_vm1, %v4424_v48 }
0x2454   :  { %8656 = vmatmul.mubr.msk.f32.vlgmr.msra.gmra.mxu0 %vm179_vm1, %v4422_v9 }
0x24a4   :  { %v10239_v33 = vpop.f32.mrf.mxu0 }
0x24a6   :  { %v10241_v62 = vpop.f32.mrf.mxu0 }
0x250c   :  { %v10243_v37 = vpop.f32.mrf.mxu0 }
0x250e   :  { %v10245_v12 = vpop.f32.mrf.mxu0 }
0x2514   :  { %v8657_v61 = vpop.f32.mrf.mxu0 }
0x2515   :  { %v4511_v13 = vmul.f32 0.35355338, %v8657_v61 }
0x2516   :  { %v4501_v17 = vpop.f32.mrf.mxu0 }
0x2517   :  { %v4513_v58 = vadd.f32 %v4511_v13, %v10194_v60  ;;  %v4510_v54 = vmul.f32 0.35355338, %v4501_v17 }
0x2519   :  { %v4512_v45 = vadd.f32 %v4510_v54, %v10199_v40  ;;  %v4517_v36 = vsel %vm267_vm2, %v4513_v58, -inf }
0x251a   :  { %4518 = vmax.xlane.f32.xlu0 %v4517_v36 }
0x251b   :  { %v4514_v7 = vsel %vm267_vm2, %v4512_v45, -inf }
0x251c   :  { %4515 = vmax.xlane.f32.xlu1 %v4514_v7 }
0x252d   :  { %4538 = vrot.lane.b32.xlu1 %v10155_v20, %s9210_s20 }
0x2531   :  { %4629 = vrot.lane.b32.xlu1 %v10155_v20, %s9214_s24 }
0x2535   :  { %4627 = vrot.lane.b32.xlu1 %v10157_v27, %s9214_s24 }
0x2539   :  { %4623 = vrot.lane.b32.xlu1 %v10175_v4, %s9214_s24 }
0x25a3   :  { %v4519_v56 = vpop.xlane.xlu0 %4518 }
0x25a4   :  { %v4521_v57 = vsub.f32 %v4513_v58, %v4519_v56 }
0x25a5   :  { %v4516_v11 = vpop.xlane.xlu1 %4515 }
0x25a6   :  { %v4524_v25 = vmul.f32 1.442695, %v4521_v57  ;;  %v4520_v10 = vsub.f32 %v4512_v45, %v4516_v11 }
0x25a8   :  { %9074 = vpow2.f32 %v4524_v25  ;;  %v4522_v19 = vmul.f32 1.442695, %v4520_v10 }
0x25a9   :  { %v4539_v6 = vpop.permute.xlu1 %4538 }
0x25aa   :  { %9076 = vpow2.f32 %v4522_v19  ;;  %8658 = vmatprep.subr.mxu1 %v4539_v6 }
0x25ab   :  { %8659 = vmatpush3.msra.mxu1 %v4539_v6 }
0x25ad   :  { %v4630_v31 = vpop.permute.xlu1 %4629 }
0x25b1   :  { %v4628_v21 = vpop.permute.xlu1 %4627 }
0x25b5   :  { %v9075_v2 = vpop.eup %9074  ;;  %v4624_v0 = vpop.permute.xlu1 %4623 }
0x25b6   :  { %v4529_v39 = vsel %vm267_vm2, %v9075_v2, 0.0 }
0x25b7   :  { %v9077_v42 = vpop.eup %9076  ;;  %4530 = vadd.xlane.f32.xlu0 %v4529_v39 }
0x25b8   :  { %v4526_v53 = vsel %vm267_vm2, %v9077_v42, 0.0 }
0x25bb   :  { %4527 = vadd.xlane.f32.xlu0 %v4526_v53 }
0x25d1   :  { %4536 = vrot.lane.b32.xlu0 %v10157_v27, %s9210_s20 }
0x25d5   :  { %4625 = vrot.lane.b32.xlu0 %v10172_v22, %s9214_s24 }
0x2640   :  { %v4531_v4 = vpop.xlane.xlu0 %4530 }
0x2641   :  { %9078 = vrcp.f32 %v4531_v4 }
0x2644   :  { %v4528_v24 = vpop.xlane.xlu0 %4527 }
0x2645   :  { %9080 = vrcp.f32 %v4528_v24 }
0x2648   :  { %v4537_v26 = vpop.permute.xlu0 %4536 }
0x2649   :  { %8660 = vmatprep.subr.mxu1 %v4537_v26 }
0x264a   :  { %8661 = vmatpush3.msra.mxu1 %v4537_v26 }
0x264b   :  { %8665 = vmatprep.subr.msk.mxu1 %vm179_vm1, %v4630_v31 }
0x264c   :  { %v4626_v22 = vpop.permute.xlu0 %4625 }
0x264e   :  { %v9079_v32 = vpop.eup %9078 }
0x264f   :  { %v4535_v47 = vmul.f32 %v9079_v32, %v9075_v2 }
0x2652   :  { %v9081_v35 = vpop.eup %9080 }
0x2653   :  { %v4534_v38 = vmul.f32 %v9081_v35, %v9077_v42 }
0x2655   :  { %8662 = vmatprep.mubr.msk.f32.mxu1 %vm267_vm2, %v4534_v38 }
0x2656   :  { %8663 = vmatmul.mubr.msk.f32.vlgmr.msra.gmra.mxu1 %vm267_vm2, %v4535_v47 }
0x2657   :  { %8666 = vmatpush3.xpose.msk.msra.mxu1 %vm179_vm1, %v4630_v31  ;;  %8669 = vmatprep.mubr.msk.f32.mxu1 %vm179_vm1, %v4624_v0 }
0x2658   :  { %8667 = vmatprep.subr.msk.mxu1 %vm179_vm1, %v4628_v21 }
0x265b   :  { %8668 = vmatpush3.xpose.msk.msra.mxu1 %vm179_vm1, %v4628_v21 }
0x265e   :  { %8670 = vmatmul.mubr.msk.f32.vlgmr.msra.gmra.mxu1 %vm179_vm1, %v4626_v22 }
0x2716   :  { %v8664_v49 = vpop.f32.mrf.mxu1 }
0x2718   :  { %v4614_v1 = vpop.f32.mrf.mxu1 }
0x271e   :  { %v8671_v51 = vpop.f32.mrf.mxu1 }
0x271f   :  { %v4715_v50 = vmul.f32 0.35355338, %v8671_v51 }
0x2720   :  { %v4705_v52 = vpop.f32.mrf.mxu1 }
0x2721   :  { %v4717_v29 = vadd.f32 %v4715_v50, %v10194_v60  ;;  %v4714_v41 = vmul.f32 0.35355338, %v4705_v52 }
0x2723   :  { %v4716_v63 = vadd.f32 %v4714_v41, %v10199_v40  ;;  %v4721_v48 = vsel %vm267_vm2, %v4717_v29, -inf  ;;  %v7872_v41 = vld [vmem:[%s10906_s3 + $0x58] sm:$0xff] }
0x2724   :  { %4722 = vmax.xlane.f32.xlu0 %v4721_v48  ;;  %8690 = vmatprep.subr.mxu1 %v7872_v41  ;;  %v7870_v48 = vld [vmem:[%s10906_s3 + $0x48] sm:$0xff] }
0x2725   :  { %v4718_v9 = vsel %vm267_vm2, %v4716_v63, -inf  ;;  %8691 = vmatpush3.msra.mxu1 %v7872_v41 }
0x2726   :  { %4719 = vmax.xlane.f32.xlu1 %v4718_v9  ;;  %v7869_v9 = vld [vmem:[%s10906_s3 + $0x40] sm:$0xff] }
0x2737   :  { %4742 = vrot.lane.b32.xlu1 %v10155_v20, %s9213_s23 }
0x273b   :  { %4867 = vrot.lane.b32.xlu1 %v10083_v46, %s9216_s26 }
0x273f   :  { %4865 = vrot.lane.b32.xlu1 %v10089_v8, %s9216_s26 }
0x2743   :  { %4829 = vrot.lane.b32.xlu1 %v10245_v12, %s9218_s28 }
0x2747   :  { %4831 = vrot.lane.b32.xlu1 %v10243_v37, %s9218_s28 }
0x274b   :  { %4839 = vrot.lane.b32.xlu1 %v8664_v49, %s9217_s27 }
0x274f   :  { %4861 = vrot.lane.b32.xlu1 %v10103_v23, %s9216_s26 }
0x27ad   :  { %v4723_v60 = vpop.xlane.xlu0 %4722 }
0x27ae   :  { %v4725_v40 = vsub.f32 %v4717_v29, %v4723_v60  ;;  %v7882_v60 = vld [vmem:[%s10907_s4 + $0xb8] sm:$0xff] }
0x27af   :  { %v4720_v20 = vpop.xlane.xlu1 %4719 }
0x27b0   :  { %v4728_v61 = vmul.f32 1.442695, %v4725_v40  ;;  %v4724_v13 = vsub.f32 %v4716_v63, %v4720_v20  ;;  %v7871_v63 = vld [vmem:[%s10906_s3 + $0x50] sm:$0xff]  ;;  %v7880_v20 = vld [vmem:[%s10907_s4 + $0xa8] sm:$0xff] }
0x27b1   :  { %8692 = vmatprep.subr.mxu1 %v7871_v63  ;;  %v7881_v40 = vld [vmem:[%s10907_s4 + $0xb0] sm:$0xff] }
0x27b2   :  { %9082 = vpow2.f32 %v4728_v61  ;;  %v4726_v46 = vmul.f32 1.442695, %v4724_v13  ;;  %8693 = vmatpush3.msra.mxu1 %v7871_v63  ;;  %v7879_v61 = vld [vmem:[%s10907_s4 + $0xa0] sm:$0xff] }
0x27b3   :  { %v4743_v17 = vpop.permute.xlu1 %4742  ;;  %8694 = vmatprep.subr.mxu1 %v7870_v48 }
0x27b4   :  { %9084 = vpow2.f32 %v4726_v46  ;;  %8672 = vmatprep.subr.mxu0 %v4743_v17  ;;  %8695 = vmatpush3.msra.mxu1 %v7870_v48 }
0x27b5   :  { %8673 = vmatpush3.msra.mxu0 %v4743_v17  ;;  %8696 = vmatprep.subr.mxu1 %v7869_v9 }
0x27b6   :  { %8697 = vmatpush3.msra.mxu1 %v7869_v9 }
0x27b7   :  { %v4868_v36 = vpop.permute.xlu1 %4867 }
0x27bf   :  { %v9083_v8 = vpop.eup %9082 }
0x27c0   :  { %v4733_v12 = vsel %vm267_vm2, %v9083_v8, 0.0 }
0x27c1   :  { %v9085_v37 = vpop.eup %9084  ;;  %4734 = vadd.xlane.f32.xlu0 %v4733_v12 }
0x27c2   :  { %v4730_v58 = vsel %vm267_vm2, %v9085_v37, 0.0 }
0x27c5   :  { %4731 = vadd.xlane.f32.xlu0 %v4730_v58 }
0x27db   :  { %4740 = vrot.lane.b32.xlu0 %v10157_v27, %s9213_s23 }
0x27df   :  { %4863 = vrot.lane.b32.xlu0 %v10097_v16, %s9216_s26  ;;  %v4866_v16 = vpop.permute.xlu1 %4865 }
0x27e3   :  { %4837 = vrot.lane.b32.xlu0 %v4614_v1, %s9217_s27  ;;  %v4830_v25 = vpop.permute.xlu1 %4829 }
0x27e4   :  { %v4851_v53 = vsel %vm179_vm1, %v10241_v62, %v4830_v25  ;;  %v9177_v62 = vld [vmem:[%s10908_s5 + $0x10] sm:$0xff] }
0x27e5   :  { %v4860_v38 = vrot.slane %v9177_v62, %v9560_v44 }
0x27e7   :  { %v4832_v10 = vpop.permute.xlu1 %4831 }
0x27e8   :  { %v4852_v31 = vsel %vm179_vm1, %v10239_v33, %v4832_v10 }
0x27eb   :  { %v4840_v19 = vpop.permute.xlu1 %4839 }
0x27ec   :  { %v4854_v21 = vsel %vm267_vm2, %v4852_v31, %v4840_v19  ;;  %v7877_v31 = vld [vmem:[%s10907_s4 + $0x90] sm:$0xff] }
0x27ef   :  { %v4862_v6 = vpop.permute.xlu1 %4861 }
0x284a   :  { %v4735_v23 = vpop.xlane.xlu0 %4734 }
0x284b   :  { %9086 = vrcp.f32 %v4735_v23 }
0x284e   :  { %v4732_v54 = vpop.xlane.xlu0 %4731 }
0x284f   :  { %9088 = vrcp.f32 %v4732_v54 }
0x2852   :  { %v4741_v45 = vpop.permute.xlu0 %4740 }
0x2853   :  { %8674 = vmatprep.subr.mxu0 %v4741_v45 }
0x2854   :  { %8675 = vmatpush3.msra.mxu0 %v4741_v45 }
0x2855   :  { %8679 = vmatprep.subr.mxu0 %v4868_v36 }
0x2856   :  { %v4864_v27 = vpop.permute.xlu0 %4863 }
0x2858   :  { %v9087_v7 = vpop.eup %9086 }
0x2859   :  { %v4739_v11 = vmul.f32 %v9087_v7, %v9083_v8 }
0x285a   :  { %v4838_v42 = vpop.permute.xlu0 %4837 }
0x285b   :  { %v4853_v4 = vsel %vm267_vm2, %v4851_v53, %v4838_v42 }
0x285c   :  { %v9089_v56 = vpop.eup %9088 }
0x285d   :  { %v4738_v57 = vmul.f32 %v9089_v56, %v9085_v37 }
0x285f   :  { %8676 = vmatprep.mubr.msk.f32.mxu0 %vm267_vm2, %v4738_v57 }
0x2860   :  { %8677 = vmatmul.mubr.msk.f32.vlgmr.msra.gmra.mxu0 %vm267_vm2, %v4739_v11  ;;  %v10358_v11 = vld [vmem:[%s10908_s5 + $0x18] sm:$0xff] }
0x2861   :  { %8680 = vmatpush3.msra.mxu0 %v4868_v36  ;;  %v4995_v19 = vrot.slane %v10358_v11, %v9316_v30 }
0x2862   :  { %8681 = vmatprep.subr.mxu0 %v4866_v16 }
0x2863   :  { %8682 = vmatpush3.msra.mxu0 %v4866_v16 }
0x2864   :  { %8683 = vmatprep.subr.mxu0 %v4864_v27 }
0x2865   :  { %8684 = vmatpush3.msra.mxu0 %v4864_v27  ;;  %v4989_v27 = vrot.slane %v10358_v11, %v9308_v28 }
0x2866   :  { %8685 = vmatprep.subr.mxu0 %v4862_v6 }
0x2867   :  { %8686 = vmatpush3.msra.mxu0 %v4862_v6 }
0x2868   :  { %8701 = vmatprep.subr.mxu0 %v7882_v60 }
0x2920   :  { %v8678_v2 = vpop.f32.mrf.mxu0 }
0x2922   :  { %v4818_v39 = vpop.f32.mrf.mxu0 }
0x2923   :  { %4845 = vrot.lane.b32.xlu0 %v4818_v39, %s9219_s29 }
0x2927   :  { %4847 = vrot.lane.b32.xlu0 %v8678_v2, %s9219_s29 }
0x2995   :  { %v4846_v24 = vpop.permute.xlu0 %4845 }
0x2996   :  { %v4855_v26 = vsel %vm1017_vm3, %v4853_v4, %v4846_v24 }
0x2997   :  { %8687 = vmatprep.mubr.msk.f32.mxu0 %vm40_vm0, %v4855_v26  ;;  %v7878_v26 = vld [vmem:[%s10907_s4 + $0x98] sm:$0xff] }
0x2999   :  { %v4848_v32 = vpop.permute.xlu0 %4847 }
0x299a   :  { %v4856_v35 = vsel %vm1017_vm3, %v4854_v21, %v4848_v32  ;;  %v7876_v21 = vld [vmem:[%s10907_s4 + $0x88] sm:$0xff]  ;;  %v7875_v32 = vld [vmem:[%s10907_s4 + $0x80] sm:$0xff] }
0x299b   :  { %8688 = vmatmul.mubr.msk.f32.vlgmr.msra.gmra.mxu0 %vm40_vm0, %v4856_v35  ;;  %v5006_v35 = vrot.slane %v10358_v11, %v9327_v43 }
0x299c   :  { %8702 = vmatpush3.msra.mxu0 %v7882_v60 }
0x299d   :  { %8703 = vmatprep.subr.mxu0 %v7881_v40 }
0x299e   :  { %8704 = vmatpush3.msra.mxu0 %v7881_v40  ;;  %v10405_v40 = vld [vmem:[%s10905_s2 + $0x98] sm:$0xff] }
0x299f   :  { %8705 = vmatprep.subr.mxu0 %v7880_v20  ;;  %8720 = vmatprep.subr.mxu1 %v10405_v40 }
0x29a0   :  { %8706 = vmatpush3.msra.mxu0 %v7880_v20  ;;  %v10410_v20 = vld [vmem:[%s10905_s2 + $0x90] sm:$0xff] }
0x29a1   :  { %8707 = vmatprep.subr.mxu0 %v7879_v61 }
0x29a2   :  { %8708 = vmatpush3.msra.mxu0 %v7879_v61  ;;  %v10417_v61 = vld [vmem:[%s10905_s2 + $0x88] sm:$0xff] }
0x29a3   :  { %8709 = vmatprep.subr.mxu0 %v7878_v26 }
0x29a4   :  { %8710 = vmatpush3.msra.mxu0 %v7878_v26 }
0x29a5   :  { %8711 = vmatprep.subr.mxu0 %v7877_v31 }
0x29a6   :  { %8712 = vmatpush3.msra.mxu0 %v7877_v31  ;;  %v5236_v31 = vrot.slane %v10358_v11, %v9553_v34 }
0x29a7   :  { %8713 = vmatprep.subr.mxu0 %v7876_v21 }
0x29a8   :  { %8714 = vmatpush3.msra.mxu0 %v7876_v21 }
0x29a9   :  { %8715 = vmatprep.subr.mxu0 %v7875_v32 }
0x29aa   :  { %8716 = vmatpush3.msra.mxu0 %v7875_v32 }
0x2a5b   :  { %v8689_v47 = vpop.f32.mrf.mxu0 }
0x2a5c   :  { %v4951_v0 = vadd.f32 %v8689_v47, %v4860_v38 }
0x2a5d   :  { %v4945_v22 = vpop.f32.mrf.mxu0 }
0x2a5e   :  { %v10316_v49 = vadd.f32 %v4951_v0, %v10111_v18  ;;  %v4946_v33 = vadd.f32 %v4945_v22, %v4860_v38 }
0x2a60   :  { %v10319_v1 = vadd.f32 %v4946_v33, %v10114_v59  ;;  %v4959_v51 = vsel %vm40_vm0, %v10316_v49, 0.0  ;;  %v4965_v18 = vmul.f32 %v10316_v49, %v10316_v49 }
0x2a61   :  { %4960 = vadd.xlane.f32.xlu0 %v4959_v51  ;;  %v5102_v51 = vrot.slane %v10358_v11, %v9482_v3 }
0x2a62   :  { %v4956_v50 = vsel %vm40_vm0, %v10319_v1, 0.0  ;;  %v4964_v52 = vmul.f32 %v10319_v1, %v10319_v1  ;;  %v4969_v59 = vsel %vm40_vm0, %v4965_v18, 0.0 }
0x2a63   :  { %4957 = vadd.xlane.f32.xlu1 %v4956_v50 }
0x2a64   :  { %v4966_v29 = vsel %vm40_vm0, %v4964_v52, 0.0 }
0x2a65   :  { %4967 = vadd.xlane.f32.xlu0 %v4966_v29 }
0x2a69   :  { %4970 = vadd.xlane.f32.xlu0 %v4969_v59 }
0x2aea   :  { %v4961_v13 = vpop.xlane.xlu0 %4960 }
0x2aeb   :  { %v4963_v12 = vmul.f32 0.03125, %v4961_v13  ;;  %v10424_v13 = vld [vmem:[%s10905_s2 + $0x80] sm:$0xff] }
0x2aec   :  { %v4958_v46 = vpop.xlane.xlu1 %4957 }
0x2aed   :  { %v4962_v17 = vmul.f32 0.03125, %v4958_v46  ;;  %v4975_v45 = vmul.f32 %v4963_v12, %v4963_v12  ;;  %v4979_v6 = vsub.f32 %v10316_v49, %v4963_v12 }
0x2aee   :  { %v4968_v8 = vpop.xlane.xlu0 %4967 }
0x2aef   :  { %v4974_v37 = vmul.f32 %v4962_v17, %v4962_v17  ;;  %v4972_v58 = vmul.f32 0.03125, %v4968_v8  ;;  %v4978_v16 = vsub.f32 %v10319_v1, %v4962_v17 }
0x2af1   :  { %v4976_v23 = vsub.f32 %v4972_v58, %v4974_v37 }
0x2af2   :  { %v4971_v54 = vpop.xlane.xlu0 %4970 }
0x2af3   :  { %v4980_v36 = vadd.f32 1e-05, %v4976_v23  ;;  %v4973_v7 = vmul.f32 0.03125, %v4971_v54 }
0x2af5   :  { %9090 = vrsqrt.f32 %v4980_v36  ;;  %v4977_v56 = vsub.f32 %v4973_v7, %v4975_v45 }
0x2af7   :  { %v4981_v57 = vadd.f32 1e-05, %v4977_v56 }
0x2af9   :  { %9092 = vrsqrt.f32 %v4981_v57 }
0x2b02   :  { %v9091_v25 = vpop.eup %9090 }
0x2b03   :  { %v4984_v10 = vmul.f32 %v9091_v25, %v4978_v16 }
0x2b05   :  { %v4990_v2 = vmul.f32 %v4989_v27, %v4984_v10  ;;  %v5219_v10 = vrot.slane %v10358_v11, %v9527_v5 }
0x2b06   :  { %v9093_v39 = vpop.eup %9092 }
0x2b07   :  { %v4985_v42 = vmul.f32 %v9093_v39, %v4979_v6  ;;  %v4996_v53 = vadd.f32 %v4995_v19, %v4990_v2 }
0x2b09   :  { %v4991_v4 = vmul.f32 %v4989_v27, %v4985_v42  ;;  %8698 = vmatprep.mubr.msk.f32.mxu1 %vm40_vm0, %v4996_v53  ;;  %v5225_v53 = vrot.slane %v10358_v11, %v9530_v15 }
0x2b0b   :  { %v4997_v24 = vadd.f32 %v4995_v19, %v4991_v4 }
0x2b0d   :  { %8699 = vmatmul.mubr.msk.f32.vlgmr.msra.gmra.mxu1 %vm40_vm0, %v4997_v24 }
0x2b0e   :  { %8721 = vmatpush3.msra.mxu1 %v10405_v40 }
0x2b0f   :  { %8722 = vmatprep.subr.mxu1 %v10410_v20 }
0x2b10   :  { %8723 = vmatpush3.msra.mxu1 %v10410_v20 }
0x2b11   :  { %8724 = vmatprep.subr.mxu1 %v10417_v61 }
0x2b12   :  { %8725 = vmatpush3.msra.mxu1 %v10417_v61 }
0x2b13   :  { %8726 = vmatprep.subr.mxu1 %v10424_v13 }
0x2b14   :  { %8727 = vmatpush3.msra.mxu1 %v10424_v13 }
0x2bcd   :  { %v8700_v62 = vpop.f32.mrf.mxu1 }
0x2bce   :  { %v5085_v38 = vadd.f32 %v8700_v62, %v5006_v35 }
0x2bcf   :  { %v5079_v47 = vpop.f32.mrf.mxu1 }
0x2bd0   :  { %v5080_v0 = vadd.f32 %v5079_v47, %v5006_v35  ;;  %v5089_v33 = vmax.f32 %v5085_v38, 0.0 }
0x2bd2   :  { %v5088_v22 = vmax.f32 %v5080_v0, 0.0 }
0x2bd4   :  { %8717 = vmatprep.mubr.msk.f32.mxu0 %vm1268_vm4, %v5088_v22 }
0x2bd5   :  { %8718 = vmatmul.mubr.msk.f32.vlgmr.msra.gmra.mxu0 %vm1268_vm4, %v5089_v33 }
0x2c95   :  { %v8719_v50 = vpop.f32.mrf.mxu0 }
0x2c96   :  { %v5181_v52 = vadd.f32 %v8719_v50, %v5102_v51 }
0x2c97   :  { %v5175_v29 = vpop.f32.mrf.mxu0 }
0x2c98   :  { %v10387_v18 = vadd.f32 %v5181_v52, %v10316_v49  ;;  %v5176_v59 = vadd.f32 %v5175_v29, %v5102_v51 }
0x2c9a   :  { %v10390_v41 = vadd.f32 %v5176_v59, %v10319_v1  ;;  %v5189_v63 = vsel %vm40_vm0, %v10387_v18, 0.0  ;;  %v5195_v48 = vmul.f32 %v10387_v18, %v10387_v18  ;;  %v10473_v59 = vld [vmem:[%s10904_s1 + $0x28] sm:$0xff] }
0x2c9b   :  { %5190 = vadd.xlane.f32.xlu0 %v5189_v63 }
0x2c9c   :  { %v5186_v9 = vsel %vm40_vm0, %v10390_v41, 0.0  ;;  %v5194_v60 = vmul.f32 %v10390_v41, %v10390_v41  ;;  %v5199_v49 = vsel %vm40_vm0, %v5195_v48, 0.0 }
0x2c9d   :  { %5187 = vadd.xlane.f32.xlu1 %v5186_v9  ;;  %v10479_v9 = vld [vmem:[%s10904_s1 + $0x20] sm:$0xff] }
0x2c9e   :  { %v5196_v1 = vsel %vm40_vm0, %v5194_v60, 0.0 }
0x2c9f   :  { %5200 = vadd.xlane.f32.xlu0 %v5199_v49 }
0x2ca1   :  { %5197 = vadd.xlane.f32.xlu1 %v5196_v1 }
0x2d24   :  { %v5191_v46 = vpop.xlane.xlu0 %5190 }
0x2d25   :  { %v5193_v17 = vmul.f32 0.03125, %v5191_v46 }
0x2d26   :  { %v5188_v8 = vpop.xlane.xlu1 %5187 }
0x2d27   :  { %v5192_v12 = vmul.f32 0.03125, %v5188_v8  ;;  %v5205_v58 = vmul.f32 %v5193_v17, %v5193_v17  ;;  %v5209_v27 = vsub.f32 %v10387_v18, %v5193_v17 }
0x2d28   :  { %v5201_v37 = vpop.xlane.xlu0 %5200 }
0x2d29   :  { %v5203_v23 = vmul.f32 0.03125, %v5201_v37  ;;  %v5204_v45 = vmul.f32 %v5192_v12, %v5192_v12  ;;  %v5208_v19 = vsub.f32 %v10390_v41, %v5192_v12 }
0x2d2a   :  { %v5198_v54 = vpop.xlane.xlu1 %5197 }
0x2d2b   :  { %v5207_v36 = vsub.f32 %v5203_v23, %v5205_v58  ;;  %v5202_v7 = vmul.f32 0.03125, %v5198_v54 }
0x2d2d   :  { %v5211_v56 = vadd.f32 1e-05, %v5207_v36  ;;  %v5206_v57 = vsub.f32 %v5202_v7, %v5204_v45 }
0x2d2f   :  { %9094 = vrsqrt.f32 %v5211_v56  ;;  %v5210_v16 = vadd.f32 1e-05, %v5206_v57 }
0x2d31   :  { %9096 = vrsqrt.f32 %v5210_v16 }
0x2d3c   :  { %v9095_v25 = vpop.eup %9094 }
0x2d3d   :  { %v5215_v6 = vmul.f32 %v9095_v25, %v5209_v27 }
0x2d3e   :  { %v9097_v2 = vpop.eup %9096 }
0x2d3f   :  { %v5214_v39 = vmul.f32 %v9097_v2, %v5208_v19  ;;  %v5221_v42 = vmul.f32 %v5219_v10, %v5215_v6 }
0x2d41   :  { %v5220_v4 = vmul.f32 %v5219_v10, %v5214_v39  ;;  %v5227_v26 = vadd.f32 %v5225_v53, %v5221_v42 }
0x2d43   :  { %v5226_v24 = vadd.f32 %v5225_v53, %v5220_v4 }
0x2d45   :  { %8728 = vmatprep.mubr.msk.f32.mxu1 %vm40_vm0, %v5226_v24 }
0x2d46   :  { %8729 = vmatmul.mubr.msk.f32.vlgmr.msra.gmra.mxu1 %vm40_vm0, %v5227_v26 }
0x2e06   :  { %v8730_v21 = vpop.f32.mrf.mxu1 }
0x2e07   :  { %v10440_v32 = vadd.f32 %v8730_v21, %v5236_v31 }
0x2e08   :  { %v5309_v35 = vpop.f32.mrf.mxu1 }
0x2e09   :  { %v10442_v62 = vadd.f32 %v5309_v35, %v5236_v31  ;;  %5322 = vrot.lane.b32.xlu1 %v10440_v32, %s9205_s11 }
0x2e0b   :  { %5320 = vrot.lane.b32.xlu0 %v10442_v62, %s9205_s11  ;;  %8735 = vmatprep.mubr.msk.f32.mxu1 %vm179_vm1, %v10442_v62 }
0x2e0d   :  { %5526 = vrot.lane.b32.xlu1 %v10440_v32, %s9207_s13 }
0x2e0f   :  { %5522 = vrot.lane.b32.xlu0 %v10440_v32, %s9206_s12 }
0x2e11   :  { %5524 = vrot.lane.b32.xlu1 %v10442_v62, %s9207_s13 }
0x2e15   :  { %5520 = vrot.lane.b32.xlu1 %v10442_v62, %s9206_s12 }
0x2e7b   :  { %v5323_v38 = vpop.permute.xlu1 %5322 }
0x2e7c   :  { %8731 = vmatprep.subr.msk.mxu1 %vm179_vm1, %v5323_v38 }
0x2e7d   :  { %8732 = vmatpush3.xpose.msk.msra.mxu1 %vm179_vm1, %v5323_v38  ;;  %v5321_v47 = vpop.permute.xlu0 %5320 }
0x2e7e   :  { %8733 = vmatprep.subr.msk.mxu1 %vm179_vm1, %v5321_v47 }
0x2e7f   :  { %v5527_v0 = vpop.permute.xlu1 %5526 }
0x2e81   :  { %8734 = vmatpush3.xpose.msk.msra.mxu1 %vm179_vm1, %v5321_v47  ;;  %v5523_v51 = vpop.permute.xlu0 %5522 }
0x2e82   :  { %8745 = vmatprep.subr.msk.mxu1 %vm179_vm1, %v5527_v0 }
0x2e83   :  { %v5525_v22 = vpop.permute.xlu1 %5524 }
0x2e84   :  { %8736 = vmatmul.mubr.msk.f32.vlgmr.msra.gmra.mxu1 %vm179_vm1, %v10440_v32 }
0x2e85   :  { %8746 = vmatpush3.xpose.msk.msra.mxu1 %vm179_vm1, %v5527_v0 }
0x2e86   :  { %8747 = vmatprep.subr.msk.mxu1 %vm179_vm1, %v5525_v22 }
0x2e87   :  { %v5521_v33 = vpop.permute.xlu1 %5520 }
0x2e88   :  { %8749 = vmatprep.mubr.msk.f32.mxu1 %vm179_vm1, %v5521_v33 }
0x2e89   :  { %8748 = vmatpush3.xpose.msk.msra.mxu1 %vm179_vm1, %v5525_v22 }
0x2e8c   :  { %8750 = vmatmul.mubr.msk.f32.vlgmr.msra.gmra.mxu1 %vm179_vm1, %v5523_v51 }
0x2f44   :  { %v8737_v50 = vpop.f32.mrf.mxu1 }
0x2f45   :  { %v5408_v52 = vmul.f32 0.35355338, %v8737_v50 }
0x2f46   :  { %v5398_v29 = vpop.f32.mrf.mxu1 }
0x2f47   :  { %v5410_v63 = vadd.f32 %v10473_v59, %v5408_v52  ;;  %v5407_v48 = vmul.f32 0.35355338, %v5398_v29 }
0x2f49   :  { %v5409_v60 = vadd.f32 %v10479_v9, %v5407_v48  ;;  %v5414_v49 = vsel %vm267_vm2, %v5410_v63, -inf }
0x2f4a   :  { %5415 = vmax.xlane.f32.xlu0 %v5414_v49 }
0x2f4b   :  { %v5411_v1 = vsel %vm267_vm2, %v5409_v60, -inf }
0x2f4c   :  { %v8751_v46 = vpop.f32.mrf.mxu1  ;;  %5412 = vmax.xlane.f32.xlu1 %v5411_v1 }
0x2f4d   :  { %v5612_v8 = vmul.f32 0.35355338, %v8751_v46 }
0x2f4e   :  { %v5602_v17 = vpop.f32.mrf.mxu1 }
0x2f4f   :  { %v5611_v12 = vmul.f32 0.35355338, %v5602_v17  ;;  %v5614_v58 = vadd.f32 %v10473_v59, %v5612_v8 }
0x2f51   :  { %v5613_v37 = vadd.f32 %v10479_v9, %v5611_v12  ;;  %v5618_v54 = vsel %vm267_vm2, %v5614_v58, -inf }
0x2f53   :  { %v5615_v23 = vsel %vm267_vm2, %v5613_v37, -inf }
0x2f54   :  { %5616 = vmax.xlane.f32.xlu0 %v5615_v23 }
0x2f58   :  { %5619 = vmax.xlane.f32.xlu0 %v5618_v54 }
0x2f5d   :  { %5435 = vrot.lane.b32.xlu1 %v10440_v32, %s9208_s18 }
0x2f61   :  { %5639 = vrot.lane.b32.xlu1 %v10440_v32, %s9209_s19 }
0x2f65   :  { %5637 = vrot.lane.b32.xlu1 %v10442_v62, %s9209_s19 }
0x2f69   :  { %5730 = vrot.lane.b32.xlu1 %v10440_v32, %s9210_s20 }
0x2f6e   :  { %5433 = vrot.lane.b32.xlu0 %v10442_v62, %s9208_s18 }
0x2fd3   :  { %v5416_v45 = vpop.xlane.xlu0 %5415 }
0x2fd4   :  { %v5418_v36 = vsub.f32 %v5410_v63, %v5416_v45 }
0x2fd5   :  { %v5413_v7 = vpop.xlane.xlu1 %5412 }
0x2fd6   :  { %v5421_v56 = vmul.f32 1.442695, %v5418_v36  ;;  %v5417_v57 = vsub.f32 %v5409_v60, %v5413_v7 }
0x2fd8   :  { %9098 = vpow2.f32 %v5421_v56  ;;  %v5419_v16 = vmul.f32 1.442695, %v5417_v57 }
0x2fd9   :  { %v5436_v27 = vpop.permute.xlu1 %5435 }
0x2fda   :  { %9100 = vpow2.f32 %v5419_v16  ;;  %8738 = vmatprep.subr.mxu0 %v5436_v27 }
0x2fdb   :  { %8739 = vmatpush3.msra.mxu0 %v5436_v27 }
0x2fdd   :  { %v5617_v25 = vpop.xlane.xlu0 %5616  ;;  %v5640_v26 = vpop.permute.xlu1 %5639 }
0x2fde   :  { %v5621_v10 = vsub.f32 %v5613_v37, %v5617_v25 }
0x2fe0   :  { %v5623_v19 = vmul.f32 1.442695, %v5621_v10 }
0x2fe1   :  { %v5620_v6 = vpop.xlane.xlu0 %5619  ;;  %v5638_v0 = vpop.permute.xlu1 %5637 }
0x2fe2   :  { %9102 = vpow2.f32 %v5623_v19  ;;  %v5622_v2 = vsub.f32 %v5614_v58, %v5620_v6 }
0x2fe4   :  { %v5625_v39 = vmul.f32 1.442695, %v5622_v2 }
0x2fe5   :  { %v9099_v42 = vpop.eup %9098  ;;  %v5434_v53 = vpop.permute.xlu0 %5433 }
0x2fe6   :  { %9104 = vpow2.f32 %v5625_v39  ;;  %8740 = vmatprep.subr.mxu0 %v5434_v53  ;;  %v5426_v4 = vsel %vm267_vm2, %v9099_v42, 0.0  ;;  %v5731_v22 = vpop.permute.xlu1 %5730 }
0x2fe7   :  { %v9101_v24 = vpop.eup %9100  ;;  %5427 = vadd.xlane.f32.xlu0 %v5426_v4  ;;  %8741 = vmatpush3.msra.mxu0 %v5434_v53 }
0x2fe8   :  { %8752 = vmatprep.subr.mxu0 %v5640_v26  ;;  %v5423_v31 = vsel %vm267_vm2, %v9101_v24, 0.0 }
0x2fe9   :  { %5424 = vadd.xlane.f32.xlu1 %v5423_v31 }
0x2fef   :  { %v9103_v21 = vpop.eup %9102 }
0x2ff0   :  { %v5627_v35 = vsel %vm267_vm2, %v9103_v21, 0.0 }
0x2ff1   :  { %5628 = vadd.xlane.f32.xlu1 %v5627_v35 }
0x2ff3   :  { %v9105_v38 = vpop.eup %9104 }
0x2ff4   :  { %v5630_v47 = vsel %vm267_vm2, %v9105_v38, 0.0 }
0x2ff5   :  { %5631 = vadd.xlane.f32.xlu0 %v5630_v47 }
0x3002   :  { %5724 = vrot.lane.b32.xlu1 %v10442_v62, %s9211_s21 }
0x300b   :  { %5728 = vrot.lane.b32.xlu0 %v10442_v62, %s9210_s20 }
0x300f   :  { %5726 = vrot.lane.b32.xlu0 %v10440_v32, %s9211_s21 }
0x3070   :  { %v5428_v33 = vpop.xlane.xlu0 %5427 }
0x3071   :  { %9106 = vrcp.f32 %v5428_v33 }
0x3072   :  { %v5425_v51 = vpop.xlane.xlu1 %5424 }
0x3073   :  { %9108 = vrcp.f32 %v5425_v51 }
0x307a   :  { %v5629_v50 = vpop.xlane.xlu1 %5628 }
0x307b   :  { %9110 = vrcp.f32 %v5629_v50 }
0x307e   :  { %v5632_v52 = vpop.xlane.xlu0 %5631  ;;  %v9107_v29 = vpop.eup %9106 }
0x307f   :  { %9112 = vrcp.f32 %v5632_v52  ;;  %v5432_v60 = vmul.f32 %v9107_v29, %v9099_v42  ;;  %v5725_v8 = vpop.permute.xlu1 %5724 }
0x3080   :  { %v9109_v63 = vpop.eup %9108 }
0x3081   :  { %v5431_v48 = vmul.f32 %v9109_v63, %v9101_v24 }
0x3082   :  { %v5729_v12 = vpop.permute.xlu0 %5728 }
0x3083   :  { %8742 = vmatprep.mubr.msk.f32.mxu0 %vm267_vm2, %v5431_v48 }
0x3084   :  { %8743 = vmatmul.mubr.msk.f32.vlgmr.msra.gmra.mxu0 %vm267_vm2, %v5432_v60 }
0x3085   :  { %8753 = vmatpush3.msra.mxu0 %v5640_v26 }
0x3086   :  { %8754 = vmatprep.subr.mxu0 %v5638_v0  ;;  %v5727_v37 = vpop.permute.xlu0 %5726 }
0x3087   :  { %8755 = vmatpush3.msra.mxu0 %v5638_v0 }
0x3088   :  { %v9111_v49 = vpop.eup %9110  ;;  %8759 = vmatprep.subr.msk.mxu0 %vm179_vm1, %v5731_v22 }
0x3089   :  { %v5635_v1 = vmul.f32 %v9111_v49, %v9103_v21 }
0x308b   :  { %8756 = vmatprep.mubr.msk.f32.mxu0 %vm267_vm2, %v5635_v1 }
0x308c   :  { %v9113_v46 = vpop.eup %9112 }
0x308d   :  { %v5636_v17 = vmul.f32 %v9113_v46, %v9105_v38 }
0x308f   :  { %8757 = vmatmul.mubr.msk.f32.vlgmr.msra.gmra.mxu0 %vm267_vm2, %v5636_v17 }
0x3090   :  { %8760 = vmatpush3.xpose.msk.msra.mxu0 %vm179_vm1, %v5731_v22  ;;  %8763 = vmatprep.mubr.msk.f32.mxu0 %vm179_vm1, %v5725_v8 }
0x3091   :  { %8761 = vmatprep.subr.msk.mxu0 %vm179_vm1, %v5729_v12 }
0x3094   :  { %8762 = vmatpush3.xpose.msk.msra.mxu0 %vm179_vm1, %v5729_v12 }
0x3097   :  { %8764 = vmatmul.mubr.msk.f32.vlgmr.msra.gmra.mxu0 %vm179_vm1, %v5727_v37 }
0x3144   :  { %v10518_v58 = vpop.f32.mrf.mxu0 }
0x3146   :  { %v10520_v23 = vpop.f32.mrf.mxu0 }
0x314f   :  { %v10522_v54 = vpop.f32.mrf.mxu0 }
0x3151   :  { %v10524_v45 = vpop.f32.mrf.mxu0 }
0x3157   :  { %v8765_v36 = vpop.f32.mrf.mxu0 }
0x3158   :  { %v5816_v7 = vmul.f32 0.35355338, %v8765_v36 }
0x3159   :  { %v5806_v56 = vpop.f32.mrf.mxu0 }
0x315a   :  { %v5818_v57 = vadd.f32 %v10473_v59, %v5816_v7  ;;  %v5815_v16 = vmul.f32 0.35355338, %v5806_v56 }
0x315c   :  { %v5817_v27 = vadd.f32 %v10479_v9, %v5815_v16  ;;  %v5822_v25 = vsel %vm267_vm2, %v5818_v57, -inf }
0x315d   :  { %5823 = vmax.xlane.f32.xlu0 %v5822_v25 }
0x315e   :  { %v5819_v10 = vsel %vm267_vm2, %v5817_v27, -inf }
0x315f   :  { %5820 = vmax.xlane.f32.xlu1 %v5819_v10 }
0x3170   :  { %5843 = vrot.lane.b32.xlu1 %v10440_v32, %s9212_s22 }
0x3174   :  { %5934 = vrot.lane.b32.xlu1 %v10440_v32, %s9213_s23 }
0x3178   :  { %5932 = vrot.lane.b32.xlu1 %v10442_v62, %s9213_s23 }
0x317c   :  { %5928 = vrot.lane.b32.xlu1 %v10442_v62, %s9214_s24 }
0x31e6   :  { %v5824_v19 = vpop.xlane.xlu0 %5823 }
0x31e7   :  { %v5826_v6 = vsub.f32 %v5818_v57, %v5824_v19 }
0x31e8   :  { %v5821_v2 = vpop.xlane.xlu1 %5820 }
0x31e9   :  { %v5829_v39 = vmul.f32 1.442695, %v5826_v6  ;;  %v5825_v42 = vsub.f32 %v5817_v27, %v5821_v2 }
0x31eb   :  { %9114 = vpow2.f32 %v5829_v39  ;;  %v5827_v53 = vmul.f32 1.442695, %v5825_v42 }
0x31ec   :  { %v5844_v4 = vpop.permute.xlu1 %5843 }
0x31ed   :  { %9116 = vpow2.f32 %v5827_v53  ;;  %8766 = vmatprep.subr.mxu1 %v5844_v4 }
0x31ee   :  { %8767 = vmatpush3.msra.mxu1 %v5844_v4 }
0x31f0   :  { %v5935_v0 = vpop.permute.xlu1 %5934 }
0x31f4   :  { %v5933_v22 = vpop.permute.xlu1 %5932 }
0x31f8   :  { %v9115_v24 = vpop.eup %9114  ;;  %v5929_v29 = vpop.permute.xlu1 %5928 }
0x31f9   :  { %v5834_v26 = vsel %vm267_vm2, %v9115_v24, 0.0 }
0x31fa   :  { %v9117_v31 = vpop.eup %9116  ;;  %5835 = vadd.xlane.f32.xlu0 %v5834_v26  ;;  %v10581_v26 = vld [vmem:[%s10905_s2 + $0xb8] sm:$0xff] }
0x31fb   :  { %v5831_v21 = vsel %vm267_vm2, %v9117_v31, 0.0 }
0x31fe   :  { %5832 = vadd.xlane.f32.xlu0 %v5831_v21 }
0x3214   :  { %5841 = vrot.lane.b32.xlu0 %v10442_v62, %s9212_s22 }
0x3218   :  { %5930 = vrot.lane.b32.xlu0 %v10440_v32, %s9214_s24 }
0x3283   :  { %v5836_v35 = vpop.xlane.xlu0 %5835 }
0x3284   :  { %9118 = vrcp.f32 %v5836_v35 }
0x3287   :  { %v5833_v38 = vpop.xlane.xlu0 %5832 }
0x3288   :  { %9120 = vrcp.f32 %v5833_v38 }
0x328b   :  { %v5842_v47 = vpop.permute.xlu0 %5841 }
0x328c   :  { %8768 = vmatprep.subr.mxu1 %v5842_v47 }
0x328d   :  { %8769 = vmatpush3.msra.mxu1 %v5842_v47 }
0x328e   :  { %8773 = vmatprep.subr.msk.mxu1 %vm179_vm1, %v5935_v0 }
0x328f   :  { %v5931_v63 = vpop.permute.xlu0 %5930 }
0x3291   :  { %v9119_v33 = vpop.eup %9118 }
0x3292   :  { %v5840_v52 = vmul.f32 %v9119_v33, %v9115_v24 }
0x3295   :  { %v9121_v51 = vpop.eup %9120 }
0x3296   :  { %v5839_v50 = vmul.f32 %v9121_v51, %v9117_v31 }
0x3298   :  { %8770 = vmatprep.mubr.msk.f32.mxu1 %vm267_vm2, %v5839_v50 }
0x3299   :  { %8771 = vmatmul.mubr.msk.f32.vlgmr.msra.gmra.mxu1 %vm267_vm2, %v5840_v52 }
0x329a   :  { %8774 = vmatpush3.xpose.msk.msra.mxu1 %vm179_vm1, %v5935_v0  ;;  %8777 = vmatprep.mubr.msk.f32.mxu1 %vm179_vm1, %v5929_v29 }
0x329b   :  { %8775 = vmatprep.subr.msk.mxu1 %vm179_vm1, %v5933_v22 }
0x329e   :  { %8776 = vmatpush3.xpose.msk.msra.mxu1 %vm179_vm1, %v5933_v22 }
0x329f   :  { %8798 = vmatprep.subr.mxu1 %v10581_v26 }
0x32a1   :  { %8778 = vmatmul.mubr.msk.f32.vlgmr.msra.gmra.mxu1 %vm179_vm1, %v5931_v63  ;;  %v6165_v63 = vrot.slane %v10358_v11, %v9560_v44 }
0x32a2   :  { %8799 = vmatpush3.msra.mxu1 %v10581_v26 }
0x3359   :  { %v8772_v48 = vpop.f32.mrf.mxu1 }
0x335b   :  { %v5919_v60 = vpop.f32.mrf.mxu1 }
0x3361   :  { %v8779_v49 = vpop.f32.mrf.mxu1 }
0x3362   :  { %v6020_v1 = vmul.f32 0.35355338, %v8779_v49 }
0x3363   :  { %v6010_v46 = vpop.f32.mrf.mxu1 }
0x3364   :  { %v6022_v17 = vadd.f32 %v10473_v59, %v6020_v1  ;;  %v6019_v8 = vmul.f32 0.35355338, %v6010_v46 }
0x3366   :  { %v6021_v12 = vadd.f32 %v10479_v9, %v6019_v8  ;;  %v6026_v37 = vsel %vm267_vm2, %v6022_v17, -inf }
0x3367   :  { %6027 = vmax.xlane.f32.xlu0 %v6026_v37 }
0x3368   :  { %v6023_v36 = vsel %vm267_vm2, %v6021_v12, -inf }
0x3369   :  { %6024 = vmax.xlane.f32.xlu1 %v6023_v36  ;;  %v10649_v36 = vld [vmem:[%s10908_s5 + $0x20] sm:$0xff] }
0x337a   :  { %6047 = vrot.lane.b32.xlu1 %v10440_v32, %s9215_s25 }
0x337e   :  { %6176 = vrot.lane.b32.xlu1 %v10405_v40, %s9216_s26 }
0x3382   :  { %6174 = vrot.lane.b32.xlu1 %v10410_v20, %s9216_s26 }
0x3386   :  { %6134 = vrot.lane.b32.xlu1 %v10524_v45, %s9218_s28 }
0x338a   :  { %6136 = vrot.lane.b32.xlu1 %v10522_v54, %s9218_s28 }
0x338e   :  { %6144 = vrot.lane.b32.xlu1 %v8772_v48, %s9217_s27 }
0x3392   :  { %6170 = vrot.lane.b32.xlu1 %v10424_v13, %s9216_s26 }
0x3396   :  { %6407 = vrot.lane.b32.xlu1 %v10581_v26, %s9205_s11 }
0x33f0   :  { %v6028_v59 = vpop.xlane.xlu0 %6027 }
0x33f1   :  { %v6030_v9 = vsub.f32 %v6022_v17, %v6028_v59  ;;  %v6315_v59 = vrot.slane %v10649_v36, %v9327_v43 }
0x33f2   :  { %v6025_v32 = vpop.xlane.xlu1 %6024 }
0x33f3   :  { %v6033_v7 = vmul.f32 1.442695, %v6030_v9  ;;  %v6029_v56 = vsub.f32 %v6021_v12, %v6025_v32 }
0x33f5   :  { %9122 = vpow2.f32 %v6033_v7  ;;  %v6031_v40 = vmul.f32 1.442695, %v6029_v56 }
0x33f6   :  { %v6048_v57 = vpop.permute.xlu1 %6047 }
0x33f7   :  { %9124 = vpow2.f32 %v6031_v40  ;;  %8780 = vmatprep.subr.mxu0 %v6048_v57 }
0x33f8   :  { %8781 = vmatpush3.msra.mxu0 %v6048_v57 }
0x33fa   :  { %v6177_v10 = vpop.permute.xlu1 %6176 }
0x3402   :  { %v9123_v20 = vpop.eup %9122 }
0x3403   :  { %v6038_v45 = vsel %vm267_vm2, %v9123_v20, 0.0 }
0x3404   :  { %v9125_v54 = vpop.eup %9124  ;;  %6039 = vadd.xlane.f32.xlu0 %v6038_v45 }
0x3405   :  { %v6035_v16 = vsel %vm267_vm2, %v9125_v54, 0.0 }
0x3408   :  { %6036 = vadd.xlane.f32.xlu0 %v6035_v16 }
0x341e   :  { %6045 = vrot.lane.b32.xlu0 %v10442_v62, %s9215_s25 }
0x3422   :  { %6172 = vrot.lane.b32.xlu0 %v10417_v61, %s9216_s26  ;;  %v6175_v61 = vpop.permute.xlu1 %6174 }
0x3426   :  { %6142 = vrot.lane.b32.xlu0 %v5919_v60, %s9217_s27  ;;  %v6135_v42 = vpop.permute.xlu1 %6134 }
0x3427   :  { %v6156_v38 = vsel %vm179_vm1, %v10520_v23, %v6135_v42  ;;  %v10604_v23 = vld [vmem:[%s10905_s2 + $0xb0] sm:$0xff]  ;;  %v6298_v42 = vrot.slane %v10649_v36, %v9308_v28 }
0x3428   :  { %8800 = vmatprep.subr.mxu1 %v10604_v23 }
0x3429   :  { %8801 = vmatpush3.msra.mxu1 %v10604_v23 }
0x342a   :  { %v6137_v53 = vpop.permute.xlu1 %6136 }
0x342b   :  { %v6157_v33 = vsel %vm179_vm1, %v10518_v58, %v6137_v53  ;;  %v10611_v58 = vld [vmem:[%s10905_s2 + $0xa8] sm:$0xff] }
0x342c   :  { %8802 = vmatprep.subr.mxu1 %v10611_v58 }
0x342d   :  { %8803 = vmatpush3.msra.mxu1 %v10611_v58 }
0x342e   :  { %v6145_v4 = vpop.permute.xlu1 %6144 }
0x342f   :  { %v6159_v51 = vsel %vm267_vm2, %v6157_v33, %v6145_v4 }
0x3432   :  { %v6171_v24 = vpop.permute.xlu1 %6170 }
0x3436   :  { %v6408_v29 = vpop.permute.xlu1 %6407 }
0x348d   :  { %v6040_v13 = vpop.xlane.xlu0 %6039 }
0x348e   :  { %9126 = vrcp.f32 %v6040_v13 }
0x3491   :  { %v6037_v27 = vpop.xlane.xlu0 %6036 }
0x3492   :  { %9128 = vrcp.f32 %v6037_v27 }
0x3495   :  { %v6046_v25 = vpop.permute.xlu0 %6045 }
0x3496   :  { %8782 = vmatprep.subr.mxu0 %v6046_v25 }
0x3497   :  { %8783 = vmatpush3.msra.mxu0 %v6046_v25 }
0x3498   :  { %8787 = vmatprep.subr.mxu0 %v6177_v10 }
0x3499   :  { %v6173_v62 = vpop.permute.xlu0 %6172 }
0x349b   :  { %v9127_v19 = vpop.eup %9126 }
0x349c   :  { %v6044_v39 = vmul.f32 %v9127_v19, %v9123_v20 }
0x349d   :  { %v6143_v35 = vpop.permute.xlu0 %6142 }
0x349e   :  { %v6158_v47 = vsel %vm267_vm2, %v6156_v38, %v6143_v35 }
0x349f   :  { %v9129_v6 = vpop.eup %9128 }
0x34a0   :  { %v6043_v2 = vmul.f32 %v9129_v6, %v9125_v54 }
0x34a2   :  { %8784 = vmatprep.mubr.msk.f32.mxu0 %vm267_vm2, %v6043_v2 }
0x34a3   :  { %8785 = vmatmul.mubr.msk.f32.vlgmr.msra.gmra.mxu0 %vm267_vm2, %v6044_v39 }
0x34a4   :  { %8788 = vmatpush3.msra.mxu0 %v6177_v10 }
0x34a5   :  { %8789 = vmatprep.subr.mxu0 %v6175_v61 }
0x34a6   :  { %8790 = vmatpush3.msra.mxu0 %v6175_v61 }
0x34a7   :  { %8791 = vmatprep.subr.mxu0 %v6173_v62 }
0x34a8   :  { %8792 = vmatpush3.msra.mxu0 %v6173_v62 }
0x34a9   :  { %8793 = vmatprep.subr.mxu0 %v6171_v24 }
0x34aa   :  { %8794 = vmatpush3.msra.mxu0 %v6171_v24 }
0x34ab   :  { %8809 = vmatprep.subr.mxu0 %v6408_v29 }
0x3563   :  { %v8786_v31 = vpop.f32.mrf.mxu0 }
0x3565   :  { %v6123_v21 = vpop.f32.mrf.mxu0 }
0x3566   :  { %6150 = vrot.lane.b32.xlu0 %v6123_v21, %s9219_s29  ;;  %v6304_v21 = vrot.slane %v10649_v36, %v9316_v30 }
0x356a   :  { %6152 = vrot.lane.b32.xlu0 %v8786_v31, %s9219_s29 }
0x35d8   :  { %v6151_v0 = vpop.permute.xlu0 %6150 }
0x35d9   :  { %v6160_v22 = vsel %vm1017_vm3, %v6158_v47, %v6151_v0 }
0x35da   :  { %8795 = vmatprep.mubr.msk.f32.mxu0 %vm40_vm0, %v6160_v22 }
0x35dc   :  { %v6153_v50 = vpop.permute.xlu0 %6152 }
0x35dd   :  { %v6161_v52 = vsel %vm1017_vm3, %v6159_v51, %v6153_v50 }
0x35de   :  { %8796 = vmatmul.mubr.msk.f32.vlgmr.msra.gmra.mxu0 %vm40_vm0, %v6161_v52 }
0x35df   :  { %8817 = vmatprep.mubr.msk.f32.mxu0 %vm40_vm0, %v10075_v55  ;;  %v10617_v55 = vld [vmem:[%s10905_s2 + $0xa0] sm:$0xff]  ;;  %8810 = vmatpush3.msra.mxu0 %v6408_v29 }
0x35e0   :  { %8804 = vmatprep.subr.mxu1 %v10617_v55 }
0x35e1   :  { %8805 = vmatpush3.msra.mxu1 %v10617_v55 }
0x369e   :  { %v8797_v48 = vpop.f32.mrf.mxu0 }
0x369f   :  { %v6260_v60 = vadd.f32 %v8797_v48, %v6165_v63 }
0x36a0   :  { %v6254_v49 = vpop.f32.mrf.mxu0 }
0x36a1   :  { %v10625_v1 = vadd.f32 %v6260_v60, %v10387_v18  ;;  %v6255_v46 = vadd.f32 %v6254_v49, %v6165_v63 }
0x36a3   :  { %v10628_v17 = vadd.f32 %v6255_v46, %v10390_v41  ;;  %v6268_v8 = vsel %vm40_vm0, %v10625_v1, 0.0  ;;  %v6274_v12 = vmul.f32 %v10625_v1, %v10625_v1 }
0x36a4   :  { %6269 = vadd.xlane.f32.xlu0 %v6268_v8 }
0x36a5   :  { %v6265_v11 = vsel %vm40_vm0, %v10628_v17, 0.0  ;;  %v6278_v37 = vsel %vm40_vm0, %v6274_v12, 0.0  ;;  %v6273_v18 = vmul.f32 %v10628_v17, %v10628_v17  ;;  %v10701_v12 = vld [vmem:[%s10904_s1 + $0x18] sm:$0xff] }
0x36a6   :  { %6266 = vadd.xlane.f32.xlu1 %v6265_v11 }
0x36a7   :  { %v6275_v41 = vsel %vm40_vm0, %v6273_v18, 0.0  ;;  %v10707_v18 = vld [vmem:[%s10904_s1 + $0x10] sm:$0xff] }
0x36a8   :  { %6279 = vadd.xlane.f32.xlu0 %v6278_v37 }
0x36ac   :  { %6276 = vadd.xlane.f32.xlu0 %v6275_v41 }
0x36b7   :  { %6403 = vrot.lane.b32.xlu1 %v10611_v58, %s9205_s11 }
0x36bb   :  { %6401 = vrot.lane.b32.xlu1 %v10617_v55, %s9205_s11 }
0x36bf   :  { %6414 = vrot.lane.b32.xlu1 %v6315_v59, %s9205_s11 }
0x36c2   :  { %6405 = vrot.lane.b32.xlu0 %v10604_v23, %s9205_s11 }
0x372d   :  { %v6270_v9 = vpop.xlane.xlu0 %6269 }
0x372e   :  { %v6272_v32 = vmul.f32 0.03125, %v6270_v9 }
0x372f   :  { %v6267_v7 = vpop.xlane.xlu1 %6266 }
0x3730   :  { %v6284_v40 = vmul.f32 %v6272_v32, %v6272_v32  ;;  %v6271_v57 = vmul.f32 0.03125, %v6267_v7  ;;  %v6288_v61 = vsub.f32 %v10625_v1, %v6272_v32 }
0x3731   :  { %v6280_v56 = vpop.xlane.xlu0 %6279 }
0x3732   :  { %v6282_v20 = vmul.f32 0.03125, %v6280_v56  ;;  %v6283_v13 = vmul.f32 %v6271_v57, %v6271_v57  ;;  %v6287_v53 = vsub.f32 %v10628_v17, %v6271_v57 }
0x3733   :  { %v6404_v16 = vpop.permute.xlu1 %6403 }
0x3734   :  { %v6286_v45 = vsub.f32 %v6282_v20, %v6284_v40 }
0x3735   :  { %v6277_v54 = vpop.xlane.xlu0 %6276 }
0x3736   :  { %v6290_v27 = vadd.f32 1e-05, %v6286_v45  ;;  %v6281_v25 = vmul.f32 0.03125, %v6277_v54 }
0x3737   :  { %v6402_v2 = vpop.permute.xlu1 %6401 }
0x3738   :  { %9130 = vrsqrt.f32 %v6290_v27  ;;  %v6285_v10 = vsub.f32 %v6281_v25, %v6283_v13 }
0x3739   :  { %v6406_v19 = vpop.permute.xlu0 %6405 }
0x373a   :  { %v6289_v6 = vadd.f32 1e-05, %v6285_v10  ;;  %8811 = vmatprep.subr.mxu0 %v6406_v19 }
0x373b   :  { %8812 = vmatpush3.msra.mxu0 %v6406_v19 }
0x373c   :  { %9132 = vrsqrt.f32 %v6289_v6  ;;  %8813 = vmatprep.subr.mxu0 %v6404_v16 }
0x373d   :  { %8814 = vmatpush3.msra.mxu0 %v6404_v16 }
0x373e   :  { %8815 = vmatprep.subr.mxu0 %v6402_v2 }
0x373f   :  { %8816 = vmatpush3.msra.mxu0 %v6402_v2 }
0x3740   :  { %8818 = vmatmul.mubr.msk.f32.vlgmr.msra.gmra.mxu0 %vm40_vm0, %v10143_v14  ;;  %v6415_v14 = vpop.permute.xlu1 %6414 }
0x3745   :  { %v9131_v39 = vpop.eup %9130 }
0x3746   :  { %v6294_v62 = vmul.f32 %v9131_v39, %v6288_v61 }
0x3748   :  { %v6300_v31 = vmul.f32 %v6298_v42, %v6294_v62 }
0x3749   :  { %v9133_v4 = vpop.eup %9132 }
0x374a   :  { %v6293_v24 = vmul.f32 %v9133_v4, %v6287_v53  ;;  %v6306_v47 = vadd.f32 %v6304_v21, %v6300_v31 }
0x374c   :  { %v6299_v35 = vmul.f32 %v6298_v42, %v6293_v24 }
0x374e   :  { %v6305_v38 = vadd.f32 %v6304_v21, %v6299_v35 }
0x3750   :  { %8806 = vmatprep.mubr.msk.f32.mxu1 %vm40_vm0, %v6305_v38 }
0x3751   :  { %8807 = vmatmul.mubr.msk.f32.vlgmr.msra.gmra.mxu1 %vm40_vm0, %v6306_v47 }
0x3800   :  { %v8819_v0 = vpop.f32.mrf.mxu0 }
0x3801   :  { %v10664_v22 = vadd.f32 %v8819_v0, %v6415_v14 }
0x3802   :  { %v6483_v28 = vpop.f32.mrf.mxu0 }
0x3803   :  { %v10666_v33 = vadd.f32 %v6483_v28, %v6415_v14  ;;  %6698 = vrot.lane.b32.xlu0 %v10664_v22, %s9206_s12  ;;  %8820 = vmatprep.subr.msk.mxu1 %vm179_vm1, %v10664_v22 }
0x3804   :  { %8821 = vmatpush3.xpose.msk.msra.mxu1 %vm179_vm1, %v10664_v22 }
0x3805   :  { %6696 = vrot.lane.b32.xlu1 %v10666_v33, %s9206_s12  ;;  %8822 = vmatprep.subr.msk.mxu1 %vm179_vm1, %v10666_v33 }
0x3808   :  { %8823 = vmatpush3.xpose.msk.msra.mxu1 %vm179_vm1, %v10666_v33 }
0x3811   :  { %v8808_v30 = vpop.f32.mrf.mxu1 }
0x3812   :  { %v10680_v51 = vadd.f32 %v8808_v30, %v6315_v59 }
0x3813   :  { %v6388_v50 = vpop.f32.mrf.mxu1 }
0x3814   :  { %v10682_v52 = vadd.f32 %v6388_v50, %v6315_v59  ;;  %6694 = vrot.lane.b32.xlu1 %v10680_v51, %s9206_s12 }
0x3816   :  { %8824 = vmatprep.mubr.msk.f32.mxu1 %vm179_vm1, %v10682_v52  ;;  %6692 = vrot.lane.b32.xlu0 %v10682_v52, %s9206_s12 }
0x3817   :  { %8825 = vmatmul.mubr.msk.f32.vlgmr.msra.gmra.mxu1 %vm179_vm1, %v10680_v51 }
0x3875   :  { %v6699_v29 = vpop.permute.xlu0 %6698 }
0x3876   :  { %8834 = vmatprep.subr.msk.mxu1 %vm179_vm1, %v6699_v29 }
0x3877   :  { %v6697_v63 = vpop.permute.xlu1 %6696  ;;  %8835 = vmatpush3.xpose.msk.msra.mxu1 %vm179_vm1, %v6699_v29 }
0x3878   :  { %8836 = vmatprep.subr.msk.mxu1 %vm179_vm1, %v6697_v63 }
0x387b   :  { %8837 = vmatpush3.xpose.msk.msra.mxu1 %vm179_vm1, %v6697_v63 }
0x3886   :  { %v6695_v60 = vpop.permute.xlu1 %6694 }
0x3888   :  { %v6693_v48 = vpop.permute.xlu0 %6692 }
0x3889   :  { %8838 = vmatprep.mubr.msk.f32.mxu1 %vm179_vm1, %v6693_v48 }
0x388a   :  { %8839 = vmatmul.mubr.msk.f32.vlgmr.msra.gmra.mxu1 %vm179_vm1, %v6695_v60 }
0x38d7   :  { %v8826_v49 = vpop.f32.mrf.mxu1 }
0x38d8   :  { %v6580_v46 = vmul.f32 0.35355338, %v8826_v49 }
0x38d9   :  { %v6570_v8 = vpop.f32.mrf.mxu1 }
0x38da   :  { %v6582_v11 = vadd.f32 %v10701_v12, %v6580_v46  ;;  %v6579_v37 = vmul.f32 0.35355338, %v6570_v8 }
0x38dc   :  { %v6581_v41 = vadd.f32 %v10707_v18, %v6579_v37  ;;  %v6586_v59 = vsel %vm267_vm2, %v6582_v11, -inf }
0x38dd   :  { %6587 = vmax.xlane.f32.xlu1 %v6586_v59 }
0x38de   :  { %v6583_v9 = vsel %vm267_vm2, %v6581_v41, -inf }
0x38df   :  { %6584 = vmax.xlane.f32.xlu0 %v6583_v9 }
0x38ee   :  { %6605 = vrot.lane.b32.xlu1 %v10666_v33, %s9205_s11 }
0x38f2   :  { %6811 = vrot.lane.b32.xlu1 %v10664_v22, %s9207_s13 }
0x38f6   :  { %6809 = vrot.lane.b32.xlu1 %v10666_v33, %s9207_s13 }
0x394a   :  { %v8840_v32 = vpop.f32.mrf.mxu1 }
0x394b   :  { %v6784_v56 = vmul.f32 0.35355338, %v8840_v32 }
0x394c   :  { %v6774_v7 = vpop.f32.mrf.mxu1 }
0x394d   :  { %v6783_v40 = vmul.f32 0.35355338, %v6774_v7  ;;  %v6786_v20 = vadd.f32 %v10701_v12, %v6784_v56 }
0x394f   :  { %v6785_v57 = vadd.f32 %v10707_v18, %v6783_v40  ;;  %v6790_v54 = vsel %vm267_vm2, %v6786_v20, -inf }
0x3951   :  { %v6787_v45 = vsel %vm267_vm2, %v6785_v57, -inf }
0x3952   :  { %6788 = vmax.xlane.f32.xlu0 %v6787_v45 }
0x3956   :  { %6791 = vmax.xlane.f32.xlu0 %v6790_v54 }
0x3966   :  { %v6588_v16 = vpop.xlane.xlu1 %6587 }
0x3967   :  { %v6590_v13 = vsub.f32 %v6582_v11, %v6588_v16 }
0x3968   :  { %v6585_v25 = vpop.xlane.xlu0 %6584 }
0x3969   :  { %v6593_v27 = vmul.f32 1.442695, %v6590_v13  ;;  %v6589_v10 = vsub.f32 %v6581_v41, %v6585_v25 }
0x396a   :  { %v6606_v31 = vpop.permute.xlu1 %6605 }
0x396b   :  { %9134 = vpow2.f32 %v6593_v27  ;;  %v6591_v19 = vmul.f32 1.442695, %v6589_v10 }
0x396c   :  { %6607 = vrot.lane.b32.xlu0 %v10664_v22, %s9205_s11 }
0x396d   :  { %9136 = vpow2.f32 %v6591_v19 }
0x396e   :  { %v6812_v38 = vpop.permute.xlu1 %6811 }
0x3972   :  { %v6810_v30 = vpop.permute.xlu1 %6809 }
0x3978   :  { %v9135_v6 = vpop.eup %9134 }
0x3979   :  { %v6598_v2 = vsel %vm267_vm2, %v9135_v6, 0.0 }
0x397a   :  { %6599 = vadd.xlane.f32.xlu1 %v6598_v2  ;;  %v9137_v39 = vpop.eup %9136 }
0x397b   :  { %v6595_v61 = vsel %vm267_vm2, %v9137_v39, 0.0 }
0x398b   :  { %6596 = vadd.xlane.f32.xlu0 %v6595_v61 }
0x39db   :  { %v6789_v62 = vpop.xlane.xlu0 %6788 }
0x39dc   :  { %v6793_v42 = vsub.f32 %v6785_v57, %v6789_v62 }
0x39de   :  { %v6795_v53 = vmul.f32 1.442695, %v6793_v42 }
0x39df   :  { %v6792_v4 = vpop.xlane.xlu0 %6791 }
0x39e0   :  { %9138 = vpow2.f32 %v6795_v53  ;;  %v6794_v24 = vsub.f32 %v6786_v20, %v6792_v4 }
0x39e2   :  { %v6797_v21 = vmul.f32 1.442695, %v6794_v24 }
0x39e3   :  { %v6608_v35 = vpop.permute.xlu0 %6607 }
0x39e4   :  { %9140 = vpow2.f32 %v6797_v21  ;;  %8827 = vmatprep.subr.mxu0 %v6608_v35 }
0x39e5   :  { %8828 = vmatpush3.msra.mxu0 %v6608_v35 }
0x39e6   :  { %8829 = vmatprep.subr.mxu0 %v6606_v31 }
0x39e7   :  { %8830 = vmatpush3.msra.mxu0 %v6606_v31 }
0x39e8   :  { %8841 = vmatprep.subr.mxu0 %v6812_v38 }
0x39ed   :  { %v9139_v47 = vpop.eup %9138 }
0x39ee   :  { %v6799_v14 = vsel %vm267_vm2, %v9139_v47, 0.0 }
0x39ef   :  { %6800 = vadd.xlane.f32.xlu0 %v6799_v14 }
0x39f1   :  { %v9141_v0 = vpop.eup %9140 }
0x39f2   :  { %v6802_v28 = vsel %vm267_vm2, %v9141_v0, 0.0 }
0x39f3   :  { %6803 = vadd.xlane.f32.xlu1 %v6802_v28 }
0x3a03   :  { %v6600_v50 = vpop.xlane.xlu1 %6599 }
0x3a04   :  { %6900 = vrot.lane.b32.xlu1 %v10666_v33, %s9211_s21  ;;  %9142 = vrcp.f32 %v6600_v50 }
0x3a05   :  { %6902 = vrot.lane.b32.xlu0 %v10664_v22, %s9211_s21 }
0x3a08   :  { %6898 = vrot.lane.b32.xlu1 %v10680_v51, %s9211_s21 }
0x3a09   :  { %6896 = vrot.lane.b32.xlu0 %v10682_v52, %s9211_s21 }
0x3a11   :  { %v9143_v63 = vpop.eup %9142 }
0x3a12   :  { %v6604_v49 = vmul.f32 %v9143_v63, %v9135_v6 }
0x3a14   :  { %v6597_v29 = vpop.xlane.xlu0 %6596 }
0x3a15   :  { %9144 = vrcp.f32 %v6597_v29 }
0x3a22   :  { %v9145_v48 = vpop.eup %9144 }
0x3a23   :  { %v6603_v60 = vmul.f32 %v9145_v48, %v9137_v39 }
0x3a25   :  { %8831 = vmatprep.mubr.msk.f32.mxu0 %vm267_vm2, %v6603_v60 }
0x3a26   :  { %8832 = vmatmul.mubr.msk.f32.vlgmr.msra.gmra.mxu0 %vm267_vm2, %v6604_v49 }
0x3a27   :  { %8842 = vmatpush3.msra.mxu0 %v6812_v38 }
0x3a28   :  { %8843 = vmatprep.subr.mxu0 %v6810_v30 }
0x3a29   :  { %8844 = vmatpush3.msra.mxu0 %v6810_v30 }
0x3a78   :  { %v6801_v46 = vpop.xlane.xlu0 %6800 }
0x3a79   :  { %9146 = vrcp.f32 %v6801_v46 }
0x3a7c   :  { %v6804_v8 = vpop.xlane.xlu1 %6803  ;;  %v6903_v11 = vpop.permute.xlu0 %6902 }
0x3a7d   :  { %9148 = vrcp.f32 %v6804_v8  ;;  %8848 = vmatprep.subr.msk.mxu0 %vm179_vm1, %v6903_v11 }
0x3a80   :  { %v6897_v32 = vpop.permute.xlu0 %6896  ;;  %v6901_v7 = vpop.permute.xlu1 %6900 }
0x3a84   :  { %v6899_v56 = vpop.permute.xlu1 %6898 }
0x3a86   :  { %v9147_v37 = vpop.eup %9146 }
0x3a87   :  { %v6807_v41 = vmul.f32 %v9147_v37, %v9139_v47 }
0x3a89   :  { %8845 = vmatprep.mubr.msk.f32.mxu0 %vm267_vm2, %v6807_v41 }
0x3a8a   :  { %v9149_v59 = vpop.eup %9148 }
0x3a8b   :  { %v6808_v9 = vmul.f32 %v9149_v59, %v9141_v0 }
0x3a8d   :  { %8846 = vmatmul.mubr.msk.f32.vlgmr.msra.gmra.mxu0 %vm267_vm2, %v6808_v9 }
0x3a8e   :  { %8849 = vmatpush3.xpose.msk.msra.mxu0 %vm179_vm1, %v6903_v11  ;;  %8852 = vmatprep.mubr.msk.f32.mxu0 %vm179_vm1, %v6897_v32 }
0x3a8f   :  { %8850 = vmatprep.subr.msk.mxu0 %vm179_vm1, %v6901_v7 }
0x3a92   :  { %8851 = vmatpush3.xpose.msk.msra.mxu0 %vm179_vm1, %v6901_v7 }
0x3a95   :  { %8853 = vmatmul.mubr.msk.f32.vlgmr.msra.gmra.mxu0 %vm179_vm1, %v6899_v56 }
0x3ae6   :  { %v10746_v40 = vpop.f32.mrf.mxu0 }
0x3ae8   :  { %v10748_v57 = vpop.f32.mrf.mxu0 }
0x3b4d   :  { %v10750_v20 = vpop.f32.mrf.mxu0 }
0x3b4f   :  { %v10752_v45 = vpop.f32.mrf.mxu0 }
0x3b55   :  { %v8854_v54 = vpop.f32.mrf.mxu0 }
0x3b56   :  { %v6988_v16 = vmul.f32 0.35355338, %v8854_v54 }
0x3b57   :  { %v6978_v13 = vpop.f32.mrf.mxu0 }
0x3b58   :  { %v6990_v27 = vadd.f32 %v10701_v12, %v6988_v16  ;;  %v6987_v25 = vmul.f32 0.35355338, %v6978_v13 }
0x3b5a   :  { %v6989_v10 = vadd.f32 %v10707_v18, %v6987_v25  ;;  %v6994_v19 = vsel %vm267_vm2, %v6990_v27, -inf }
0x3b5b   :  { %6995 = vmax.xlane.f32.xlu1 %v6994_v19 }
0x3b5c   :  { %v6991_v6 = vsel %vm267_vm2, %v6989_v10, -inf }
0x3b5d   :  { %6992 = vmax.xlane.f32.xlu0 %v6991_v6 }
0x3b6c   :  { %7013 = vrot.lane.b32.xlu1 %v10666_v33, %s9210_s20 }
0x3b70   :  { %7106 = vrot.lane.b32.xlu1 %v10664_v22, %s9214_s24 }
0x3b74   :  { %7104 = vrot.lane.b32.xlu1 %v10666_v33, %s9214_s24 }
0x3b78   :  { %7102 = vrot.lane.b32.xlu1 %v10680_v51, %s9214_s24 }
0x3be4   :  { %v6996_v2 = vpop.xlane.xlu1 %6995 }
0x3be5   :  { %v6998_v39 = vsub.f32 %v6990_v27, %v6996_v2 }
0x3be6   :  { %v6993_v61 = vpop.xlane.xlu0 %6992 }
0x3be7   :  { %v7001_v62 = vmul.f32 1.442695, %v6998_v39  ;;  %v6997_v42 = vsub.f32 %v6989_v10, %v6993_v61 }
0x3be8   :  { %v7014_v38 = vpop.permute.xlu1 %7013 }
0x3be9   :  { %9150 = vpow2.f32 %v7001_v62  ;;  %v6999_v53 = vmul.f32 1.442695, %v6997_v42 }
0x3beb   :  { %9152 = vpow2.f32 %v6999_v53 }
0x3bec   :  { %v7107_v14 = vpop.permute.xlu1 %7106 }
0x3bf0   :  { %v7105_v29 = vpop.permute.xlu1 %7104 }
0x3bf4   :  { %v7103_v63 = vpop.permute.xlu1 %7102 }
0x3bf6   :  { %v9151_v4 = vpop.eup %9150 }
0x3bf7   :  { %v7006_v24 = vsel %vm267_vm2, %v9151_v4, 0.0 }
0x3bf8   :  { %v9153_v31 = vpop.eup %9152  ;;  %7007 = vadd.xlane.f32.xlu0 %v7006_v24 }
0x3bf9   :  { %v7003_v21 = vsel %vm267_vm2, %v9153_v31, 0.0 }
0x3bfc   :  { %7004 = vadd.xlane.f32.xlu0 %v7003_v21 }
0x3c12   :  { %7015 = vrot.lane.b32.xlu0 %v10664_v22, %s9210_s20 }
0x3c16   :  { %7100 = vrot.lane.b32.xlu0 %v10682_v52, %s9214_s24 }
0x3c81   :  { %v7008_v51 = vpop.xlane.xlu0 %7007 }
0x3c82   :  { %9154 = vrcp.f32 %v7008_v51 }
0x3c85   :  { %v7005_v35 = vpop.xlane.xlu0 %7004 }
0x3c86   :  { %9156 = vrcp.f32 %v7005_v35 }
0x3c89   :  { %v7016_v47 = vpop.permute.xlu0 %7015 }
0x3c8a   :  { %8855 = vmatprep.subr.mxu1 %v7016_v47 }
0x3c8b   :  { %8856 = vmatpush3.msra.mxu1 %v7016_v47 }
0x3c8c   :  { %8857 = vmatprep.subr.mxu1 %v7014_v38 }
0x3c8d   :  { %8858 = vmatpush3.msra.mxu1 %v7014_v38  ;;  %v7101_v52 = vpop.permute.xlu0 %7100 }
0x3c8e   :  { %8862 = vmatprep.subr.msk.mxu1 %vm179_vm1, %v7107_v14 }
0x3c8f   :  { %v9155_v0 = vpop.eup %9154 }
0x3c90   :  { %v7012_v50 = vmul.f32 %v9155_v0, %v9151_v4 }
0x3c93   :  { %v9157_v28 = vpop.eup %9156 }
0x3c94   :  { %v7011_v30 = vmul.f32 %v9157_v28, %v9153_v31 }
0x3c96   :  { %8859 = vmatprep.mubr.msk.f32.mxu1 %vm267_vm2, %v7011_v30 }
0x3c97   :  { %8860 = vmatmul.mubr.msk.f32.vlgmr.msra.gmra.mxu1 %vm267_vm2, %v7012_v50 }
0x3c98   :  { %8863 = vmatpush3.xpose.msk.msra.mxu1 %vm179_vm1, %v7107_v14  ;;  %8866 = vmatprep.mubr.msk.f32.mxu1 %vm179_vm1, %v7101_v52 }
0x3c99   :  { %8864 = vmatprep.subr.msk.mxu1 %vm179_vm1, %v7105_v29 }
0x3c9c   :  { %8865 = vmatpush3.xpose.msk.msra.mxu1 %vm179_vm1, %v7105_v29 }
0x3c9f   :  { %8867 = vmatmul.mubr.msk.f32.vlgmr.msra.gmra.mxu1 %vm179_vm1, %v7103_v63 }
0x3d57   :  { %v8861_v48 = vpop.f32.mrf.mxu1 }
0x3d59   :  { %v7091_v60 = vpop.f32.mrf.mxu1 }
0x3d5f   :  { %v8868_v49 = vpop.f32.mrf.mxu1 }
0x3d60   :  { %v7192_v46 = vmul.f32 0.35355338, %v8868_v49  ;;  %v7954_v49 = vld [vmem:[%s10906_s3 + $0x78] sm:$0xff] }
0x3d61   :  { %v7182_v8 = vpop.f32.mrf.mxu1  ;;  %8887 = vmatprep.subr.mxu1 %v7954_v49 }
0x3d62   :  { %v7194_v11 = vadd.f32 %v10701_v12, %v7192_v46  ;;  %v7191_v37 = vmul.f32 0.35355338, %v7182_v8  ;;  %v7953_v46 = vld [vmem:[%s10906_s3 + $0x70] sm:$0xff]  ;;  %8888 = vmatpush3.msra.mxu1 %v7954_v49  ;;  %v7952_v8 = vld [vmem:[%s10906_s3 + $0x68] sm:$0xff] }
0x3d63   :  { %8889 = vmatprep.subr.mxu1 %v7953_v46 }
0x3d64   :  { %v7193_v41 = vadd.f32 %v10707_v18, %v7191_v37  ;;  %v7198_v59 = vsel %vm267_vm2, %v7194_v11, -inf  ;;  %8890 = vmatpush3.msra.mxu1 %v7953_v46  ;;  %v7964_v37 = vld [vmem:[%s10907_s4 + $0xf8] sm:$0xff] }
0x3d65   :  { %7199 = vmax.xlane.f32.xlu1 %v7198_v59  ;;  %8891 = vmatprep.subr.mxu1 %v7952_v8  ;;  %v7962_v59 = vld [vmem:[%s10907_s4 + $0xe8] sm:$0xff] }
0x3d66   :  { %v7195_v9 = vsel %vm267_vm2, %v7193_v41, -inf  ;;  %8892 = vmatpush3.msra.mxu1 %v7952_v8 }
0x3d67   :  { %7196 = vmax.xlane.f32.xlu0 %v7195_v9  ;;  %v7961_v9 = vld [vmem:[%s10907_s4 + $0xe0] sm:$0xff] }
0x3d76   :  { %7217 = vrot.lane.b32.xlu1 %v10666_v33, %s9213_s23 }
0x3d7a   :  { %7344 = vrot.lane.b32.xlu1 %v10581_v26, %s9216_s26 }
0x3d7e   :  { %7342 = vrot.lane.b32.xlu1 %v10604_v23, %s9216_s26 }
0x3d82   :  { %7340 = vrot.lane.b32.xlu1 %v10611_v58, %s9216_s26 }
0x3d86   :  { %7314 = vrot.lane.b32.xlu1 %v7091_v60, %s9217_s27 }
0x3dee   :  { %v7200_v12 = vpop.xlane.xlu1 %7199 }
0x3def   :  { %v7202_v18 = vsub.f32 %v7194_v11, %v7200_v12  ;;  %v7951_v11 = vld [vmem:[%s10906_s3 + $0x60] sm:$0xff] }
0x3df0   :  { %v7197_v32 = vpop.xlane.xlu0 %7196  ;;  %8893 = vmatprep.subr.mxu1 %v7951_v11 }
0x3df1   :  { %v7205_v7 = vmul.f32 1.442695, %v7202_v18  ;;  %v7201_v56 = vsub.f32 %v7193_v41, %v7197_v32  ;;  %8894 = vmatpush3.msra.mxu1 %v7951_v11  ;;  %v7963_v41 = vld [vmem:[%s10907_s4 + $0xf0] sm:$0xff] }
0x3df2   :  { %v7218_v27 = vpop.permute.xlu1 %7217 }
0x3df3   :  { %9158 = vpow2.f32 %v7205_v7  ;;  %v7203_v54 = vmul.f32 1.442695, %v7201_v56 }
0x3df5   :  { %9160 = vpow2.f32 %v7203_v54 }
0x3e00   :  { %v9159_v33 = vpop.eup %9158 }
0x3e01   :  { %v7210_v16 = vsel %vm267_vm2, %v9159_v33, 0.0 }
0x3e02   :  { %v9161_v26 = vpop.eup %9160  ;;  %7211 = vadd.xlane.f32.xlu0 %v7210_v16 }
0x3e03   :  { %v7207_v23 = vsel %vm267_vm2, %v9161_v26, 0.0 }
0x3e06   :  { %7208 = vadd.xlane.f32.xlu0 %v7207_v23 }
0x3e1c   :  { %7219 = vrot.lane.b32.xlu0 %v10664_v22, %s9213_s23  ;;  %v7345_v22 = vpop.permute.xlu1 %7344 }
0x3e20   :  { %7306 = vrot.lane.b32.xlu0 %v10752_v45, %s9218_s28 }
0x3e24   :  { %7308 = vrot.lane.b32.xlu0 %v10750_v20, %s9218_s28  ;;  %v7343_v20 = vpop.permute.xlu1 %7342 }
0x3e28   :  { %7316 = vrot.lane.b32.xlu0 %v8861_v48, %s9217_s27 }
0x3e2c   :  { %7338 = vrot.lane.b32.xlu0 %v10617_v55, %s9216_s26  ;;  %v7341_v55 = vpop.permute.xlu1 %7340 }
0x3e30   :  { %v7315_v4 = vpop.permute.xlu1 %7314 }
0x3e8b   :  { %v7212_v58 = vpop.xlane.xlu0 %7211 }
0x3e8c   :  { %9162 = vrcp.f32 %v7212_v58 }
0x3e8f   :  { %v7209_v13 = vpop.xlane.xlu0 %7208 }
0x3e90   :  { %9164 = vrcp.f32 %v7209_v13 }
0x3e93   :  { %v7220_v25 = vpop.permute.xlu0 %7219 }
0x3e94   :  { %8869 = vmatprep.subr.mxu0 %v7220_v25 }
0x3e95   :  { %8870 = vmatpush3.msra.mxu0 %v7220_v25 }
0x3e96   :  { %8871 = vmatprep.subr.mxu0 %v7218_v27 }
0x3e97   :  { %8872 = vmatpush3.msra.mxu0 %v7218_v27  ;;  %v7307_v2 = vpop.permute.xlu0 %7306 }
0x3e98   :  { %8876 = vmatprep.subr.mxu0 %v7345_v22  ;;  %v7328_v24 = vsel %vm179_vm1, %v10748_v57, %v7307_v2  ;;  %v7337_v57 = vrot.slane %v10649_v36, %v9482_v3 }
0x3e99   :  { %v9163_v45 = vpop.eup %9162  ;;  %v7330_v21 = vsel %vm267_vm2, %v7328_v24, %v7315_v4  ;;  %v7957_v4 = vld [vmem:[%s10907_s4 + $0xc0] sm:$0xff]  ;;  %v7483_v24 = vrot.slane %v10649_v36, %v9553_v34 }
0x3e9a   :  { %v7216_v6 = vmul.f32 %v9163_v45, %v9159_v33  ;;  %v7466_v45 = vrot.slane %v10649_v36, %v9527_v5  ;;  %v7960_v5 = vld [vmem:[%s10907_s4 + $0xd8] sm:$0xff] }
0x3e9b   :  { %v7309_v39 = vpop.permute.xlu0 %7308 }
0x3e9c   :  { %v7329_v35 = vsel %vm179_vm1, %v10746_v40, %v7309_v39 }
0x3e9d   :  { %v9165_v10 = vpop.eup %9164 }
0x3e9e   :  { %v7215_v19 = vmul.f32 %v9165_v10, %v9161_v26 }
0x3e9f   :  { %v7317_v61 = vpop.permute.xlu0 %7316 }
0x3ea0   :  { %8873 = vmatprep.mubr.msk.f32.mxu0 %vm267_vm2, %v7215_v19  ;;  %v7331_v38 = vsel %vm267_vm2, %v7329_v35, %v7317_v61  ;;  %v7472_v19 = vrot.slane %v10649_v36, %v9530_v15  ;;  %v7959_v15 = vld [vmem:[%s10907_s4 + $0xd0] sm:$0xff] }
0x3ea1   :  { %8874 = vmatmul.mubr.msk.f32.vlgmr.msra.gmra.mxu0 %vm267_vm2, %v7216_v6 }
0x3ea2   :  { %8877 = vmatpush3.msra.mxu0 %v7345_v22 }
0x3ea3   :  { %8878 = vmatprep.subr.mxu0 %v7343_v20  ;;  %v7339_v62 = vpop.permute.xlu0 %7338 }
0x3ea4   :  { %8879 = vmatpush3.msra.mxu0 %v7343_v20 }
0x3ea5   :  { %8880 = vmatprep.subr.mxu0 %v7341_v55 }
0x3ea6   :  { %8881 = vmatpush3.msra.mxu0 %v7341_v55 }
0x3ea7   :  { %8882 = vmatprep.subr.mxu0 %v7339_v62 }
0x3ea8   :  { %8883 = vmatpush3.msra.mxu0 %v7339_v62 }
0x3ea9   :  { %8898 = vmatprep.subr.mxu0 %v7964_v37 }
0x3f61   :  { %v8875_v42 = vpop.f32.mrf.mxu0 }
0x3f63   :  { %v7295_v53 = vpop.f32.mrf.mxu0 }
0x3f64   :  { %7322 = vrot.lane.b32.xlu1 %v7295_v53, %s9219_s29  ;;  %v7958_v53 = vld [vmem:[%s10907_s4 + $0xc8] sm:$0xff] }
0x3f68   :  { %7324 = vrot.lane.b32.xlu1 %v8875_v42, %s9219_s29 }
0x3fd6   :  { %v7323_v31 = vpop.permute.xlu1 %7322 }
0x3fd7   :  { %v7332_v51 = vsel %vm1017_vm3, %v7330_v21, %v7323_v31 }
0x3fd8   :  { %8884 = vmatprep.mubr.msk.f32.mxu0 %vm40_vm0, %v7332_v51 }
0x3fda   :  { %v7325_v47 = vpop.permute.xlu1 %7324 }
0x3fdb   :  { %v7333_v14 = vsel %vm1017_vm3, %v7331_v38, %v7325_v47 }
0x3fdc   :  { %8885 = vmatmul.mubr.msk.f32.vlgmr.msra.gmra.mxu0 %vm40_vm0, %v7333_v14  ;;  %v7579_v14 = vrot.slane %v10649_v36, %v9560_v44 }
0x3fdd   :  { %8899 = vmatpush3.msra.mxu0 %v7964_v37 }
0x3fde   :  { %8900 = vmatprep.subr.mxu0 %v7963_v41 }
0x3fdf   :  { %8901 = vmatpush3.msra.mxu0 %v7963_v41 }
0x3fe0   :  { %8902 = vmatprep.subr.mxu0 %v7962_v59 }
0x3fe1   :  { %8903 = vmatpush3.msra.mxu0 %v7962_v59 }
0x3fe2   :  { %8904 = vmatprep.subr.mxu0 %v7961_v9 }
0x3fe3   :  { %8905 = vmatpush3.msra.mxu0 %v7961_v9 }
0x3fe4   :  { %8906 = vmatprep.subr.mxu0 %v7960_v5 }
0x3fe5   :  { %8907 = vmatpush3.msra.mxu0 %v7960_v5 }
0x3fe6   :  { %8908 = vmatprep.subr.mxu0 %v7959_v15 }
0x3fe7   :  { %8909 = vmatpush3.msra.mxu0 %v7959_v15 }
0x3fe8   :  { %8910 = vmatprep.subr.mxu0 %v7958_v53 }
0x3fe9   :  { %8911 = vmatpush3.msra.mxu0 %v7958_v53 }
0x3fea   :  { %8912 = vmatprep.subr.mxu0 %v7957_v4 }
0x3feb   :  { %8913 = vmatpush3.msra.mxu0 %v7957_v4 }
0x409c   :  { %v8886_v0 = vpop.f32.mrf.mxu0 }
0x409d   :  { %v7428_v28 = vadd.f32 %v8886_v0, %v7337_v57 }
0x409e   :  { %v7422_v30 = vpop.f32.mrf.mxu0 }
0x409f   :  { %v10821_v50 = vadd.f32 %v7428_v28, %v10625_v1  ;;  %v7423_v52 = vadd.f32 %v7422_v30, %v7337_v57 }
0x40a1   :  { %v10824_v29 = vadd.f32 %v7423_v52, %v10628_v17  ;;  %v7436_v40 = vsel %vm40_vm0, %v10821_v50, 0.0  ;;  %v7442_v1 = vmul.f32 %v10821_v50, %v10821_v50 }
0x40a2   :  { %7437 = vadd.xlane.f32.xlu1 %v7436_v40 }
0x40a3   :  { %v7433_v63 = vsel %vm40_vm0, %v10824_v29, 0.0  ;;  %v7441_v48 = vmul.f32 %v10824_v29, %v10824_v29  ;;  %v7446_v17 = vsel %vm40_vm0, %v7442_v1, 0.0 }
0x40a4   :  { %7434 = vadd.xlane.f32.xlu0 %v7433_v63 }
0x40a5   :  { %v7443_v60 = vsel %vm40_vm0, %v7441_v48, 0.0 }
0x40a8   :  { %7444 = vadd.xlane.f32.xlu0 %v7443_v60 }
0x40ac   :  { %7447 = vadd.xlane.f32.xlu0 %v7446_v17 }
0x412b   :  { %v7438_v32 = vpop.xlane.xlu1 %7437 }
0x412c   :  { %v7440_v56 = vmul.f32 0.03125, %v7438_v32 }
0x412d   :  { %v7435_v12 = vpop.xlane.xlu0 %7434 }
0x412e   :  { %v7439_v18 = vmul.f32 0.03125, %v7435_v12  ;;  %v7452_v23 = vmul.f32 %v7440_v56, %v7440_v56  ;;  %v7456_v6 = vsub.f32 %v10821_v50, %v7440_v56 }
0x4130   :  { %v7451_v54 = vmul.f32 %v7439_v18, %v7439_v18  ;;  %v7455_v22 = vsub.f32 %v10824_v29, %v7439_v18 }
0x4131   :  { %v7445_v7 = vpop.xlane.xlu0 %7444 }
0x4132   :  { %v7449_v33 = vmul.f32 0.03125, %v7445_v7  ;;  %v9182_v7 = vld [vmem:[%s10908_s5 + $0x28] sm:$0xf]  ;;  %s9183_s5 = scalar_lea.vmem %s7713_s16, 256 }
0x4133   :  { %v7696_v56 = vrot.slane %v9182_v7, %v9327_v43  ;;  %p9184_p0 = scmp.ne.s32.totalorder %s7713_s16, %s9183_s5  ;;  %p9189_p2 = scmp.lt.s32.totalorder %s9183_s5, %s9183_s5 }
0x4134   :  { %v7453_v16 = vsub.f32 %v7449_v33, %v7451_v54 }
0x4135   :  { %v7448_v26 = vpop.xlane.xlu0 %7447  ;;  %p9190_p3 = por %p9189_p2, %p9188_p1 }
0x4136   :  { %v7457_v58 = vadd.f32 1e-05, %v7453_v16  ;;  %v7450_v13 = vmul.f32 0.03125, %v7448_v26  ;;  %v7702_v26 = vrot.slane %v9182_v7, %v9482_v3 }
0x4137   :  { %p9191_p4 = pnand %p9190_p3, %p9184_p0 }
0x4138   :  { %9166 = vrsqrt.f32 %v7457_v58  ;;  %v7454_v27 = vsub.f32 %v7450_v13, %v7452_v23 }
0x413a   :  { %v7458_v25 = vadd.f32 1e-05, %v7454_v27 }
0x413c   :  { %9168 = vrsqrt.f32 %v7458_v25 }
0x4145   :  { %v9167_v10 = vpop.eup %9166 }
0x4146   :  { %v7461_v20 = vmul.f32 %v9167_v10, %v7455_v22 }
0x4148   :  { %v7467_v55 = vmul.f32 %v7466_v45, %v7461_v20 }
0x4149   :  { %v9169_v2 = vpop.eup %9168 }
0x414a   :  { %v7462_v39 = vmul.f32 %v9169_v2, %v7456_v6  ;;  %v7473_v61 = vadd.f32 %v7472_v19, %v7467_v55 }
0x414c   :  { %v7468_v62 = vmul.f32 %v7466_v45, %v7462_v39  ;;  %8895 = vmatprep.mubr.msk.f32.mxu1 %vm40_vm0, %v7473_v61 }
0x414e   :  { %v7474_v42 = vadd.f32 %v7472_v19, %v7468_v62 }
0x4150   :  { %8896 = vmatmul.mubr.msk.f32.vlgmr.msra.gmra.mxu1 %vm40_vm0, %v7474_v42 }
0x4210   :  { %v8897_v31 = vpop.f32.mrf.mxu1 }
0x4211   :  { %v7562_v21 = vadd.f32 %v8897_v31, %v7483_v24 }
0x4212   :  { %v7556_v51 = vpop.f32.mrf.mxu1 }
0x4213   :  { %v7557_v35 = vadd.f32 %v7556_v51, %v7483_v24  ;;  %v7566_v47 = vmax.f32 %v7562_v21, 0.0 }
0x4215   :  { %v7565_v38 = vmax.f32 %v7557_v35, 0.0 }
0x4217   :  { %8914 = vmatprep.mubr.msk.f32.mxu0 %vm1268_vm4, %v7565_v38 }
0x4218   :  { %8915 = vmatmul.mubr.msk.f32.vlgmr.msra.gmra.mxu0 %vm1268_vm4, %v7566_v47 }
0x42d8   :  { %v8916_v57 = vpop.f32.mrf.mxu0 }
0x42d9   :  { %v7658_v0 = vadd.f32 %v8916_v57, %v7579_v14 }
0x42da   :  { %v7652_v28 = vpop.f32.mrf.mxu0 }
0x42db   :  { %v7662_v30 = vadd.f32 %v7658_v0, %v10821_v50  ;;  %v7653_v52 = vadd.f32 %v7652_v28, %v7579_v14 }
0x42dd   :  { %v7661_v34 = vadd.f32 %v7653_v52, %v10824_v29  ;;  %v7666_v40 = vsel %vm40_vm0, %v7662_v30, 0.0  ;;  %v7672_v63 = vmul.f32 %v7662_v30, %v7662_v30 }
0x42de   :  { %7667 = vadd.xlane.f32.xlu1 %v7666_v40 }
0x42df   :  { %v7663_v48 = vsel %vm40_vm0, %v7661_v34, 0.0  ;;  %v7671_v60 = vmul.f32 %v7661_v34, %v7661_v34  ;;  %v7676_v1 = vsel %vm40_vm0, %v7672_v63, 0.0 }
0x42e0   :  { %7664 = vadd.xlane.f32.xlu0 %v7663_v48 }
0x42e1   :  { %v7673_v44 = vsel %vm40_vm0, %v7671_v60, 0.0 }
0x42e2   :  { %7677 = vadd.xlane.f32.xlu1 %v7676_v1 }
0x42e4   :  { %7674 = vadd.xlane.f32.xlu0 %v7673_v44 }
0x4367   :  { %v7668_v36 = vpop.xlane.xlu1 %7667 }
0x4368   :  { %v7670_v17 = vmul.f32 0.03125, %v7668_v36 }
0x4369   :  { %v7665_v50 = vpop.xlane.xlu0 %7664 }
0x436a   :  { %v7669_v49 = vmul.f32 0.03125, %v7665_v50  ;;  %v7682_v29 = vmul.f32 %v7670_v17, %v7670_v17  ;;  %v7686_v32 = vsub.f32 %v7662_v30, %v7670_v17 }
0x436b   :  { %v7678_v46 = vpop.xlane.xlu1 %7677 }
0x436c   :  { %v7680_v8 = vmul.f32 0.03125, %v7678_v46  ;;  %v7681_v37 = vmul.f32 %v7669_v49, %v7669_v49  ;;  %v7685_v33 = vsub.f32 %v7661_v34, %v7669_v49 }
0x436d   :  { %v7675_v11 = vpop.xlane.xlu0 %7674 }
0x436e   :  { %v7684_v41 = vsub.f32 %v7680_v8, %v7682_v29  ;;  %v7679_v59 = vmul.f32 0.03125, %v7675_v11 }
0x4370   :  { %v7688_v9 = vadd.f32 1e-05, %v7684_v41  ;;  %v7683_v12 = vsub.f32 %v7679_v59, %v7681_v37 }
0x4372   :  { %9170 = vrsqrt.f32 %v7688_v9  ;;  %v7687_v18 = vadd.f32 1e-05, %v7683_v12 }
0x4374   :  { %9172 = vrsqrt.f32 %v7687_v18 }
0x437f   :  { %v9171_v54 = vpop.eup %9170 }
0x4380   :  { %v7692_v16 = vmul.f32 %v9171_v54, %v7686_v32 }
0x4381   :  { %v9173_v23 = vpop.eup %9172 }
0x4382   :  { %v7691_v58 = vmul.f32 %v9173_v23, %v7685_v33  ;;  %v7698_v13 = vmul.f32 %v7696_v56, %v7692_v16 }
0x4384   :  { %v7697_v27 = vmul.f32 %v7696_v56, %v7691_v58  ;;  %v7704_v25 = vadd.f32 %v7702_v26, %v7698_v13 }
0x4386   :  { %v7703_v22 = vadd.f32 %v7702_v26, %v7697_v27  ;;  %7706 = vst.msk [vmem:[#allocation2 + $0x8] sm:$0xff] %vm40_vm0, %v7704_v25 }
0x4388   :  { %7705 = vst.msk [vmem:[#allocation2] sm:$0xff] %vm40_vm0, %v7703_v22 }
0x4389   :  { %9194 = shalt.err (!%p9191_p4)
}
0x438a   :  { %s9221_s1 = smov 128  }
0x438b   :  { %7718 = dma.vmem_to_hbm [thread:$0]  %s7713_s16, 256, %s10909_s6, [#allocation3], %s9221_s1, %s9221_s1, %s9218_s28  }
0x438c   :  { %9203 = dma.done.wait [#allocation3], 256  }
0x438d   :  { %9204 = vsyncadd [#allocation3], 4294967040 }
0x438e   :  { %7722 = vsyncpa [#allocation3], 1 }

</bundles_post_ra>
